<compile_context>
chip_gen: v7x
topology: tpu7x:2x2x1
jax: 0.10.0
libtpu: 0.0.40
codegen_flags: <defaults>
</compile_context>

<pallas_src>
import functools

import jax
import jax.numpy as jnp
from jax.experimental import pallas as pl
from jax.experimental.pallas import tpu as pltpu


def _round_up(v, m):
    return ((v + m - 1) // m) * m


# ----------------------------------------------------------------------------
# Fused kernel: wavefront LSTM stack + last-timestep select + MLP head
# ----------------------------------------------------------------------------
def _fused_lstm_head_kernel(*refs, seq_len, hidden_pad, num_layers):
    """refs = (x, [wihT_l, whhT_l, bias_l] * L, w1T, b1, w2T, b2, out).

    x: (T, TB, I) time-major, one batch tile.  out: (TB, Op).
    Weights are pre-transposed and gate-padded so each gate occupies Hg
    (multiple of 128) lanes -> all gate slices are lane-aligned static slices.
    """
    n_lstm = 3 * num_layers
    x_ref = refs[0]
    lstm_refs = refs[1:1 + n_lstm]
    w1t_ref, b1_ref, w2t_ref, b2_ref = refs[1 + n_lstm:1 + n_lstm + 4]
    out_ref = refs[1 + n_lstm + 4]

    T = seq_len
    L = num_layers
    Hg = hidden_pad
    TB = x_ref.shape[1]
    I0 = x_ref.shape[2]

    def mm(a, w_ref):
        w = w_ref[...]
        return jnp.dot(a.astype(w.dtype), w, preferred_element_type=jnp.float32)

    wih = [lstm_refs[3 * l] for l in range(L)]
    whh = [lstm_refs[3 * l + 1] for l in range(L)]
    bias = [lstm_refs[3 * l + 2][...] for l in range(L)]

    # Hoisted input projection for layer 0 only: one big MXU matmul off the
    # serial chain.  Layers > 0 are fed directly from layer l-1's h_t under the
    # wavefront schedule, so their input projection is inherently per-step.
    x_flat = x_ref[...].reshape(T * TB, I0)
    gx0 = mm(x_flat, wih[0]) + bias[0]                      # (T*TB, 4*Hg) f32

    h = [jnp.zeros((TB, Hg), jnp.float32) for _ in range(L)]
    c = [jnp.zeros((TB, Hg), jnp.float32) for _ in range(L)]

    # Wavefront over the (t + layer) diagonal.  Fully unrolled: T, L static and
    # small, which also gives the LLO scheduler full cross-step visibility.
    for d in range(T + L - 1):
        for l in range(L - 1, -1, -1):   # descending l: reads of h[l-1] see the
            t = d - l                    # previous-diagonal (i.e. timestep t) value
            if t < 0 or t >= T:
                continue
            if l == 0:
                gates = gx0[t * TB:(t + 1) * TB, :] + mm(h[0], whh[0])
            else:
                gates = mm(h[l - 1], wih[l]) + mm(h[l], whh[l]) + bias[l]
            # 128-lane aligned gate slices (free); sigmoid only on i/f/o,
            # tanh only on g (PyTorch gate order: i, f, g, o).
            i_g = jax.nn.sigmoid(gates[:, 0 * Hg:1 * Hg])
            f_g = jax.nn.sigmoid(gates[:, 1 * Hg:2 * Hg])
            g_g = jnp.tanh(gates[:, 2 * Hg:3 * Hg])
            o_g = jax.nn.sigmoid(gates[:, 3 * Hg:4 * Hg])
            c[l] = f_g * c[l] + i_g * g_g
            h[l] = o_g * jnp.tanh(c[l])

    # MLP head on the last timestep of the top layer (dropout is eval identity).
    hid = jnp.maximum(mm(h[L - 1], w1t_ref) + b1_ref[...], 0.0)
    out_ref[...] = mm(hid, w2t_ref) + b2_ref[...]


# ----------------------------------------------------------------------------
# One-time parameter layout prep: transpose, gate-pad to 128-lane blocks, cast
# ----------------------------------------------------------------------------
def prepare_params(params, hidden_size, num_layers, output_size,
                   matmul_dtype=jnp.float32):
    H = hidden_size
    Hg = _round_up(H, 128)
    O = output_size
    Op = _round_up(O, 128)

    def pad_gate_rows(w):
        # (4H, K) -> (4Hg, K): each of the 4 gate blocks padded to Hg rows.
        out = jnp.zeros((4 * Hg,) + w.shape[1:], jnp.float32)
        for k in range(4):
            out = out.at[k * Hg:k * Hg + H].set(w[k * H:(k + 1) * H])
        return out

    args = []
    for l in range(num_layers):
        w_ih, w_hh, b_comb = params["lstm"][l]     # (4H, I_l), (4H, H), b_ih+b_hh
        w_ih_p = pad_gate_rows(w_ih)               # (4Hg, I_l)
        if l > 0:                                  # input of layers>0 is padded h
            w_ih_p = jnp.pad(w_ih_p, ((0, 0), (0, Hg - H)))
        w_hh_p = jnp.pad(pad_gate_rows(w_hh), ((0, 0), (0, Hg - H)))   # (4Hg, Hg)
        b_p = pad_gate_rows(jnp.reshape(b_comb, (4 * H, 1))).reshape(1, 4 * Hg)
        args += [w_ih_p.T.astype(matmul_dtype),
                 w_hh_p.T.astype(matmul_dtype),
                 b_p]                               # bias stays f32

    w1_p = jnp.zeros((Hg, Hg), jnp.float32).at[:H, :H].set(params["w1"])
    b1_p = jnp.zeros((1, Hg), jnp.float32).at[:, :H].set(
        jnp.reshape(params["b1"], (1, H)))
    w2_p = jnp.zeros((Op, Hg), jnp.float32).at[:O, :H].set(params["w2"])
    b2_p = jnp.zeros((1, Op), jnp.float32).at[:, :O].set(
        jnp.reshape(params["b2"], (1, O)))
    args += [w1_p.T.astype(matmul_dtype), b1_p,
             w2_p.T.astype(matmul_dtype), b2_p]
    return args


# ----------------------------------------------------------------------------
# Forward wrapper: x layout plumbing + batch-tiled pallas_call
# ----------------------------------------------------------------------------
def sequence_lstm_forward(x, prepared, *, hidden_size, num_layers, output_size,
                          batch_tile=8):
    """x: (B, T, I) float, batch_first like the PyTorch module."""
    B, T, I = x.shape
    Hg = _round_up(hidden_size, 128)
    Op = _round_up(output_size, 128)
    TB = batch_tile
    Bp = _round_up(B, TB)

    x_tm = jnp.transpose(x, (1, 0, 2)).astype(jnp.float32)    # (T, B, I)
    if Bp != B:
        x_tm = jnp.pad(x_tm, ((0, 0), (0, Bp - B), (0, 0)))

    kernel = functools.partial(_fused_lstm_head_kernel, seq_len=T,
                               hidden_pad=Hg, num_layers=num_layers)

    weight_specs = [pl.BlockSpec(a.shape, lambda b: (0, 0)) for a in prepared]
    out = pl.pallas_call(
        kernel,
        out_shape=jax.ShapeDtypeStruct((Bp, Op), jnp.float32),
        grid=(Bp // TB,),
        in_specs=[pl.BlockSpec((T, TB, I), lambda b: (0, b, 0))] + weight_specs,
        out_specs=pl.BlockSpec((TB, Op), lambda b: (b, 0)),
        compiler_params=pltpu.CompilerParams(
            dimension_semantics=("parallel",)),
    )(x_tm, *prepared)
    return out[:B, :output_size]


# ----------------------------------------------------------------------------
# Parameter init (mirrors PyTorch LSTM/Linear init bounds)
# ----------------------------------------------------------------------------
def init_params(key, input_size, hidden_size, num_layers, output_size):
    params = {"lstm": []}
    k = 1.0 / jnp.sqrt(hidden_size)
    keys = jax.random.split(key, num_layers * 4 + 4)
    ki = 0
    for l in range(num_layers):
        in_sz = input_size if l == 0 else hidden_size
        w_ih = jax.random.uniform(keys[ki], (4 * hidden_size, in_sz),
                                  minval=-k, maxval=k, dtype=jnp.float32); ki += 1
        w_hh = jax.random.uniform(keys[ki], (4 * hidden_size, hidden_size),
                                  minval=-k, maxval=k, dtype=jnp.float32); ki += 1
        b_ih = jax.random.uniform(keys[ki], (4 * hidden_size,),
                                  minval=-k, maxval=k, dtype=jnp.float32); ki += 1
        b_hh = jax.random.uniform(keys[ki], (4 * hidden_size,),
                                  minval=-k, maxval=k, dtype=jnp.float32); ki += 1
        params["lstm"].append((w_ih, w_hh, b_ih + b_hh))
    params["w1"] = jax.random.uniform(keys[ki], (hidden_size, hidden_size),
                                      minval=-k, maxval=k, dtype=jnp.float32); ki += 1
    params["b1"] = jax.random.uniform(keys[ki], (1, hidden_size),
                                      minval=-k, maxval=k, dtype=jnp.float32); ki += 1
    params["w2"] = jax.random.uniform(keys[ki], (output_size, hidden_size),
                                      minval=-k, maxval=k, dtype=jnp.float32); ki += 1
    params["b2"] = jax.random.uniform(keys[ki], (1, output_size),
                                      minval=-k, maxval=k, dtype=jnp.float32); ki += 1
    return params


# ----------------------------------------------------------------------------
# Pure-JAX reference (correctness check of the Pallas kernel)
# ----------------------------------------------------------------------------
def reference_forward(x, params, hidden_size, num_layers):
    h_seq = x.astype(jnp.float32)
    B = x.shape[0]
    H = hidden_size
    for l in range(num_layers):
        w_ih, w_hh, b_comb = params["lstm"][l]
        h_t = jnp.zeros((B, H), jnp.float32)
        c_t = jnp.zeros((B, H), jnp.float32)
        outs = []
        for t in range(x.shape[1]):
            g = h_seq[:, t, :] @ w_ih.T + h_t @ w_hh.T + b_comb.reshape(1, -1)
            i_g = jax.nn.sigmoid(g[:, 0 * H:1 * H])
            f_g = jax.nn.sigmoid(g[:, 1 * H:2 * H])
            g_g = jnp.tanh(g[:, 2 * H:3 * H])
            o_g = jax.nn.sigmoid(g[:, 3 * H:4 * H])
            c_t = f_g * c_t + i_g * g_g
            h_t = o_g * jnp.tanh(c_t)
            outs.append(h_t)
        h_seq = jnp.stack(outs, axis=1)
    last = h_seq[:, -1, :]
    h = jnp.maximum(last @ params["w1"].T + params["b1"], 0.0)
    return h @ params["w2"].T + params["b2"]


if __name__ == "__main__":
    B, T = 2, 8                 # batch, sequence length
    INPUT_SIZE = 16             # per-token feature size (e.g. embedding dim)
    HIDDEN_SIZE = 32
    NUM_LAYERS = 2
    OUTPUT_SIZE = 4

    key = jax.random.PRNGKey(0)
    k_x, k_p = jax.random.split(key)
    x = jax.random.normal(k_x, (B, T, INPUT_SIZE), dtype=jnp.float32)
    params = init_params(k_p, INPUT_SIZE, HIDDEN_SIZE, NUM_LAYERS, OUTPUT_SIZE)

    # f32 matmul operands here to keep a tight parity check; pass
    # matmul_dtype=jnp.bfloat16 for the bf16-native v5e/v6e/v7x MXU path.
    prepared = prepare_params(params, HIDDEN_SIZE, NUM_LAYERS, OUTPUT_SIZE,
                              matmul_dtype=jnp.float32)

    fwd = jax.jit(functools.partial(sequence_lstm_forward,
                                    hidden_size=HIDDEN_SIZE,
                                    num_layers=NUM_LAYERS,
                                    output_size=OUTPUT_SIZE))
    out = fwd(x, prepared)
    out = jax.block_until_ready(out)

    ref = reference_forward(x, params, HIDDEN_SIZE, NUM_LAYERS)
    assert out.shape == (B, OUTPUT_SIZE)
    assert jnp.allclose(out, ref, atol=1e-3, rtol=1e-3), (
        jnp.max(jnp.abs(out - ref)))

    print("KERNEL_OK")
</pallas_src>

<mosaic_0001>
module attributes {stable_mosaic.version = 11 : i64} {
  func.func @_fused_lstm_head_kernel(%arg0: i32, %arg1: memref<8x8x16xf32, #tpu.memory_space<vmem>>, %arg2: memref<16x512xf32, #tpu.memory_space<vmem>>, %arg3: memref<128x512xf32, #tpu.memory_space<vmem>>, %arg4: memref<1x512xf32, #tpu.memory_space<vmem>>, %arg5: memref<128x512xf32, #tpu.memory_space<vmem>>, %arg6: memref<128x512xf32, #tpu.memory_space<vmem>>, %arg7: memref<1x512xf32, #tpu.memory_space<vmem>>, %arg8: memref<128x128xf32, #tpu.memory_space<vmem>>, %arg9: memref<1x128xf32, #tpu.memory_space<vmem>>, %arg10: memref<128x128xf32, #tpu.memory_space<vmem>>, %arg11: memref<1x128xf32, #tpu.memory_space<vmem>>, %arg12: memref<8x128xf32, #tpu.memory_space<vmem>>) attributes {dimension_semantics = [#tpu.dimension_semantics<parallel>], iteration_bounds = array<i64: 1>, scalar_prefetch = 0 : i64, scratch_operands = 0 : i64, tpu.core_type = #tpu.core_type<tc>, window_params = [{transform_indices = @transform_0, window_bounds = array<i64: 8, 8, 16>}, {pipeline_mode = #tpu.pipeline_mode<synchronous>, transform_indices = @transform_1, window_bounds = array<i64: 16, 512>}, {pipeline_mode = #tpu.pipeline_mode<synchronous>, transform_indices = @transform_2, window_bounds = array<i64: 128, 512>}, {pipeline_mode = #tpu.pipeline_mode<synchronous>, transform_indices = @transform_3, window_bounds = array<i64: 1, 512>}, {pipeline_mode = #tpu.pipeline_mode<synchronous>, transform_indices = @transform_4, window_bounds = array<i64: 128, 512>}, {pipeline_mode = #tpu.pipeline_mode<synchronous>, transform_indices = @transform_5, window_bounds = array<i64: 128, 512>}, {pipeline_mode = #tpu.pipeline_mode<synchronous>, transform_indices = @transform_6, window_bounds = array<i64: 1, 512>}, {pipeline_mode = #tpu.pipeline_mode<synchronous>, transform_indices = @transform_7, window_bounds = array<i64: 128, 128>}, {pipeline_mode = #tpu.pipeline_mode<synchronous>, transform_indices = @transform_8, window_bounds = array<i64: 1, 128>}, {pipeline_mode = #tpu.pipeline_mode<synchronous>, transform_indices = @transform_9, window_bounds = array<i64: 128, 128>}, {pipeline_mode = #tpu.pipeline_mode<synchronous>, transform_indices = @transform_10, window_bounds = array<i64: 1, 128>}, {transform_indices = @transform_11, window_bounds = array<i64: 8, 128>}]} {
    %c0 = arith.constant 0 : index
    %c0_0 = arith.constant 0 : index
    %0 = vector.load %arg4[%c0, %c0_0] : memref<1x512xf32, #tpu.memory_space<vmem>>, vector<1x512xf32>
    %c0_1 = arith.constant 0 : index
    %c0_2 = arith.constant 0 : index
    %1 = vector.load %arg7[%c0_1, %c0_2] : memref<1x512xf32, #tpu.memory_space<vmem>>, vector<1x512xf32>
    %c0_3 = arith.constant 0 : index
    %c0_4 = arith.constant 0 : index
    %c0_5 = arith.constant 0 : index
    %2 = vector.load %arg1[%c0_3, %c0_4, %c0_5] : memref<8x8x16xf32, #tpu.memory_space<vmem>>, vector<8x8x16xf32>
    %3 = vector.shape_cast %2 : vector<8x8x16xf32> to vector<64x16xf32>
    %c0_6 = arith.constant 0 : index
    %c0_7 = arith.constant 0 : index
    %4 = vector.load %arg2[%c0_6, %c0_7] : memref<16x512xf32, #tpu.memory_space<vmem>>, vector<16x512xf32>
    %cst = arith.constant dense<0.000000e+00> : vector<64x512xf32>
    %5 = tpu.matmul %3, %4, %cst {dimension_numbers = #tpu.dot_dimension_numbers<[1], [0], [0], [1], [0, 0, 1, 1], [], []>} : vector<64x16xf32>, vector<16x512xf32>, vector<64x512xf32> -> vector<64x512xf32>
    %6 = vector.broadcast %0 : vector<1x512xf32> to vector<64x512xf32>
    %7 = arith.addf %5, %6 : vector<64x512xf32>
    %cst_8 = arith.constant 0.000000e+00 : f32
    %8 = vector.broadcast %cst_8 : f32 to vector<8x128xf32>
    %cst_9 = arith.constant 0.000000e+00 : f32
    %9 = vector.broadcast %cst_9 : f32 to vector<8x128xf32>
    %cst_10 = arith.constant 0.000000e+00 : f32
    %10 = vector.broadcast %cst_10 : f32 to vector<8x128xf32>
    %cst_11 = arith.constant 0.000000e+00 : f32
    %11 = vector.broadcast %cst_11 : f32 to vector<8x128xf32>
    %12 = vector.extract_strided_slice %7 {offsets = [0, 0], sizes = [8, 512], strides = [1, 1]} : vector<64x512xf32> to vector<8x512xf32>
    %c0_12 = arith.constant 0 : index
    %c0_13 = arith.constant 0 : index
    %13 = vector.load %arg3[%c0_12, %c0_13] : memref<128x512xf32, #tpu.memory_space<vmem>>, vector<128x512xf32>
    %cst_14 = arith.constant dense<0.000000e+00> : vector<8x512xf32>
    %14 = tpu.matmul %8, %13, %cst_14 {dimension_numbers = #tpu.dot_dimension_numbers<[1], [0], [0], [1], [0, 0, 1, 1], [], []>} : vector<8x128xf32>, vector<128x512xf32>, vector<8x512xf32> -> vector<8x512xf32>
    %15 = arith.addf %12, %14 : vector<8x512xf32>
    %16 = vector.extract_strided_slice %15 {offsets = [0, 0], sizes = [8, 128], strides = [1, 1]} : vector<8x512xf32> to vector<8x128xf32>
    %17 = arith.negf %16 : vector<8x128xf32>
    %18 = math.exp %17 : vector<8x128xf32>
    %cst_15 = arith.constant 1.000000e+00 : f32
    %19 = vector.broadcast %cst_15 : f32 to vector<8x128xf32>
    %20 = arith.addf %19, %18 : vector<8x128xf32>
    %21 = arith.divf %19, %20 : vector<8x128xf32>
    %22 = vector.extract_strided_slice %15 {offsets = [0, 128], sizes = [8, 128], strides = [1, 1]} : vector<8x512xf32> to vector<8x128xf32>
    %23 = arith.negf %22 : vector<8x128xf32>
    %24 = math.exp %23 : vector<8x128xf32>
    %cst_16 = arith.constant 1.000000e+00 : f32
    %25 = vector.broadcast %cst_16 : f32 to vector<8x128xf32>
    %26 = arith.addf %25, %24 : vector<8x128xf32>
    %27 = arith.divf %25, %26 : vector<8x128xf32>
    %28 = vector.extract_strided_slice %15 {offsets = [0, 256], sizes = [8, 128], strides = [1, 1]} : vector<8x512xf32> to vector<8x128xf32>
    %29 = math.tanh %28 : vector<8x128xf32>
    %30 = vector.extract_strided_slice %15 {offsets = [0, 384], sizes = [8, 128], strides = [1, 1]} : vector<8x512xf32> to vector<8x128xf32>
    %31 = arith.negf %30 : vector<8x128xf32>
    %32 = math.exp %31 : vector<8x128xf32>
    %cst_17 = arith.constant 1.000000e+00 : f32
    %33 = vector.broadcast %cst_17 : f32 to vector<8x128xf32>
    %34 = arith.addf %33, %32 : vector<8x128xf32>
    %35 = arith.divf %33, %34 : vector<8x128xf32>
    %36 = arith.mulf %27, %10 : vector<8x128xf32>
    %37 = arith.mulf %21, %29 : vector<8x128xf32>
    %38 = arith.addf %36, %37 : vector<8x128xf32>
    %39 = math.tanh %38 : vector<8x128xf32>
    %40 = arith.mulf %35, %39 : vector<8x128xf32>
    %c0_18 = arith.constant 0 : index
    %c0_19 = arith.constant 0 : index
    %41 = vector.load %arg5[%c0_18, %c0_19] : memref<128x512xf32, #tpu.memory_space<vmem>>, vector<128x512xf32>
    %cst_20 = arith.constant dense<0.000000e+00> : vector<8x512xf32>
    %42 = tpu.matmul %40, %41, %cst_20 {dimension_numbers = #tpu.dot_dimension_numbers<[1], [0], [0], [1], [0, 0, 1, 1], [], []>} : vector<8x128xf32>, vector<128x512xf32>, vector<8x512xf32> -> vector<8x512xf32>
    %c0_21 = arith.constant 0 : index
    %c0_22 = arith.constant 0 : index
    %43 = vector.load %arg6[%c0_21, %c0_22] : memref<128x512xf32, #tpu.memory_space<vmem>>, vector<128x512xf32>
    %cst_23 = arith.constant dense<0.000000e+00> : vector<8x512xf32>
    %44 = tpu.matmul %9, %43, %cst_23 {dimension_numbers = #tpu.dot_dimension_numbers<[1], [0], [0], [1], [0, 0, 1, 1], [], []>} : vector<8x128xf32>, vector<128x512xf32>, vector<8x512xf32> -> vector<8x512xf32>
    %45 = arith.addf %42, %44 : vector<8x512xf32>
    %46 = vector.broadcast %1 : vector<1x512xf32> to vector<8x512xf32>
    %47 = arith.addf %45, %46 : vector<8x512xf32>
    %48 = vector.extract_strided_slice %47 {offsets = [0, 0], sizes = [8, 128], strides = [1, 1]} : vector<8x512xf32> to vector<8x128xf32>
    %49 = arith.negf %48 : vector<8x128xf32>
    %50 = math.exp %49 : vector<8x128xf32>
    %cst_24 = arith.constant 1.000000e+00 : f32
    %51 = vector.broadcast %cst_24 : f32 to vector<8x128xf32>
    %52 = arith.addf %51, %50 : vector<8x128xf32>
    %53 = arith.divf %51, %52 : vector<8x128xf32>
    %54 = vector.extract_strided_slice %47 {offsets = [0, 128], sizes = [8, 128], strides = [1, 1]} : vector<8x512xf32> to vector<8x128xf32>
    %55 = arith.negf %54 : vector<8x128xf32>
    %56 = math.exp %55 : vector<8x128xf32>
    %cst_25 = arith.constant 1.000000e+00 : f32
    %57 = vector.broadcast %cst_25 : f32 to vector<8x128xf32>
    %58 = arith.addf %57, %56 : vector<8x128xf32>
    %59 = arith.divf %57, %58 : vector<8x128xf32>
    %60 = vector.extract_strided_slice %47 {offsets = [0, 256], sizes = [8, 128], strides = [1, 1]} : vector<8x512xf32> to vector<8x128xf32>
    %61 = math.tanh %60 : vector<8x128xf32>
    %62 = vector.extract_strided_slice %47 {offsets = [0, 384], sizes = [8, 128], strides = [1, 1]} : vector<8x512xf32> to vector<8x128xf32>
    %63 = arith.negf %62 : vector<8x128xf32>
    %64 = math.exp %63 : vector<8x128xf32>
    %cst_26 = arith.constant 1.000000e+00 : f32
    %65 = vector.broadcast %cst_26 : f32 to vector<8x128xf32>
    %66 = arith.addf %65, %64 : vector<8x128xf32>
    %67 = arith.divf %65, %66 : vector<8x128xf32>
    %68 = arith.mulf %59, %11 : vector<8x128xf32>
    %69 = arith.mulf %53, %61 : vector<8x128xf32>
    %70 = arith.addf %68, %69 : vector<8x128xf32>
    %71 = math.tanh %70 : vector<8x128xf32>
    %72 = arith.mulf %67, %71 : vector<8x128xf32>
    %73 = vector.extract_strided_slice %7 {offsets = [8, 0], sizes = [8, 512], strides = [1, 1]} : vector<64x512xf32> to vector<8x512xf32>
    %c0_27 = arith.constant 0 : index
    %c0_28 = arith.constant 0 : index
    %74 = vector.load %arg3[%c0_27, %c0_28] : memref<128x512xf32, #tpu.memory_space<vmem>>, vector<128x512xf32>
    %cst_29 = arith.constant dense<0.000000e+00> : vector<8x512xf32>
    %75 = tpu.matmul %40, %74, %cst_29 {dimension_numbers = #tpu.dot_dimension_numbers<[1], [0], [0], [1], [0, 0, 1, 1], [], []>} : vector<8x128xf32>, vector<128x512xf32>, vector<8x512xf32> -> vector<8x512xf32>
    %76 = arith.addf %73, %75 : vector<8x512xf32>
    %77 = vector.extract_strided_slice %76 {offsets = [0, 0], sizes = [8, 128], strides = [1, 1]} : vector<8x512xf32> to vector<8x128xf32>
    %78 = arith.negf %77 : vector<8x128xf32>
    %79 = math.exp %78 : vector<8x128xf32>
    %cst_30 = arith.constant 1.000000e+00 : f32
    %80 = vector.broadcast %cst_30 : f32 to vector<8x128xf32>
    %81 = arith.addf %80, %79 : vector<8x128xf32>
    %82 = arith.divf %80, %81 : vector<8x128xf32>
    %83 = vector.extract_strided_slice %76 {offsets = [0, 128], sizes = [8, 128], strides = [1, 1]} : vector<8x512xf32> to vector<8x128xf32>
    %84 = arith.negf %83 : vector<8x128xf32>
    %85 = math.exp %84 : vector<8x128xf32>
    %cst_31 = arith.constant 1.000000e+00 : f32
    %86 = vector.broadcast %cst_31 : f32 to vector<8x128xf32>
    %87 = arith.addf %86, %85 : vector<8x128xf32>
    %88 = arith.divf %86, %87 : vector<8x128xf32>
    %89 = vector.extract_strided_slice %76 {offsets = [0, 256], sizes = [8, 128], strides = [1, 1]} : vector<8x512xf32> to vector<8x128xf32>
    %90 = math.tanh %89 : vector<8x128xf32>
    %91 = vector.extract_strided_slice %76 {offsets = [0, 384], sizes = [8, 128], strides = [1, 1]} : vector<8x512xf32> to vector<8x128xf32>
    %92 = arith.negf %91 : vector<8x128xf32>
    %93 = math.exp %92 : vector<8x128xf32>
    %cst_32 = arith.constant 1.000000e+00 : f32
    %94 = vector.broadcast %cst_32 : f32 to vector<8x128xf32>
    %95 = arith.addf %94, %93 : vector<8x128xf32>
    %96 = arith.divf %94, %95 : vector<8x128xf32>
    %97 = arith.mulf %88, %38 : vector<8x128xf32>
    %98 = arith.mulf %82, %90 : vector<8x128xf32>
    %99 = arith.addf %97, %98 : vector<8x128xf32>
    %100 = math.tanh %99 : vector<8x128xf32>
    %101 = arith.mulf %96, %100 : vector<8x128xf32>
    %c0_33 = arith.constant 0 : index
    %c0_34 = arith.constant 0 : index
    %102 = vector.load %arg5[%c0_33, %c0_34] : memref<128x512xf32, #tpu.memory_space<vmem>>, vector<128x512xf32>
    %cst_35 = arith.constant dense<0.000000e+00> : vector<8x512xf32>
    %103 = tpu.matmul %101, %102, %cst_35 {dimension_numbers = #tpu.dot_dimension_numbers<[1], [0], [0], [1], [0, 0, 1, 1], [], []>} : vector<8x128xf32>, vector<128x512xf32>, vector<8x512xf32> -> vector<8x512xf32>
    %c0_36 = arith.constant 0 : index
    %c0_37 = arith.constant 0 : index
    %104 = vector.load %arg6[%c0_36, %c0_37] : memref<128x512xf32, #tpu.memory_space<vmem>>, vector<128x512xf32>
    %cst_38 = arith.constant dense<0.000000e+00> : vector<8x512xf32>
    %105 = tpu.matmul %72, %104, %cst_38 {dimension_numbers = #tpu.dot_dimension_numbers<[1], [0], [0], [1], [0, 0, 1, 1], [], []>} : vector<8x128xf32>, vector<128x512xf32>, vector<8x512xf32> -> vector<8x512xf32>
    %106 = arith.addf %103, %105 : vector<8x512xf32>
    %107 = vector.broadcast %1 : vector<1x512xf32> to vector<8x512xf32>
    %108 = arith.addf %106, %107 : vector<8x512xf32>
    %109 = vector.extract_strided_slice %108 {offsets = [0, 0], sizes = [8, 128], strides = [1, 1]} : vector<8x512xf32> to vector<8x128xf32>
    %110 = arith.negf %109 : vector<8x128xf32>
    %111 = math.exp %110 : vector<8x128xf32>
    %cst_39 = arith.constant 1.000000e+00 : f32
    %112 = vector.broadcast %cst_39 : f32 to vector<8x128xf32>
    %113 = arith.addf %112, %111 : vector<8x128xf32>
    %114 = arith.divf %112, %113 : vector<8x128xf32>
    %115 = vector.extract_strided_slice %108 {offsets = [0, 128], sizes = [8, 128], strides = [1, 1]} : vector<8x512xf32> to vector<8x128xf32>
    %116 = arith.negf %115 : vector<8x128xf32>
    %117 = math.exp %116 : vector<8x128xf32>
    %cst_40 = arith.constant 1.000000e+00 : f32
    %118 = vector.broadcast %cst_40 : f32 to vector<8x128xf32>
    %119 = arith.addf %118, %117 : vector<8x128xf32>
    %120 = arith.divf %118, %119 : vector<8x128xf32>
    %121 = vector.extract_strided_slice %108 {offsets = [0, 256], sizes = [8, 128], strides = [1, 1]} : vector<8x512xf32> to vector<8x128xf32>
    %122 = math.tanh %121 : vector<8x128xf32>
    %123 = vector.extract_strided_slice %108 {offsets = [0, 384], sizes = [8, 128], strides = [1, 1]} : vector<8x512xf32> to vector<8x128xf32>
    %124 = arith.negf %123 : vector<8x128xf32>
    %125 = math.exp %124 : vector<8x128xf32>
    %cst_41 = arith.constant 1.000000e+00 : f32
    %126 = vector.broadcast %cst_41 : f32 to vector<8x128xf32>
    %127 = arith.addf %126, %125 : vector<8x128xf32>
    %128 = arith.divf %126, %127 : vector<8x128xf32>
    %129 = arith.mulf %120, %70 : vector<8x128xf32>
    %130 = arith.mulf %114, %122 : vector<8x128xf32>
    %131 = arith.addf %129, %130 : vector<8x128xf32>
    %132 = math.tanh %131 : vector<8x128xf32>
    %133 = arith.mulf %128, %132 : vector<8x128xf32>
    %134 = vector.extract_strided_slice %7 {offsets = [16, 0], sizes = [8, 512], strides = [1, 1]} : vector<64x512xf32> to vector<8x512xf32>
    %c0_42 = arith.constant 0 : index
    %c0_43 = arith.constant 0 : index
    %135 = vector.load %arg3[%c0_42, %c0_43] : memref<128x512xf32, #tpu.memory_space<vmem>>, vector<128x512xf32>
    %cst_44 = arith.constant dense<0.000000e+00> : vector<8x512xf32>
    %136 = tpu.matmul %101, %135, %cst_44 {dimension_numbers = #tpu.dot_dimension_numbers<[1], [0], [0], [1], [0, 0, 1, 1], [], []>} : vector<8x128xf32>, vector<128x512xf32>, vector<8x512xf32> -> vector<8x512xf32>
    %137 = arith.addf %134, %136 : vector<8x512xf32>
    %138 = vector.extract_strided_slice %137 {offsets = [0, 0], sizes = [8, 128], strides = [1, 1]} : vector<8x512xf32> to vector<8x128xf32>
    %139 = arith.negf %138 : vector<8x128xf32>
    %140 = math.exp %139 : vector<8x128xf32>
    %cst_45 = arith.constant 1.000000e+00 : f32
    %141 = vector.broadcast %cst_45 : f32 to vector<8x128xf32>
    %142 = arith.addf %141, %140 : vector<8x128xf32>
    %143 = arith.divf %141, %142 : vector<8x128xf32>
    %144 = vector.extract_strided_slice %137 {offsets = [0, 128], sizes = [8, 128], strides = [1, 1]} : vector<8x512xf32> to vector<8x128xf32>
    %145 = arith.negf %144 : vector<8x128xf32>
    %146 = math.exp %145 : vector<8x128xf32>
    %cst_46 = arith.constant 1.000000e+00 : f32
    %147 = vector.broadcast %cst_46 : f32 to vector<8x128xf32>
    %148 = arith.addf %147, %146 : vector<8x128xf32>
    %149 = arith.divf %147, %148 : vector<8x128xf32>
    %150 = vector.extract_strided_slice %137 {offsets = [0, 256], sizes = [8, 128], strides = [1, 1]} : vector<8x512xf32> to vector<8x128xf32>
    %151 = math.tanh %150 : vector<8x128xf32>
    %152 = vector.extract_strided_slice %137 {offsets = [0, 384], sizes = [8, 128], strides = [1, 1]} : vector<8x512xf32> to vector<8x128xf32>
    %153 = arith.negf %152 : vector<8x128xf32>
    %154 = math.exp %153 : vector<8x128xf32>
    %cst_47 = arith.constant 1.000000e+00 : f32
    %155 = vector.broadcast %cst_47 : f32 to vector<8x128xf32>
    %156 = arith.addf %155, %154 : vector<8x128xf32>
    %157 = arith.divf %155, %156 : vector<8x128xf32>
    %158 = arith.mulf %149, %99 : vector<8x128xf32>
    %159 = arith.mulf %143, %151 : vector<8x128xf32>
    %160 = arith.addf %158, %159 : vector<8x128xf32>
    %161 = math.tanh %160 : vector<8x128xf32>
    %162 = arith.mulf %157, %161 : vector<8x128xf32>
    %c0_48 = arith.constant 0 : index
    %c0_49 = arith.constant 0 : index
    %163 = vector.load %arg5[%c0_48, %c0_49] : memref<128x512xf32, #tpu.memory_space<vmem>>, vector<128x512xf32>
    %cst_50 = arith.constant dense<0.000000e+00> : vector<8x512xf32>
    %164 = tpu.matmul %162, %163, %cst_50 {dimension_numbers = #tpu.dot_dimension_numbers<[1], [0], [0], [1], [0, 0, 1, 1], [], []>} : vector<8x128xf32>, vector<128x512xf32>, vector<8x512xf32> -> vector<8x512xf32>
    %c0_51 = arith.constant 0 : index
    %c0_52 = arith.constant 0 : index
    %165 = vector.load %arg6[%c0_51, %c0_52] : memref<128x512xf32, #tpu.memory_space<vmem>>, vector<128x512xf32>
    %cst_53 = arith.constant dense<0.000000e+00> : vector<8x512xf32>
    %166 = tpu.matmul %133, %165, %cst_53 {dimension_numbers = #tpu.dot_dimension_numbers<[1], [0], [0], [1], [0, 0, 1, 1], [], []>} : vector<8x128xf32>, vector<128x512xf32>, vector<8x512xf32> -> vector<8x512xf32>
    %167 = arith.addf %164, %166 : vector<8x512xf32>
    %168 = vector.broadcast %1 : vector<1x512xf32> to vector<8x512xf32>
    %169 = arith.addf %167, %168 : vector<8x512xf32>
    %170 = vector.extract_strided_slice %169 {offsets = [0, 0], sizes = [8, 128], strides = [1, 1]} : vector<8x512xf32> to vector<8x128xf32>
    %171 = arith.negf %170 : vector<8x128xf32>
    %172 = math.exp %171 : vector<8x128xf32>
    %cst_54 = arith.constant 1.000000e+00 : f32
    %173 = vector.broadcast %cst_54 : f32 to vector<8x128xf32>
    %174 = arith.addf %173, %172 : vector<8x128xf32>
    %175 = arith.divf %173, %174 : vector<8x128xf32>
    %176 = vector.extract_strided_slice %169 {offsets = [0, 128], sizes = [8, 128], strides = [1, 1]} : vector<8x512xf32> to vector<8x128xf32>
    %177 = arith.negf %176 : vector<8x128xf32>
    %178 = math.exp %177 : vector<8x128xf32>
    %cst_55 = arith.constant 1.000000e+00 : f32
    %179 = vector.broadcast %cst_55 : f32 to vector<8x128xf32>
    %180 = arith.addf %179, %178 : vector<8x128xf32>
    %181 = arith.divf %179, %180 : vector<8x128xf32>
    %182 = vector.extract_strided_slice %169 {offsets = [0, 256], sizes = [8, 128], strides = [1, 1]} : vector<8x512xf32> to vector<8x128xf32>
    %183 = math.tanh %182 : vector<8x128xf32>
    %184 = vector.extract_strided_slice %169 {offsets = [0, 384], sizes = [8, 128], strides = [1, 1]} : vector<8x512xf32> to vector<8x128xf32>
    %185 = arith.negf %184 : vector<8x128xf32>
    %186 = math.exp %185 : vector<8x128xf32>
    %cst_56 = arith.constant 1.000000e+00 : f32
    %187 = vector.broadcast %cst_56 : f32 to vector<8x128xf32>
    %188 = arith.addf %187, %186 : vector<8x128xf32>
    %189 = arith.divf %187, %188 : vector<8x128xf32>
    %190 = arith.mulf %181, %131 : vector<8x128xf32>
    %191 = arith.mulf %175, %183 : vector<8x128xf32>
    %192 = arith.addf %190, %191 : vector<8x128xf32>
    %193 = math.tanh %192 : vector<8x128xf32>
    %194 = arith.mulf %189, %193 : vector<8x128xf32>
    %195 = vector.extract_strided_slice %7 {offsets = [24, 0], sizes = [8, 512], strides = [1, 1]} : vector<64x512xf32> to vector<8x512xf32>
    %c0_57 = arith.constant 0 : index
    %c0_58 = arith.constant 0 : index
    %196 = vector.load %arg3[%c0_57, %c0_58] : memref<128x512xf32, #tpu.memory_space<vmem>>, vector<128x512xf32>
    %cst_59 = arith.constant dense<0.000000e+00> : vector<8x512xf32>
    %197 = tpu.matmul %162, %196, %cst_59 {dimension_numbers = #tpu.dot_dimension_numbers<[1], [0], [0], [1], [0, 0, 1, 1], [], []>} : vector<8x128xf32>, vector<128x512xf32>, vector<8x512xf32> -> vector<8x512xf32>
    %198 = arith.addf %195, %197 : vector<8x512xf32>
    %199 = vector.extract_strided_slice %198 {offsets = [0, 0], sizes = [8, 128], strides = [1, 1]} : vector<8x512xf32> to vector<8x128xf32>
    %200 = arith.negf %199 : vector<8x128xf32>
    %201 = math.exp %200 : vector<8x128xf32>
    %cst_60 = arith.constant 1.000000e+00 : f32
    %202 = vector.broadcast %cst_60 : f32 to vector<8x128xf32>
    %203 = arith.addf %202, %201 : vector<8x128xf32>
    %204 = arith.divf %202, %203 : vector<8x128xf32>
    %205 = vector.extract_strided_slice %198 {offsets = [0, 128], sizes = [8, 128], strides = [1, 1]} : vector<8x512xf32> to vector<8x128xf32>
    %206 = arith.negf %205 : vector<8x128xf32>
    %207 = math.exp %206 : vector<8x128xf32>
    %cst_61 = arith.constant 1.000000e+00 : f32
    %208 = vector.broadcast %cst_61 : f32 to vector<8x128xf32>
    %209 = arith.addf %208, %207 : vector<8x128xf32>
    %210 = arith.divf %208, %209 : vector<8x128xf32>
    %211 = vector.extract_strided_slice %198 {offsets = [0, 256], sizes = [8, 128], strides = [1, 1]} : vector<8x512xf32> to vector<8x128xf32>
    %212 = math.tanh %211 : vector<8x128xf32>
    %213 = vector.extract_strided_slice %198 {offsets = [0, 384], sizes = [8, 128], strides = [1, 1]} : vector<8x512xf32> to vector<8x128xf32>
    %214 = arith.negf %213 : vector<8x128xf32>
    %215 = math.exp %214 : vector<8x128xf32>
    %cst_62 = arith.constant 1.000000e+00 : f32
    %216 = vector.broadcast %cst_62 : f32 to vector<8x128xf32>
    %217 = arith.addf %216, %215 : vector<8x128xf32>
    %218 = arith.divf %216, %217 : vector<8x128xf32>
    %219 = arith.mulf %210, %160 : vector<8x128xf32>
    %220 = arith.mulf %204, %212 : vector<8x128xf32>
    %221 = arith.addf %219, %220 : vector<8x128xf32>
    %222 = math.tanh %221 : vector<8x128xf32>
    %223 = arith.mulf %218, %222 : vector<8x128xf32>
    %c0_63 = arith.constant 0 : index
    %c0_64 = arith.constant 0 : index
    %224 = vector.load %arg5[%c0_63, %c0_64] : memref<128x512xf32, #tpu.memory_space<vmem>>, vector<128x512xf32>
    %cst_65 = arith.constant dense<0.000000e+00> : vector<8x512xf32>
    %225 = tpu.matmul %223, %224, %cst_65 {dimension_numbers = #tpu.dot_dimension_numbers<[1], [0], [0], [1], [0, 0, 1, 1], [], []>} : vector<8x128xf32>, vector<128x512xf32>, vector<8x512xf32> -> vector<8x512xf32>
    %c0_66 = arith.constant 0 : index
    %c0_67 = arith.constant 0 : index
    %226 = vector.load %arg6[%c0_66, %c0_67] : memref<128x512xf32, #tpu.memory_space<vmem>>, vector<128x512xf32>
    %cst_68 = arith.constant dense<0.000000e+00> : vector<8x512xf32>
    %227 = tpu.matmul %194, %226, %cst_68 {dimension_numbers = #tpu.dot_dimension_numbers<[1], [0], [0], [1], [0, 0, 1, 1], [], []>} : vector<8x128xf32>, vector<128x512xf32>, vector<8x512xf32> -> vector<8x512xf32>
    %228 = arith.addf %225, %227 : vector<8x512xf32>
    %229 = vector.broadcast %1 : vector<1x512xf32> to vector<8x512xf32>
    %230 = arith.addf %228, %229 : vector<8x512xf32>
    %231 = vector.extract_strided_slice %230 {offsets = [0, 0], sizes = [8, 128], strides = [1, 1]} : vector<8x512xf32> to vector<8x128xf32>
    %232 = arith.negf %231 : vector<8x128xf32>
    %233 = math.exp %232 : vector<8x128xf32>
    %cst_69 = arith.constant 1.000000e+00 : f32
    %234 = vector.broadcast %cst_69 : f32 to vector<8x128xf32>
    %235 = arith.addf %234, %233 : vector<8x128xf32>
    %236 = arith.divf %234, %235 : vector<8x128xf32>
    %237 = vector.extract_strided_slice %230 {offsets = [0, 128], sizes = [8, 128], strides = [1, 1]} : vector<8x512xf32> to vector<8x128xf32>
    %238 = arith.negf %237 : vector<8x128xf32>
    %239 = math.exp %238 : vector<8x128xf32>
    %cst_70 = arith.constant 1.000000e+00 : f32
    %240 = vector.broadcast %cst_70 : f32 to vector<8x128xf32>
    %241 = arith.addf %240, %239 : vector<8x128xf32>
    %242 = arith.divf %240, %241 : vector<8x128xf32>
    %243 = vector.extract_strided_slice %230 {offsets = [0, 256], sizes = [8, 128], strides = [1, 1]} : vector<8x512xf32> to vector<8x128xf32>
    %244 = math.tanh %243 : vector<8x128xf32>
    %245 = vector.extract_strided_slice %230 {offsets = [0, 384], sizes = [8, 128], strides = [1, 1]} : vector<8x512xf32> to vector<8x128xf32>
    %246 = arith.negf %245 : vector<8x128xf32>
    %247 = math.exp %246 : vector<8x128xf32>
    %cst_71 = arith.constant 1.000000e+00 : f32
    %248 = vector.broadcast %cst_71 : f32 to vector<8x128xf32>
    %249 = arith.addf %248, %247 : vector<8x128xf32>
    %250 = arith.divf %248, %249 : vector<8x128xf32>
    %251 = arith.mulf %242, %192 : vector<8x128xf32>
    %252 = arith.mulf %236, %244 : vector<8x128xf32>
    %253 = arith.addf %251, %252 : vector<8x128xf32>
    %254 = math.tanh %253 : vector<8x128xf32>
    %255 = arith.mulf %250, %254 : vector<8x128xf32>
    %256 = vector.extract_strided_slice %7 {offsets = [32, 0], sizes = [8, 512], strides = [1, 1]} : vector<64x512xf32> to vector<8x512xf32>
    %c0_72 = arith.constant 0 : index
    %c0_73 = arith.constant 0 : index
    %257 = vector.load %arg3[%c0_72, %c0_73] : memref<128x512xf32, #tpu.memory_space<vmem>>, vector<128x512xf32>
    %cst_74 = arith.constant dense<0.000000e+00> : vector<8x512xf32>
    %258 = tpu.matmul %223, %257, %cst_74 {dimension_numbers = #tpu.dot_dimension_numbers<[1], [0], [0], [1], [0, 0, 1, 1], [], []>} : vector<8x128xf32>, vector<128x512xf32>, vector<8x512xf32> -> vector<8x512xf32>
    %259 = arith.addf %256, %258 : vector<8x512xf32>
    %260 = vector.extract_strided_slice %259 {offsets = [0, 0], sizes = [8, 128], strides = [1, 1]} : vector<8x512xf32> to vector<8x128xf32>
    %261 = arith.negf %260 : vector<8x128xf32>
    %262 = math.exp %261 : vector<8x128xf32>
    %cst_75 = arith.constant 1.000000e+00 : f32
    %263 = vector.broadcast %cst_75 : f32 to vector<8x128xf32>
    %264 = arith.addf %263, %262 : vector<8x128xf32>
    %265 = arith.divf %263, %264 : vector<8x128xf32>
    %266 = vector.extract_strided_slice %259 {offsets = [0, 128], sizes = [8, 128], strides = [1, 1]} : vector<8x512xf32> to vector<8x128xf32>
    %267 = arith.negf %266 : vector<8x128xf32>
    %268 = math.exp %267 : vector<8x128xf32>
    %cst_76 = arith.constant 1.000000e+00 : f32
    %269 = vector.broadcast %cst_76 : f32 to vector<8x128xf32>
    %270 = arith.addf %269, %268 : vector<8x128xf32>
    %271 = arith.divf %269, %270 : vector<8x128xf32>
    %272 = vector.extract_strided_slice %259 {offsets = [0, 256], sizes = [8, 128], strides = [1, 1]} : vector<8x512xf32> to vector<8x128xf32>
    %273 = math.tanh %272 : vector<8x128xf32>
    %274 = vector.extract_strided_slice %259 {offsets = [0, 384], sizes = [8, 128], strides = [1, 1]} : vector<8x512xf32> to vector<8x128xf32>
    %275 = arith.negf %274 : vector<8x128xf32>
    %276 = math.exp %275 : vector<8x128xf32>
    %cst_77 = arith.constant 1.000000e+00 : f32
    %277 = vector.broadcast %cst_77 : f32 to vector<8x128xf32>
    %278 = arith.addf %277, %276 : vector<8x128xf32>
    %279 = arith.divf %277, %278 : vector<8x128xf32>
    %280 = arith.mulf %271, %221 : vector<8x128xf32>
    %281 = arith.mulf %265, %273 : vector<8x128xf32>
    %282 = arith.addf %280, %281 : vector<8x128xf32>
    %283 = math.tanh %282 : vector<8x128xf32>
    %284 = arith.mulf %279, %283 : vector<8x128xf32>
    %c0_78 = arith.constant 0 : index
    %c0_79 = arith.constant 0 : index
    %285 = vector.load %arg5[%c0_78, %c0_79] : memref<128x512xf32, #tpu.memory_space<vmem>>, vector<128x512xf32>
    %cst_80 = arith.constant dense<0.000000e+00> : vector<8x512xf32>
    %286 = tpu.matmul %284, %285, %cst_80 {dimension_numbers = #tpu.dot_dimension_numbers<[1], [0], [0], [1], [0, 0, 1, 1], [], []>} : vector<8x128xf32>, vector<128x512xf32>, vector<8x512xf32> -> vector<8x512xf32>
    %c0_81 = arith.constant 0 : index
    %c0_82 = arith.constant 0 : index
    %287 = vector.load %arg6[%c0_81, %c0_82] : memref<128x512xf32, #tpu.memory_space<vmem>>, vector<128x512xf32>
    %cst_83 = arith.constant dense<0.000000e+00> : vector<8x512xf32>
    %288 = tpu.matmul %255, %287, %cst_83 {dimension_numbers = #tpu.dot_dimension_numbers<[1], [0], [0], [1], [0, 0, 1, 1], [], []>} : vector<8x128xf32>, vector<128x512xf32>, vector<8x512xf32> -> vector<8x512xf32>
    %289 = arith.addf %286, %288 : vector<8x512xf32>
    %290 = vector.broadcast %1 : vector<1x512xf32> to vector<8x512xf32>
    %291 = arith.addf %289, %290 : vector<8x512xf32>
    %292 = vector.extract_strided_slice %291 {offsets = [0, 0], sizes = [8, 128], strides = [1, 1]} : vector<8x512xf32> to vector<8x128xf32>
    %293 = arith.negf %292 : vector<8x128xf32>
    %294 = math.exp %293 : vector<8x128xf32>
    %cst_84 = arith.constant 1.000000e+00 : f32
    %295 = vector.broadcast %cst_84 : f32 to vector<8x128xf32>
    %296 = arith.addf %295, %294 : vector<8x128xf32>
    %297 = arith.divf %295, %296 : vector<8x128xf32>
    %298 = vector.extract_strided_slice %291 {offsets = [0, 128], sizes = [8, 128], strides = [1, 1]} : vector<8x512xf32> to vector<8x128xf32>
    %299 = arith.negf %298 : vector<8x128xf32>
    %300 = math.exp %299 : vector<8x128xf32>
    %cst_85 = arith.constant 1.000000e+00 : f32
    %301 = vector.broadcast %cst_85 : f32 to vector<8x128xf32>
    %302 = arith.addf %301, %300 : vector<8x128xf32>
    %303 = arith.divf %301, %302 : vector<8x128xf32>
    %304 = vector.extract_strided_slice %291 {offsets = [0, 256], sizes = [8, 128], strides = [1, 1]} : vector<8x512xf32> to vector<8x128xf32>
    %305 = math.tanh %304 : vector<8x128xf32>
    %306 = vector.extract_strided_slice %291 {offsets = [0, 384], sizes = [8, 128], strides = [1, 1]} : vector<8x512xf32> to vector<8x128xf32>
    %307 = arith.negf %306 : vector<8x128xf32>
    %308 = math.exp %307 : vector<8x128xf32>
    %cst_86 = arith.constant 1.000000e+00 : f32
    %309 = vector.broadcast %cst_86 : f32 to vector<8x128xf32>
    %310 = arith.addf %309, %308 : vector<8x128xf32>
    %311 = arith.divf %309, %310 : vector<8x128xf32>
    %312 = arith.mulf %303, %253 : vector<8x128xf32>
    %313 = arith.mulf %297, %305 : vector<8x128xf32>
    %314 = arith.addf %312, %313 : vector<8x128xf32>
    %315 = math.tanh %314 : vector<8x128xf32>
    %316 = arith.mulf %311, %315 : vector<8x128xf32>
    %317 = vector.extract_strided_slice %7 {offsets = [40, 0], sizes = [8, 512], strides = [1, 1]} : vector<64x512xf32> to vector<8x512xf32>
    %c0_87 = arith.constant 0 : index
    %c0_88 = arith.constant 0 : index
    %318 = vector.load %arg3[%c0_87, %c0_88] : memref<128x512xf32, #tpu.memory_space<vmem>>, vector<128x512xf32>
    %cst_89 = arith.constant dense<0.000000e+00> : vector<8x512xf32>
    %319 = tpu.matmul %284, %318, %cst_89 {dimension_numbers = #tpu.dot_dimension_numbers<[1], [0], [0], [1], [0, 0, 1, 1], [], []>} : vector<8x128xf32>, vector<128x512xf32>, vector<8x512xf32> -> vector<8x512xf32>
    %320 = arith.addf %317, %319 : vector<8x512xf32>
    %321 = vector.extract_strided_slice %320 {offsets = [0, 0], sizes = [8, 128], strides = [1, 1]} : vector<8x512xf32> to vector<8x128xf32>
    %322 = arith.negf %321 : vector<8x128xf32>
    %323 = math.exp %322 : vector<8x128xf32>
    %cst_90 = arith.constant 1.000000e+00 : f32
    %324 = vector.broadcast %cst_90 : f32 to vector<8x128xf32>
    %325 = arith.addf %324, %323 : vector<8x128xf32>
    %326 = arith.divf %324, %325 : vector<8x128xf32>
    %327 = vector.extract_strided_slice %320 {offsets = [0, 128], sizes = [8, 128], strides = [1, 1]} : vector<8x512xf32> to vector<8x128xf32>
    %328 = arith.negf %327 : vector<8x128xf32>
    %329 = math.exp %328 : vector<8x128xf32>
    %cst_91 = arith.constant 1.000000e+00 : f32
    %330 = vector.broadcast %cst_91 : f32 to vector<8x128xf32>
    %331 = arith.addf %330, %329 : vector<8x128xf32>
    %332 = arith.divf %330, %331 : vector<8x128xf32>
    %333 = vector.extract_strided_slice %320 {offsets = [0, 256], sizes = [8, 128], strides = [1, 1]} : vector<8x512xf32> to vector<8x128xf32>
    %334 = math.tanh %333 : vector<8x128xf32>
    %335 = vector.extract_strided_slice %320 {offsets = [0, 384], sizes = [8, 128], strides = [1, 1]} : vector<8x512xf32> to vector<8x128xf32>
    %336 = arith.negf %335 : vector<8x128xf32>
    %337 = math.exp %336 : vector<8x128xf32>
    %cst_92 = arith.constant 1.000000e+00 : f32
    %338 = vector.broadcast %cst_92 : f32 to vector<8x128xf32>
    %339 = arith.addf %338, %337 : vector<8x128xf32>
    %340 = arith.divf %338, %339 : vector<8x128xf32>
    %341 = arith.mulf %332, %282 : vector<8x128xf32>
    %342 = arith.mulf %326, %334 : vector<8x128xf32>
    %343 = arith.addf %341, %342 : vector<8x128xf32>
    %344 = math.tanh %343 : vector<8x128xf32>
    %345 = arith.mulf %340, %344 : vector<8x128xf32>
    %c0_93 = arith.constant 0 : index
    %c0_94 = arith.constant 0 : index
    %346 = vector.load %arg5[%c0_93, %c0_94] : memref<128x512xf32, #tpu.memory_space<vmem>>, vector<128x512xf32>
    %cst_95 = arith.constant dense<0.000000e+00> : vector<8x512xf32>
    %347 = tpu.matmul %345, %346, %cst_95 {dimension_numbers = #tpu.dot_dimension_numbers<[1], [0], [0], [1], [0, 0, 1, 1], [], []>} : vector<8x128xf32>, vector<128x512xf32>, vector<8x512xf32> -> vector<8x512xf32>
    %c0_96 = arith.constant 0 : index
    %c0_97 = arith.constant 0 : index
    %348 = vector.load %arg6[%c0_96, %c0_97] : memref<128x512xf32, #tpu.memory_space<vmem>>, vector<128x512xf32>
    %cst_98 = arith.constant dense<0.000000e+00> : vector<8x512xf32>
    %349 = tpu.matmul %316, %348, %cst_98 {dimension_numbers = #tpu.dot_dimension_numbers<[1], [0], [0], [1], [0, 0, 1, 1], [], []>} : vector<8x128xf32>, vector<128x512xf32>, vector<8x512xf32> -> vector<8x512xf32>
    %350 = arith.addf %347, %349 : vector<8x512xf32>
    %351 = vector.broadcast %1 : vector<1x512xf32> to vector<8x512xf32>
    %352 = arith.addf %350, %351 : vector<8x512xf32>
    %353 = vector.extract_strided_slice %352 {offsets = [0, 0], sizes = [8, 128], strides = [1, 1]} : vector<8x512xf32> to vector<8x128xf32>
    %354 = arith.negf %353 : vector<8x128xf32>
    %355 = math.exp %354 : vector<8x128xf32>
    %cst_99 = arith.constant 1.000000e+00 : f32
    %356 = vector.broadcast %cst_99 : f32 to vector<8x128xf32>
    %357 = arith.addf %356, %355 : vector<8x128xf32>
    %358 = arith.divf %356, %357 : vector<8x128xf32>
    %359 = vector.extract_strided_slice %352 {offsets = [0, 128], sizes = [8, 128], strides = [1, 1]} : vector<8x512xf32> to vector<8x128xf32>
    %360 = arith.negf %359 : vector<8x128xf32>
    %361 = math.exp %360 : vector<8x128xf32>
    %cst_100 = arith.constant 1.000000e+00 : f32
    %362 = vector.broadcast %cst_100 : f32 to vector<8x128xf32>
    %363 = arith.addf %362, %361 : vector<8x128xf32>
    %364 = arith.divf %362, %363 : vector<8x128xf32>
    %365 = vector.extract_strided_slice %352 {offsets = [0, 256], sizes = [8, 128], strides = [1, 1]} : vector<8x512xf32> to vector<8x128xf32>
    %366 = math.tanh %365 : vector<8x128xf32>
    %367 = vector.extract_strided_slice %352 {offsets = [0, 384], sizes = [8, 128], strides = [1, 1]} : vector<8x512xf32> to vector<8x128xf32>
    %368 = arith.negf %367 : vector<8x128xf32>
    %369 = math.exp %368 : vector<8x128xf32>
    %cst_101 = arith.constant 1.000000e+00 : f32
    %370 = vector.broadcast %cst_101 : f32 to vector<8x128xf32>
    %371 = arith.addf %370, %369 : vector<8x128xf32>
    %372 = arith.divf %370, %371 : vector<8x128xf32>
    %373 = arith.mulf %364, %314 : vector<8x128xf32>
    %374 = arith.mulf %358, %366 : vector<8x128xf32>
    %375 = arith.addf %373, %374 : vector<8x128xf32>
    %376 = math.tanh %375 : vector<8x128xf32>
    %377 = arith.mulf %372, %376 : vector<8x128xf32>
    %378 = vector.extract_strided_slice %7 {offsets = [48, 0], sizes = [8, 512], strides = [1, 1]} : vector<64x512xf32> to vector<8x512xf32>
    %c0_102 = arith.constant 0 : index
    %c0_103 = arith.constant 0 : index
    %379 = vector.load %arg3[%c0_102, %c0_103] : memref<128x512xf32, #tpu.memory_space<vmem>>, vector<128x512xf32>
    %cst_104 = arith.constant dense<0.000000e+00> : vector<8x512xf32>
    %380 = tpu.matmul %345, %379, %cst_104 {dimension_numbers = #tpu.dot_dimension_numbers<[1], [0], [0], [1], [0, 0, 1, 1], [], []>} : vector<8x128xf32>, vector<128x512xf32>, vector<8x512xf32> -> vector<8x512xf32>
    %381 = arith.addf %378, %380 : vector<8x512xf32>
    %382 = vector.extract_strided_slice %381 {offsets = [0, 0], sizes = [8, 128], strides = [1, 1]} : vector<8x512xf32> to vector<8x128xf32>
    %383 = arith.negf %382 : vector<8x128xf32>
    %384 = math.exp %383 : vector<8x128xf32>
    %cst_105 = arith.constant 1.000000e+00 : f32
    %385 = vector.broadcast %cst_105 : f32 to vector<8x128xf32>
    %386 = arith.addf %385, %384 : vector<8x128xf32>
    %387 = arith.divf %385, %386 : vector<8x128xf32>
    %388 = vector.extract_strided_slice %381 {offsets = [0, 128], sizes = [8, 128], strides = [1, 1]} : vector<8x512xf32> to vector<8x128xf32>
    %389 = arith.negf %388 : vector<8x128xf32>
    %390 = math.exp %389 : vector<8x128xf32>
    %cst_106 = arith.constant 1.000000e+00 : f32
    %391 = vector.broadcast %cst_106 : f32 to vector<8x128xf32>
    %392 = arith.addf %391, %390 : vector<8x128xf32>
    %393 = arith.divf %391, %392 : vector<8x128xf32>
    %394 = vector.extract_strided_slice %381 {offsets = [0, 256], sizes = [8, 128], strides = [1, 1]} : vector<8x512xf32> to vector<8x128xf32>
    %395 = math.tanh %394 : vector<8x128xf32>
    %396 = vector.extract_strided_slice %381 {offsets = [0, 384], sizes = [8, 128], strides = [1, 1]} : vector<8x512xf32> to vector<8x128xf32>
    %397 = arith.negf %396 : vector<8x128xf32>
    %398 = math.exp %397 : vector<8x128xf32>
    %cst_107 = arith.constant 1.000000e+00 : f32
    %399 = vector.broadcast %cst_107 : f32 to vector<8x128xf32>
    %400 = arith.addf %399, %398 : vector<8x128xf32>
    %401 = arith.divf %399, %400 : vector<8x128xf32>
    %402 = arith.mulf %393, %343 : vector<8x128xf32>
    %403 = arith.mulf %387, %395 : vector<8x128xf32>
    %404 = arith.addf %402, %403 : vector<8x128xf32>
    %405 = math.tanh %404 : vector<8x128xf32>
    %406 = arith.mulf %401, %405 : vector<8x128xf32>
    %c0_108 = arith.constant 0 : index
    %c0_109 = arith.constant 0 : index
    %407 = vector.load %arg5[%c0_108, %c0_109] : memref<128x512xf32, #tpu.memory_space<vmem>>, vector<128x512xf32>
    %cst_110 = arith.constant dense<0.000000e+00> : vector<8x512xf32>
    %408 = tpu.matmul %406, %407, %cst_110 {dimension_numbers = #tpu.dot_dimension_numbers<[1], [0], [0], [1], [0, 0, 1, 1], [], []>} : vector<8x128xf32>, vector<128x512xf32>, vector<8x512xf32> -> vector<8x512xf32>
    %c0_111 = arith.constant 0 : index
    %c0_112 = arith.constant 0 : index
    %409 = vector.load %arg6[%c0_111, %c0_112] : memref<128x512xf32, #tpu.memory_space<vmem>>, vector<128x512xf32>
    %cst_113 = arith.constant dense<0.000000e+00> : vector<8x512xf32>
    %410 = tpu.matmul %377, %409, %cst_113 {dimension_numbers = #tpu.dot_dimension_numbers<[1], [0], [0], [1], [0, 0, 1, 1], [], []>} : vector<8x128xf32>, vector<128x512xf32>, vector<8x512xf32> -> vector<8x512xf32>
    %411 = arith.addf %408, %410 : vector<8x512xf32>
    %412 = vector.broadcast %1 : vector<1x512xf32> to vector<8x512xf32>
    %413 = arith.addf %411, %412 : vector<8x512xf32>
    %414 = vector.extract_strided_slice %413 {offsets = [0, 0], sizes = [8, 128], strides = [1, 1]} : vector<8x512xf32> to vector<8x128xf32>
    %415 = arith.negf %414 : vector<8x128xf32>
    %416 = math.exp %415 : vector<8x128xf32>
    %cst_114 = arith.constant 1.000000e+00 : f32
    %417 = vector.broadcast %cst_114 : f32 to vector<8x128xf32>
    %418 = arith.addf %417, %416 : vector<8x128xf32>
    %419 = arith.divf %417, %418 : vector<8x128xf32>
    %420 = vector.extract_strided_slice %413 {offsets = [0, 128], sizes = [8, 128], strides = [1, 1]} : vector<8x512xf32> to vector<8x128xf32>
    %421 = arith.negf %420 : vector<8x128xf32>
    %422 = math.exp %421 : vector<8x128xf32>
    %cst_115 = arith.constant 1.000000e+00 : f32
    %423 = vector.broadcast %cst_115 : f32 to vector<8x128xf32>
    %424 = arith.addf %423, %422 : vector<8x128xf32>
    %425 = arith.divf %423, %424 : vector<8x128xf32>
    %426 = vector.extract_strided_slice %413 {offsets = [0, 256], sizes = [8, 128], strides = [1, 1]} : vector<8x512xf32> to vector<8x128xf32>
    %427 = math.tanh %426 : vector<8x128xf32>
    %428 = vector.extract_strided_slice %413 {offsets = [0, 384], sizes = [8, 128], strides = [1, 1]} : vector<8x512xf32> to vector<8x128xf32>
    %429 = arith.negf %428 : vector<8x128xf32>
    %430 = math.exp %429 : vector<8x128xf32>
    %cst_116 = arith.constant 1.000000e+00 : f32
    %431 = vector.broadcast %cst_116 : f32 to vector<8x128xf32>
    %432 = arith.addf %431, %430 : vector<8x128xf32>
    %433 = arith.divf %431, %432 : vector<8x128xf32>
    %434 = arith.mulf %425, %375 : vector<8x128xf32>
    %435 = arith.mulf %419, %427 : vector<8x128xf32>
    %436 = arith.addf %434, %435 : vector<8x128xf32>
    %437 = math.tanh %436 : vector<8x128xf32>
    %438 = arith.mulf %433, %437 : vector<8x128xf32>
    %439 = vector.extract_strided_slice %7 {offsets = [56, 0], sizes = [8, 512], strides = [1, 1]} : vector<64x512xf32> to vector<8x512xf32>
    %c0_117 = arith.constant 0 : index
    %c0_118 = arith.constant 0 : index
    %440 = vector.load %arg3[%c0_117, %c0_118] : memref<128x512xf32, #tpu.memory_space<vmem>>, vector<128x512xf32>
    %cst_119 = arith.constant dense<0.000000e+00> : vector<8x512xf32>
    %441 = tpu.matmul %406, %440, %cst_119 {dimension_numbers = #tpu.dot_dimension_numbers<[1], [0], [0], [1], [0, 0, 1, 1], [], []>} : vector<8x128xf32>, vector<128x512xf32>, vector<8x512xf32> -> vector<8x512xf32>
    %442 = arith.addf %439, %441 : vector<8x512xf32>
    %443 = vector.extract_strided_slice %442 {offsets = [0, 0], sizes = [8, 128], strides = [1, 1]} : vector<8x512xf32> to vector<8x128xf32>
    %444 = arith.negf %443 : vector<8x128xf32>
    %445 = math.exp %444 : vector<8x128xf32>
    %cst_120 = arith.constant 1.000000e+00 : f32
    %446 = vector.broadcast %cst_120 : f32 to vector<8x128xf32>
    %447 = arith.addf %446, %445 : vector<8x128xf32>
    %448 = arith.divf %446, %447 : vector<8x128xf32>
    %449 = vector.extract_strided_slice %442 {offsets = [0, 128], sizes = [8, 128], strides = [1, 1]} : vector<8x512xf32> to vector<8x128xf32>
    %450 = arith.negf %449 : vector<8x128xf32>
    %451 = math.exp %450 : vector<8x128xf32>
    %cst_121 = arith.constant 1.000000e+00 : f32
    %452 = vector.broadcast %cst_121 : f32 to vector<8x128xf32>
    %453 = arith.addf %452, %451 : vector<8x128xf32>
    %454 = arith.divf %452, %453 : vector<8x128xf32>
    %455 = vector.extract_strided_slice %442 {offsets = [0, 256], sizes = [8, 128], strides = [1, 1]} : vector<8x512xf32> to vector<8x128xf32>
    %456 = math.tanh %455 : vector<8x128xf32>
    %457 = vector.extract_strided_slice %442 {offsets = [0, 384], sizes = [8, 128], strides = [1, 1]} : vector<8x512xf32> to vector<8x128xf32>
    %458 = arith.negf %457 : vector<8x128xf32>
    %459 = math.exp %458 : vector<8x128xf32>
    %cst_122 = arith.constant 1.000000e+00 : f32
    %460 = vector.broadcast %cst_122 : f32 to vector<8x128xf32>
    %461 = arith.addf %460, %459 : vector<8x128xf32>
    %462 = arith.divf %460, %461 : vector<8x128xf32>
    %463 = arith.mulf %454, %404 : vector<8x128xf32>
    %464 = arith.mulf %448, %456 : vector<8x128xf32>
    %465 = arith.addf %463, %464 : vector<8x128xf32>
    %466 = math.tanh %465 : vector<8x128xf32>
    %467 = arith.mulf %462, %466 : vector<8x128xf32>
    %c0_123 = arith.constant 0 : index
    %c0_124 = arith.constant 0 : index
    %468 = vector.load %arg5[%c0_123, %c0_124] : memref<128x512xf32, #tpu.memory_space<vmem>>, vector<128x512xf32>
    %cst_125 = arith.constant dense<0.000000e+00> : vector<8x512xf32>
    %469 = tpu.matmul %467, %468, %cst_125 {dimension_numbers = #tpu.dot_dimension_numbers<[1], [0], [0], [1], [0, 0, 1, 1], [], []>} : vector<8x128xf32>, vector<128x512xf32>, vector<8x512xf32> -> vector<8x512xf32>
    %c0_126 = arith.constant 0 : index
    %c0_127 = arith.constant 0 : index
    %470 = vector.load %arg6[%c0_126, %c0_127] : memref<128x512xf32, #tpu.memory_space<vmem>>, vector<128x512xf32>
    %cst_128 = arith.constant dense<0.000000e+00> : vector<8x512xf32>
    %471 = tpu.matmul %438, %470, %cst_128 {dimension_numbers = #tpu.dot_dimension_numbers<[1], [0], [0], [1], [0, 0, 1, 1], [], []>} : vector<8x128xf32>, vector<128x512xf32>, vector<8x512xf32> -> vector<8x512xf32>
    %472 = arith.addf %469, %471 : vector<8x512xf32>
    %473 = vector.broadcast %1 : vector<1x512xf32> to vector<8x512xf32>
    %474 = arith.addf %472, %473 : vector<8x512xf32>
    %475 = vector.extract_strided_slice %474 {offsets = [0, 0], sizes = [8, 128], strides = [1, 1]} : vector<8x512xf32> to vector<8x128xf32>
    %476 = arith.negf %475 : vector<8x128xf32>
    %477 = math.exp %476 : vector<8x128xf32>
    %cst_129 = arith.constant 1.000000e+00 : f32
    %478 = vector.broadcast %cst_129 : f32 to vector<8x128xf32>
    %479 = arith.addf %478, %477 : vector<8x128xf32>
    %480 = arith.divf %478, %479 : vector<8x128xf32>
    %481 = vector.extract_strided_slice %474 {offsets = [0, 128], sizes = [8, 128], strides = [1, 1]} : vector<8x512xf32> to vector<8x128xf32>
    %482 = arith.negf %481 : vector<8x128xf32>
    %483 = math.exp %482 : vector<8x128xf32>
    %cst_130 = arith.constant 1.000000e+00 : f32
    %484 = vector.broadcast %cst_130 : f32 to vector<8x128xf32>
    %485 = arith.addf %484, %483 : vector<8x128xf32>
    %486 = arith.divf %484, %485 : vector<8x128xf32>
    %487 = vector.extract_strided_slice %474 {offsets = [0, 256], sizes = [8, 128], strides = [1, 1]} : vector<8x512xf32> to vector<8x128xf32>
    %488 = math.tanh %487 : vector<8x128xf32>
    %489 = vector.extract_strided_slice %474 {offsets = [0, 384], sizes = [8, 128], strides = [1, 1]} : vector<8x512xf32> to vector<8x128xf32>
    %490 = arith.negf %489 : vector<8x128xf32>
    %491 = math.exp %490 : vector<8x128xf32>
    %cst_131 = arith.constant 1.000000e+00 : f32
    %492 = vector.broadcast %cst_131 : f32 to vector<8x128xf32>
    %493 = arith.addf %492, %491 : vector<8x128xf32>
    %494 = arith.divf %492, %493 : vector<8x128xf32>
    %495 = arith.mulf %486, %436 : vector<8x128xf32>
    %496 = arith.mulf %480, %488 : vector<8x128xf32>
    %497 = arith.addf %495, %496 : vector<8x128xf32>
    %498 = math.tanh %497 : vector<8x128xf32>
    %499 = arith.mulf %494, %498 : vector<8x128xf32>
    %c0_132 = arith.constant 0 : index
    %c0_133 = arith.constant 0 : index
    %500 = vector.load %arg8[%c0_132, %c0_133] : memref<128x128xf32, #tpu.memory_space<vmem>>, vector<128x128xf32>
    %cst_134 = arith.constant dense<0.000000e+00> : vector<8x128xf32>
    %501 = tpu.matmul %499, %500, %cst_134 {dimension_numbers = #tpu.dot_dimension_numbers<[1], [0], [0], [1], [0, 0, 1, 1], [], []>} : vector<8x128xf32>, vector<128x128xf32>, vector<8x128xf32> -> vector<8x128xf32>
    %c0_135 = arith.constant 0 : index
    %c0_136 = arith.constant 0 : index
    %502 = vector.load %arg9[%c0_135, %c0_136] : memref<1x128xf32, #tpu.memory_space<vmem>>, vector<1x128xf32>
    %503 = vector.broadcast %502 : vector<1x128xf32> to vector<8x128xf32>
    %504 = arith.addf %501, %503 : vector<8x128xf32>
    %cst_137 = arith.constant 0.000000e+00 : f32
    %505 = vector.broadcast %cst_137 : f32 to vector<8x128xf32>
    %506 = arith.maximumf %504, %505 : vector<8x128xf32>
    %c0_138 = arith.constant 0 : index
    %c0_139 = arith.constant 0 : index
    %507 = vector.load %arg10[%c0_138, %c0_139] : memref<128x128xf32, #tpu.memory_space<vmem>>, vector<128x128xf32>
    %cst_140 = arith.constant dense<0.000000e+00> : vector<8x128xf32>
    %508 = tpu.matmul %506, %507, %cst_140 {dimension_numbers = #tpu.dot_dimension_numbers<[1], [0], [0], [1], [0, 0, 1, 1], [], []>} : vector<8x128xf32>, vector<128x128xf32>, vector<8x128xf32> -> vector<8x128xf32>
    %c0_141 = arith.constant 0 : index
    %c0_142 = arith.constant 0 : index
    %509 = vector.load %arg11[%c0_141, %c0_142] : memref<1x128xf32, #tpu.memory_space<vmem>>, vector<1x128xf32>
    %510 = vector.broadcast %509 : vector<1x128xf32> to vector<8x128xf32>
    %511 = arith.addf %508, %510 : vector<8x128xf32>
    %c0_143 = arith.constant 0 : index
    %c0_144 = arith.constant 0 : index
    %512 = vector.load %arg12[%c0_143, %c0_144] : memref<8x128xf32, #tpu.memory_space<vmem>>, vector<8x128xf32>
    tpu.vector_store %arg12[%c0_143, %c0_144], %511 {strides = array<i32>} : memref<8x128xf32, #tpu.memory_space<vmem>>, vector<8x128xf32>,
    return
  }
  func.func @transform_0(%arg0: i32) -> (i32, i32, i32) {
    %c0_i32 = arith.constant 0 : i32
    %c0_i32_0 = arith.constant 0 : i32
    %c0_i32_1 = arith.constant 0 : i32
    return %c0_i32, %arg0, %c0_i32_0 : i32, i32, i32
  }
  func.func @transform_1(%arg0: i32) -> (i32, i32) {
    %c0_i32 = arith.constant 0 : i32
    %c0_i32_0 = arith.constant 0 : i32
    %c0_i32_1 = arith.constant 0 : i32
    return %c0_i32, %c0_i32_0 : i32, i32
  }
  func.func @transform_2(%arg0: i32) -> (i32, i32) {
    %c0_i32 = arith.constant 0 : i32
    %c0_i32_0 = arith.constant 0 : i32
    %c0_i32_1 = arith.constant 0 : i32
    return %c0_i32, %c0_i32_0 : i32, i32
  }
  func.func @transform_3(%arg0: i32) -> (i32, i32) {
    %c0_i32 = arith.constant 0 : i32
    %c0_i32_0 = arith.constant 0 : i32
    %c0_i32_1 = arith.constant 0 : i32
    return %c0_i32, %c0_i32_0 : i32, i32
  }
  func.func @transform_4(%arg0: i32) -> (i32, i32) {
    %c0_i32 = arith.constant 0 : i32
    %c0_i32_0 = arith.constant 0 : i32
    %c0_i32_1 = arith.constant 0 : i32
    return %c0_i32, %c0_i32_0 : i32, i32
  }
  func.func @transform_5(%arg0: i32) -> (i32, i32) {
    %c0_i32 = arith.constant 0 : i32
    %c0_i32_0 = arith.constant 0 : i32
    %c0_i32_1 = arith.constant 0 : i32
    return %c0_i32, %c0_i32_0 : i32, i32
  }
  func.func @transform_6(%arg0: i32) -> (i32, i32) {
    %c0_i32 = arith.constant 0 : i32
    %c0_i32_0 = arith.constant 0 : i32
    %c0_i32_1 = arith.constant 0 : i32
    return %c0_i32, %c0_i32_0 : i32, i32
  }
  func.func @transform_7(%arg0: i32) -> (i32, i32) {
    %c0_i32 = arith.constant 0 : i32
    %c0_i32_0 = arith.constant 0 : i32
    %c0_i32_1 = arith.constant 0 : i32
    return %c0_i32, %c0_i32_0 : i32, i32
  }
  func.func @transform_8(%arg0: i32) -> (i32, i32) {
    %c0_i32 = arith.constant 0 : i32
    %c0_i32_0 = arith.constant 0 : i32
    %c0_i32_1 = arith.constant 0 : i32
    return %c0_i32, %c0_i32_0 : i32, i32
  }
  func.func @transform_9(%arg0: i32) -> (i32, i32) {
    %c0_i32 = arith.constant 0 : i32
    %c0_i32_0 = arith.constant 0 : i32
    %c0_i32_1 = arith.constant 0 : i32
    return %c0_i32, %c0_i32_0 : i32, i32
  }
  func.func @transform_10(%arg0: i32) -> (i32, i32) {
    %c0_i32 = arith.constant 0 : i32
    %c0_i32_0 = arith.constant 0 : i32
    %c0_i32_1 = arith.constant 0 : i32
    return %c0_i32, %c0_i32_0 : i32, i32
  }
  func.func @transform_11(%arg0: i32) -> (i32, i32) {
    %c0_i32 = arith.constant 0 : i32
    %c0_i32_0 = arith.constant 0 : i32
    return %arg0, %c0_i32 : i32, i32
  }
}

</mosaic_0001>

<bundles_post_ra>
// kernel: sequence_lstm_forward.1
= control target key start
LH: loop header
LB: loop body
LE: loop exit
PB: predicated region body
PF: predicated region fallthrough
CT: control target
= control target key end

     0   :  { %16 = vsyncpa [#allocation3], 0  ;;  %s8367_s0 = inlined_call_operand.vmem [shape: f32[8,8,16], index: 0, kind: input, shape index: {}]   ;;  %s8368_s1 = inlined_call_operand.hbm [shape: f32[16,512], index: 1, kind: input, shape index: {}]   ;;  %s8369_s2 = inlined_call_operand.hbm [shape: f32[128,512], index: 2, kind: input, shape index: {}]   ;;  %s8370_s3 = inlined_call_operand.vmem [shape: f32[1,512], index: 3, kind: input, shape index: {}]   ;;  %s8371_s4 = inlined_call_operand.hbm [shape: f32[128,512], index: 4, kind: input, shape index: {}]   ;;  %s8372_s5 = inlined_call_operand.hbm [shape: f32[128,512], index: 5, kind: input, shape index: {}]   ;;  %s8373_s6 = inlined_call_operand.vmem [shape: f32[1,512], index: 6, kind: input, shape index: {}]   ;;  %s8374_s7 = inlined_call_operand.vmem [shape: f32[128,128], index: 7, kind: input, shape index: {}]   ;;  %s8375_s8 = inlined_call_operand.vmem [shape: f32[1,128], index: 8, kind: input, shape index: {}]   ;;  %s8376_s9 = inlined_call_operand.hbm [shape: f32[128,128], index: 9, kind: input, shape index: {}]   ;;  %s8377_s10 = inlined_call_operand.vmem [shape: f32[1,128], index: 10, kind: input, shape index: {}]   ;;  %s8378_s11 = inlined_call_operand.vmem [shape: f32[8,128], index: 11, kind: output, shape index: {}]  }
   0x1   :  { %17 = vsyncpa [#allocation5], 0 }
   0x2   :  { %18 = vsyncpa [#allocation8], 0  ;;  %s6902_s17 = smov [#allocation4]   ;;  %s6903_s19 = smov [#allocation7]  }
   0x3   :  { %s38_s18 = sshll.u32 %s6902_s17, 4  ;;  %s64_s20 = sshll.u32 %s6903_s19, 4  ;;  %s39_s18 = int_to_ptr.vmem [resolvable:$true] %s38_s18  ;;  %s6974_s20 = int_to_ptr.vmem [resolvable:$true] %s64_s20 }
   0x4   :  { %s6786_s23 = scalar_lea.hbm %s8369_s2, 8192 }
   0x5   :  { %p6787_p0 = scmp.ne.s32.totalorder %s8369_s2, %s6786_s23  ;;  %p6790_p1 = scmp.lt.u32.totalorder %s6786_s23, %s8369_s2 }
   0x7   :  { %p6792_p2 = pnand %p6790_p1, %p6787_p0 }
   0x9   :  { %6795 = shalt.err (!%p6792_p2)
}
   0xa   :  { %s6796_s28 = scalar_lea.vmem %s39_s18, 8192  ;;  %p6801_p4 = scmp.lt.s32.totalorder %s39_s18, %s39_s18 }
   0xb   :  { %p6797_p3 = scmp.ne.s32.totalorder %s39_s18, %s6796_s28  ;;  %p6802_p5 = scmp.lt.s32.totalorder %s6796_s28, %s6796_s28 }
   0xd   :  { %p6803_p6 = por %p6802_p5, %p6801_p4 }
   0xf   :  { %p6804_p7 = pnand %p6803_p6, %p6797_p3 }
  0x11   :  { %6807 = shalt.err (!%p6804_p7)
}
  0x12   :  { %s6904_s29 = smov 512   ;;  %s6905_s30 = smov 32  }
  0x13   :  { %44 = dma.hbm_to_vmem [thread:$0]  %s8369_s2, 8192, %s39_s18, [#allocation5], %s6904_s29, %s6904_s29, %s6905_s30  }
  0x14   :  { %s6808_s16 = scalar_lea.hbm %s8372_s5, 8192 }
  0x15   :  { %p6809_p8 = scmp.ne.s32.totalorder %s8372_s5, %s6808_s16  ;;  %p6812_p9 = scmp.lt.u32.totalorder %s6808_s16, %s8372_s5 }
  0x17   :  { %p6814_p10 = pnand %p6812_p9, %p6809_p8 }
  0x19   :  { %6817 = shalt.err (!%p6814_p10)
}
  0x1a   :  { %s6818_s23 = scalar_lea.vmem %s6974_s20, 8192  ;;  %p6823_p12 = scmp.lt.s32.totalorder %s6974_s20, %s6974_s20 }
  0x1b   :  { %p6819_p11 = scmp.ne.s32.totalorder %s6974_s20, %s6818_s23  ;;  %p6824_p13 = scmp.lt.s32.totalorder %s6818_s23, %s6818_s23 }
  0x1d   :  { %p6825_p0 = por %p6824_p13, %p6823_p12 }
  0x1f   :  { %p6826_p1 = pnand %p6825_p0, %p6819_p11 }
  0x21   :  { %6829 = shalt.err (!%p6826_p1)
}
  0x22   :  { %70 = dma.hbm_to_vmem [thread:$0]  %s8372_s5, 8192, %s6974_s20, [#allocation8], %s6904_s29, %s6904_s29, %s6905_s30  }
  0x23   :  { %s6906_s24 = smov [#allocation2]   ;;  %s6907_s26 = smov [#allocation6]  }
  0x24   :  { %s26_s25 = sshll.u32 %s6906_s24, 4  ;;  %s52_s27 = sshll.u32 %s6907_s26, 4  ;;  %s27_s25 = int_to_ptr.vmem [resolvable:$true] %s26_s25  ;;  %s7011_s27 = int_to_ptr.vmem [resolvable:$true] %s52_s27 }
  0x25   :  { %s6830_s13 = scalar_lea.hbm %s8368_s1, 1024 }
  0x26   :  { %p6831_p2 = scmp.ne.s32.totalorder %s8368_s1, %s6830_s13  ;;  %p6834_p3 = scmp.lt.u32.totalorder %s6830_s13, %s8368_s1 }
  0x28   :  { %p6836_p4 = pnand %p6834_p3, %p6831_p2 }
  0x2a   :  { %6839 = shalt.err (!%p6836_p4)
}
  0x2b   :  { %s6840_s5 = scalar_lea.vmem %s27_s25, 1024  ;;  %p6845_p6 = scmp.lt.s32.totalorder %s27_s25, %s27_s25 }
  0x2c   :  { %p6841_p5 = scmp.ne.s32.totalorder %s27_s25, %s6840_s5  ;;  %p6846_p7 = scmp.lt.s32.totalorder %s6840_s5, %s6840_s5 }
  0x2e   :  { %p6847_p8 = por %p6846_p7, %p6845_p6 }
  0x30   :  { %p6848_p9 = pnand %p6847_p8, %p6841_p5 }
  0x32   :  { %6851 = shalt.err (!%p6848_p9)
}
  0x33   :  { %32 = dma.hbm_to_vmem [thread:$0]  %s8368_s1, 1024, %s27_s25, [#allocation3], %s6904_s29, %s6904_s29, %s6905_s30  }
  0x34   :  { %s6852_s23 = scalar_lea.hbm %s8371_s4, 8192 }
  0x35   :  { %p6853_p10 = scmp.ne.s32.totalorder %s8371_s4, %s6852_s23  ;;  %p6856_p11 = scmp.lt.u32.totalorder %s6852_s23, %s8371_s4 }
  0x37   :  { %p6858_p12 = pnand %p6856_p11, %p6853_p10 }
  0x39   :  { %6861 = shalt.err (!%p6858_p12)
}
  0x3a   :  { %s6862_s28 = scalar_lea.vmem %s7011_s27, 8192  ;;  %p6867_p0 = scmp.lt.s32.totalorder %s7011_s27, %s7011_s27 }
  0x3b   :  { %p6863_p13 = scmp.ne.s32.totalorder %s7011_s27, %s6862_s28  ;;  %p6868_p1 = scmp.lt.s32.totalorder %s6862_s28, %s6862_s28 }
  0x3d   :  { %p6869_p2 = por %p6868_p1, %p6867_p0 }
  0x3f   :  { %p6870_p3 = pnand %p6869_p2, %p6863_p13 }
  0x41   :  { %6873 = shalt.err (!%p6870_p3)
}
  0x42   :  { %58 = dma.hbm_to_vmem [thread:$0]  %s8371_s4, 8192, %s7011_s27, [#allocation5], %s6904_s29, %s6904_s29, %s6905_s30  }
  0x43   :  { %s6908_s12 = smov [#allocation9]   ;;  %s6874_s16 = scalar_lea.hbm %s8376_s9, 2048 }
  0x44   :  { %s82_s13 = sshll.u32 %s6908_s12, 4  ;;  %p6875_p4 = scmp.ne.s32.totalorder %s8376_s9, %s6874_s16  ;;  %s83_s13 = int_to_ptr.vmem [resolvable:$true] %s82_s13 }
  0x45   :  { %p6878_p5 = scmp.lt.u32.totalorder %s6874_s16, %s8376_s9 }
  0x47   :  { %p6880_p6 = pnand %p6878_p5, %p6875_p4 }
  0x49   :  { %6883 = shalt.err (!%p6880_p6)
}
  0x4a   :  { %s6884_s21 = scalar_lea.vmem %s83_s13, 2048  ;;  %p6889_p8 = scmp.lt.s32.totalorder %s83_s13, %s83_s13 }
  0x4b   :  { %p6885_p7 = scmp.ne.s32.totalorder %s83_s13, %s6884_s21  ;;  %p6890_p9 = scmp.lt.s32.totalorder %s6884_s21, %s6884_s21 }
  0x4d   :  { %p6891_p10 = por %p6890_p9, %p6889_p8 }
  0x4f   :  { %p6892_p11 = pnand %p6891_p10, %p6885_p7 }
  0x51   :  { %6895 = shalt.err (!%p6892_p11)
}
  0x52   :  { %s6909_s4 = smov 128   ;;  %s6910_s29 = smov 8  }
  0x53   :  { %88 = dma.hbm_to_vmem [thread:$0]  %s8376_s9, 2048, %s83_s13, [#allocation8], %s6909_s4, %s6909_s4, %s6910_s29  }
  0x54   :  { %6896 = dma.done.wait [#allocation3], 1024  }
  0x55   :  { %6897 = vsyncadd [#allocation3], 4294966272 }
  0x56   :  { %6898 = dma.done.wait [#allocation5], 16384  }
  0x57   :  { %6899 = vsyncadd [#allocation5], 4294950912 }
  0x58   :  { %6900 = dma.done.wait [#allocation8], 10240  }
  0x59   :  { %6901 = vsyncadd [#allocation8], 4294957056  ;;  %v8379_v0 = vmov 0.0   ;;  %v117_v1 = vld [vmem:[#allocation2 + $0x8] sm:$0xff]  ;;  %v119_v3 = vld [vmem:[#allocation2 + $0x18] sm:$0xff]  ;;  %vm145_vm0 = vcmask 130048  }
  0x5a   :  { %234 = vmatprep.mubr.f32.mxu0 %v8379_v0  ;;  %347 = vmatprep.mubr.f32.mxu1 %v8379_v0  ;;  %v121_v2 = vld [vmem:[#allocation2 + $0x28] sm:$0xff]  ;;  %v123_v5 = vld [vmem:[#allocation2 + $0x38] sm:$0xff]  ;;  %v116_v6 = vld [vmem:[#allocation2] sm:$0xff]  ;;  %vm6913_vm1 = vmmov 0  }
  0x5b   :  { %v4830_v4 = vpack.c.bf16 %v121_v2, %v117_v1  ;;  %v120_v7 = vld [vmem:[#allocation2 + $0x20] sm:$0xff]  ;;  %v4834_v8 = vpack.c.bf16 %v123_v5, %v119_v3  ;;  %v118_v10 = vld [vmem:[#allocation2 + $0x10] sm:$0xff]  ;;  %v397_v14 = vld [vmem:[#allocation4 + $0x8] sm:$0xff] }
  0x5c   :  { %v4832_v9 = vpack.c.bf16 %v120_v7, %v116_v6  ;;  %v122_v11 = vld [vmem:[#allocation2 + $0x30] sm:$0xff]  ;;  %v108_v12 = vld [vmem:[%s8367_s0] sm:$0xff]  ;;  %v401_v15 = vld [vmem:[#allocation4 + $0x28] sm:$0xff] }
  0x5d   :  { %4831 = vmatprep.subr.bf16.mxu0 %v4830_v4  ;;  %v4836_v13 = vpack.c.bf16 %v122_v11, %v118_v10  ;;  %v399_v16 = vld [vmem:[#allocation4 + $0x18] sm:$0xff]  ;;  %4835 = vmatprep.subr.bf16.mxu1 %v4834_v8  ;;  %v7065_v17 = vpack.c.bf16 %v401_v15, %v397_v14  ;;  %v396_v19 = vld [vmem:[#allocation4] sm:$0xff]  ;;  %v398_v23 = vld [vmem:[#allocation4 + $0x10] sm:$0xff] }
  0x5e   :  { %4833 = vmatpush1.bf16.msra.mxu0 %v4832_v9  ;;  %v403_v18 = vld [vmem:[#allocation4 + $0x38] sm:$0xff]  ;;  %v400_v20 = vld [vmem:[#allocation4 + $0x20] sm:$0xff]  ;;  %v402_v24 = vld [vmem:[#allocation4 + $0x30] sm:$0xff] }
  0x5f   :  { %8580 = vst [vmem:[#allocation13_spill] sm:$0xff] %v7065_v17  ;;  %4837 = vmatpush1.bf16.msra.mxu1 %v4836_v13  ;;  %v7067_v21 = vpack.c.bf16 %v403_v18, %v399_v16  ;;  %v7069_v22 = vpack.c.bf16 %v400_v20, %v396_v19  ;;  %4839 = vmatprep.subr.bf16.mxu0 %v7065_v17  ;;  %v405_v26 = vld [vmem:[#allocation4 + $0x48] sm:$0xff]  ;;  %v407_v28 = vld [vmem:[#allocation4 + $0x58] sm:$0xff]  ;;  %v404_v31 = vld [vmem:[#allocation4 + $0x40] sm:$0xff] }
  0x60   :  { %v7072_v25 = vpack.c.bf16 %v402_v24, %v398_v23  ;;  %v409_v27 = vld [vmem:[#allocation4 + $0x68] sm:$0xff]  ;;  %v411_v30 = vld [vmem:[#allocation4 + $0x78] sm:$0xff]  ;;  %v408_v32 = vld [vmem:[#allocation4 + $0x60] sm:$0xff] }
  0x61   :  { %8581 = vst [vmem:[#allocation14_spill] sm:$0xff] %v7067_v21  ;;  %4660 = vmatmul.mubr.msk.f32.vlgmr.msra.gmra.mrb[0].mxu0 %vm145_vm0, %v108_v12  ;;  %4871 = vmatprep.subr.bf16.mxu1 %v7067_v21  ;;  %v7076_v29 = vpack.c.bf16 %v409_v27, %v405_v26  ;;  %v109_v33 = vld [vmem:[%s8367_s0 + $0x8] sm:$0xff]  ;;  %v7083_v34 = vpack.c.bf16 %v411_v30, %v407_v28  ;;  %v406_v36 = vld [vmem:[#allocation4 + $0x50] sm:$0xff]  ;;  %v415_v41 = vld [vmem:[#allocation4 + $0x98] sm:$0xff] }
  0x62   :  { %4668 = vmatmul.mubr.msk.f32.vlgmr.msra.gmra.mrb[0].mxu1 %vm145_vm0, %v108_v12  ;;  %4841 = vmatpush1.bf16.msra.mxu0 %v7069_v22  ;;  %v7085_v35 = vpack.c.bf16 %v408_v32, %v404_v31  ;;  %v410_v37 = vld [vmem:[#allocation4 + $0x70] sm:$0xff]  ;;  %v413_v39 = vld [vmem:[#allocation4 + $0x88] sm:$0xff]  ;;  %v419_v43 = vld [vmem:[#allocation4 + $0xb8] sm:$0xff] }
  0x63   :  { %4873 = vmatpush1.bf16.msra.mxu1 %v7072_v25  ;;  %240 = vmatprep.mubr.f32.mxu0 %v8379_v0  ;;  %v7089_v38 = vpack.c.bf16 %v410_v37, %v406_v36  ;;  %v417_v40 = vld [vmem:[#allocation4 + $0xa8] sm:$0xff]  ;;  %v412_v44 = vld [vmem:[#allocation4 + $0x80] sm:$0xff]  ;;  %v110_v46 = vld [vmem:[%s8367_s0 + $0x10] sm:$0xff]  ;;  %v7100_v47 = vpack.c.bf16 %v419_v43, %v415_v41 }
  0x64   :  { %353 = vmatprep.mubr.f32.mxu1 %v8379_v0  ;;  %4843 = vmatprep.subr.bf16.mxu0 %v7076_v29  ;;  %v7093_v42 = vpack.c.bf16 %v417_v40, %v413_v39  ;;  %v416_v45 = vld [vmem:[#allocation4 + $0xa0] sm:$0xff]  ;;  %v414_v48 = vld [vmem:[#allocation4 + $0x90] sm:$0xff]  ;;  %v421_v51 = vld [vmem:[#allocation4 + $0xc8] sm:$0xff] }
  0x65   :  { %4661 = vmatmul.mubr.msk.f32.gmra.mrb[2].mxu0 %vm145_vm0, %v109_v33  ;;  %4875 = vmatprep.subr.bf16.mxu1 %v7083_v34  ;;  %8583 = vst [vmem:[#allocation16_spill] sm:$0xff] %v7100_v47  ;;  %v418_v49 = vld [vmem:[#allocation4 + $0xb0] sm:$0xff]  ;;  %v7104_v50 = vpack.c.bf16 %v416_v45, %v412_v44  ;;  %v425_v52 = vld [vmem:[#allocation4 + $0xe8] sm:$0xff]  ;;  %v423_v53 = vld [vmem:[#allocation4 + $0xd8] sm:$0xff] }
  0x66   :  { %8582 = vst [vmem:[#allocation15_spill] sm:$0xff] %v7093_v42  ;;  %4669 = vmatmul.mubr.msk.f32.gmra.mrb[2].mxu1 %vm145_vm0, %v109_v33  ;;  %4845 = vmatpush1.bf16.msra.mxu0 %v7085_v35  ;;  %v7108_v54 = vpack.c.bf16 %v418_v49, %v414_v48  ;;  %v427_v55 = vld [vmem:[#allocation4 + $0xf8] sm:$0xff]  ;;  %v420_v56 = vld [vmem:[#allocation4 + $0xc0] sm:$0xff]  ;;  %v7112_v58 = vpack.c.bf16 %v425_v52, %v421_v51  ;;  %v422_v59 = vld [vmem:[#allocation4 + $0xd0] sm:$0xff] }
  0x67   :  { %8584 = vst [vmem:[#allocation17_spill] sm:$0xff] %v7104_v50  ;;  %4877 = vmatpush1.bf16.msra.mxu1 %v7089_v38  ;;  %246 = vmatprep.mubr.f32.mxu0 %v8379_v0  ;;  %v424_v57 = vld [vmem:[#allocation4 + $0xe0] sm:$0xff]  ;;  %v426_v60 = vld [vmem:[#allocation4 + $0xf0] sm:$0xff]  ;;  %v7116_v61 = vpack.c.bf16 %v427_v55, %v423_v53  ;;  %v429_v62 = vld [vmem:[#allocation4 + $0x108] sm:$0xff] }
  0x68   :  { %8585 = vst [vmem:[#allocation18_spill] sm:$0xff] %v7108_v54  ;;  %359 = vmatprep.mubr.f32.mxu1 %v8379_v0  ;;  %4847 = vmatprep.subr.bf16.mxu0 %v7093_v42  ;;  %8586 = vst [vmem:[#allocation19_spill] sm:$0xff] %v7112_v58  ;;  %v433_v63 = vld [vmem:[#allocation4 + $0x128] sm:$0xff]  ;;  %v111_v1 = vld [vmem:[%s8367_s0 + $0x18] sm:$0xff]  ;;  %v7123_v2 = vpack.c.bf16 %v424_v57, %v420_v56  ;;  %v7127_v5 = vpack.c.bf16 %v426_v60, %v422_v59 }
  0x69   :  { %4662 = vmatmul.mubr.msk.f32.gmra.mrb[4].mxu0 %vm145_vm0, %v110_v46  ;;  %4879 = vmatprep.subr.bf16.mxu1 %v7100_v47  ;;  %8587 = vst [vmem:[#allocation20_spill] sm:$0xff] %v7116_v61  ;;  %v431_v3 = vld [vmem:[#allocation4 + $0x118] sm:$0xff]  ;;  %v428_v6 = vld [vmem:[#allocation4 + $0x100] sm:$0xff]  ;;  %v7131_v8 = vpack.c.bf16 %v433_v63, %v429_v62  ;;  %v430_v9 = vld [vmem:[#allocation4 + $0x110] sm:$0xff] }
  0x6a   :  { %4670 = vmatmul.mubr.msk.f32.gmra.mrb[4].mxu1 %vm145_vm0, %v110_v46  ;;  %4849 = vmatpush1.bf16.msra.mxu0 %v7104_v50  ;;  %8588 = vst [vmem:[#allocation21_spill] sm:$0xff] %v7123_v2  ;;  %v435_v4 = vld [vmem:[#allocation4 + $0x138] sm:$0xff]  ;;  %8589 = vst [vmem:[#allocation22_spill] sm:$0xff] %v7127_v5  ;;  %v432_v7 = vld [vmem:[#allocation4 + $0x120] sm:$0xff] }
  0x6b   :  { %4881 = vmatpush1.bf16.msra.mxu1 %v7108_v54  ;;  %252 = vmatprep.mubr.f32.mxu0 %v8379_v0  ;;  %8590 = vst [vmem:[#allocation23_spill] sm:$0xff] %v7131_v8  ;;  %v434_v10 = vld [vmem:[#allocation4 + $0x130] sm:$0xff]  ;;  %v7135_v11 = vpack.c.bf16 %v435_v4, %v431_v3  ;;  %v437_v12 = vld [vmem:[#allocation4 + $0x148] sm:$0xff]  ;;  %v112_v14 = vld [vmem:[%s8367_s0 + $0x20] sm:$0xff]  ;;  %v7142_v15 = vpack.c.bf16 %v432_v7, %v428_v6 }
  0x6c   :  { %365 = vmatprep.mubr.f32.mxu1 %v8379_v0  ;;  %4851 = vmatprep.subr.bf16.mxu0 %v7112_v58  ;;  %v441_v13 = vld [vmem:[#allocation4 + $0x168] sm:$0xff]  ;;  %v439_v16 = vld [vmem:[#allocation4 + $0x158] sm:$0xff]  ;;  %v7146_v19 = vpack.c.bf16 %v434_v10, %v430_v9  ;;  %v436_v20 = vld [vmem:[#allocation4 + $0x140] sm:$0xff] }
  0x6d   :  { %4663 = vmatmul.mubr.msk.f32.gmra.mrb[6].mxu0 %vm145_vm0, %v111_v1  ;;  %4883 = vmatprep.subr.bf16.mxu1 %v7116_v61  ;;  %8591 = vst [vmem:[#allocation24_spill] sm:$0xff] %v7135_v11  ;;  %8592 = vst [vmem:[#allocation25_spill] sm:$0xff] %v7142_v15  ;;  %v443_v18 = vld [vmem:[#allocation4 + $0x178] sm:$0xff]  ;;  %v440_v23 = vld [vmem:[#allocation4 + $0x160] sm:$0xff]  ;;  %v7150_v24 = vpack.c.bf16 %v441_v13, %v437_v12 }
  0x6e   :  { %4671 = vmatmul.mubr.msk.f32.gmra.mrb[6].mxu1 %vm145_vm0, %v111_v1  ;;  %4853 = vmatpush1.bf16.msra.mxu0 %v7123_v2  ;;  %8593 = vst [vmem:[#allocation26_spill] sm:$0xff] %v7146_v19  ;;  %v438_v26 = vld [vmem:[#allocation4 + $0x150] sm:$0xff]  ;;  %v7154_v28 = vpack.c.bf16 %v443_v18, %v439_v16  ;;  %v445_v30 = vld [vmem:[#allocation4 + $0x188] sm:$0xff]  ;;  %v7161_v33 = vpack.c.bf16 %v440_v23, %v436_v20  ;;  %v447_v36 = vld [vmem:[#allocation4 + $0x198] sm:$0xff] }
  0x6f   :  { %4885 = vmatpush1.bf16.msra.mxu1 %v7127_v5  ;;  %258 = vmatprep.mubr.f32.mxu0 %v8379_v0  ;;  %8594 = vst [vmem:[#allocation27_spill] sm:$0xff] %v7150_v24  ;;  %v442_v27 = vld [vmem:[#allocation4 + $0x170] sm:$0xff]  ;;  %v449_v31 = vld [vmem:[#allocation4 + $0x1a8] sm:$0xff]  ;;  %v451_v37 = vld [vmem:[#allocation4 + $0x1b8] sm:$0xff] }
  0x70   :  { %371 = vmatprep.mubr.f32.mxu1 %v8379_v0  ;;  %4855 = vmatprep.subr.bf16.mxu0 %v7131_v8  ;;  %8595 = vst [vmem:[#allocation28_spill] sm:$0xff] %v7154_v28  ;;  %v113_v32 = vld [vmem:[%s8367_s0 + $0x28] sm:$0xff]  ;;  %8596 = vst [vmem:[#allocation29_spill] sm:$0xff] %v7161_v33  ;;  %v7165_v39 = vpack.c.bf16 %v442_v27, %v438_v26  ;;  %v444_v40 = vld [vmem:[#allocation4 + $0x180] sm:$0xff]  ;;  %v7169_v43 = vpack.c.bf16 %v449_v31, %v445_v30 }
  0x71   :  { %4664 = vmatmul.mubr.msk.f32.gmra.mrb[8].mxu0 %vm145_vm0, %v112_v14  ;;  %4887 = vmatprep.subr.bf16.mxu1 %v7135_v11  ;;  %v448_v41 = vld [vmem:[#allocation4 + $0x1a0] sm:$0xff]  ;;  %v446_v44 = vld [vmem:[#allocation4 + $0x190] sm:$0xff]  ;;  %v7173_v46 = vpack.c.bf16 %v451_v37, %v447_v36  ;;  %v453_v48 = vld [vmem:[#allocation4 + $0x1c8] sm:$0xff] }
  0x72   :  { %4672 = vmatmul.mubr.msk.f32.gmra.mrb[8].mxu1 %vm145_vm0, %v112_v14  ;;  %4857 = vmatpush1.bf16.msra.mxu0 %v7142_v15  ;;  %8597 = vst [vmem:[#allocation30_spill] sm:$0xff] %v7165_v39  ;;  %8598 = vst [vmem:[#allocation31_spill] sm:$0xff] %v7169_v43  ;;  %v450_v45 = vld [vmem:[#allocation4 + $0x1b0] sm:$0xff]  ;;  %v457_v49 = vld [vmem:[#allocation4 + $0x1e8] sm:$0xff]  ;;  %v7180_v52 = vpack.c.bf16 %v448_v41, %v444_v40 }
  0x73   :  { %4889 = vmatpush1.bf16.msra.mxu1 %v7146_v19  ;;  %264 = vmatprep.mubr.f32.mxu0 %v8379_v0  ;;  %8599 = vst [vmem:[#allocation32_spill] sm:$0xff] %v7173_v46  ;;  %v114_v51 = vld [vmem:[%s8367_s0 + $0x30] sm:$0xff]  ;;  %v455_v53 = vld [vmem:[#allocation4 + $0x1d8] sm:$0xff]  ;;  %v7184_v56 = vpack.c.bf16 %v450_v45, %v446_v44  ;;  %v452_v57 = vld [vmem:[#allocation4 + $0x1c0] sm:$0xff]  ;;  %v7188_v60 = vpack.c.bf16 %v457_v49, %v453_v48 }
  0x74   :  { %377 = vmatprep.mubr.f32.mxu1 %v8379_v0  ;;  %4859 = vmatprep.subr.bf16.mxu0 %v7150_v24  ;;  %8600 = vst [vmem:[#allocation33_spill] sm:$0xff] %v7180_v52  ;;  %v459_v55 = vld [vmem:[#allocation4 + $0x1f8] sm:$0xff]  ;;  %v456_v59 = vld [vmem:[#allocation4 + $0x1e0] sm:$0xff]  ;;  %v454_v62 = vld [vmem:[#allocation4 + $0x1d0] sm:$0xff] }
  0x75   :  { %4665 = vmatmul.mubr.msk.f32.gmra.mrb[10].mxu0 %vm145_vm0, %v113_v32  ;;  %4891 = vmatprep.subr.bf16.mxu1 %v7154_v28  ;;  %8601 = vst [vmem:[#allocation34_spill] sm:$0xff] %v7184_v56  ;;  %8602 = vst [vmem:[#allocation35_spill] sm:$0xff] %v7188_v60  ;;  %v458_v63 = vld [vmem:[#allocation4 + $0x1f0] sm:$0xff]  ;;  %v7192_v1 = vpack.c.bf16 %v459_v55, %v455_v53  ;;  %v695_v3 = vld [vmem:[#allocation7 + $0x8] sm:$0xff]  ;;  %v7199_v7 = vpack.c.bf16 %v456_v59, %v452_v57 }
  0x76   :  { %4673 = vmatmul.mubr.msk.f32.gmra.mrb[10].mxu1 %vm145_vm0, %v113_v32  ;;  %4861 = vmatpush1.bf16.msra.mxu0 %v7161_v33  ;;  %v699_v4 = vld [vmem:[#allocation7 + $0x28] sm:$0xff]  ;;  %v115_v6 = vld [vmem:[%s8367_s0 + $0x38] sm:$0xff]  ;;  %v7203_v12 = vpack.c.bf16 %v458_v63, %v454_v62  ;;  %v694_v13 = vld [vmem:[#allocation7] sm:$0xff] }
  0x77   :  { %4893 = vmatpush1.bf16.msra.mxu1 %v7165_v39  ;;  %270 = vmatprep.mubr.f32.mxu0 %v8379_v0  ;;  %8603 = vst [vmem:[#allocation36_spill] sm:$0xff] %v7192_v1  ;;  %8604 = vst [vmem:[#allocation37_spill] sm:$0xff] %v7199_v7  ;;  %v697_v9 = vld [vmem:[#allocation7 + $0x18] sm:$0xff]  ;;  %v698_v14 = vld [vmem:[#allocation7 + $0x20] sm:$0xff]  ;;  %v7207_v18 = vpack.c.bf16 %v699_v4, %v695_v3 }
  0x78   :  { %383 = vmatprep.mubr.f32.mxu1 %v8379_v0  ;;  %4863 = vmatprep.subr.bf16.mxu0 %v7169_v43  ;;  %v701_v10 = vld [vmem:[#allocation7 + $0x38] sm:$0xff]  ;;  %8605 = vst [vmem:[#allocation38_spill] sm:$0xff] %v7203_v12  ;;  %v696_v16 = vld [vmem:[#allocation7 + $0x10] sm:$0xff]  ;;  %v703_v23 = vld [vmem:[#allocation7 + $0x48] sm:$0xff]  ;;  %v7215_v32 = vpack.c.bf16 %v698_v14, %v694_v13 }
  0x79   :  { %4666 = vmatmul.mubr.msk.f32.gmra.mrb[12].mxu0 %vm145_vm0, %v114_v51  ;;  %4895 = vmatprep.subr.bf16.mxu1 %v7173_v46  ;;  %8606 = vst [vmem:[#allocation39_spill] sm:$0xff] %v7207_v18  ;;  %v700_v20 = vld [vmem:[#allocation7 + $0x30] sm:$0xff]  ;;  %v707_v26 = vld [vmem:[#allocation7 + $0x68] sm:$0xff]  ;;  %v7211_v27 = vpack.c.bf16 %v701_v10, %v697_v9  ;;  %v705_v30 = vld [vmem:[#allocation7 + $0x58] sm:$0xff] }
  0x7a   :  { %4674 = vmatmul.mubr.msk.f32.gmra.mrb[12].mxu1 %vm145_vm0, %v114_v51  ;;  %4865 = vmatpush1.bf16.msra.mxu0 %v7180_v52  ;;  %v709_v31 = vld [vmem:[#allocation7 + $0x78] sm:$0xff]  ;;  %8608 = vst [vmem:[#allocation41_spill] sm:$0xff] %v7215_v32  ;;  %v7219_v36 = vpack.c.bf16 %v700_v20, %v696_v16  ;;  %v7221_v37 = vpack.c.bf16 %v707_v26, %v703_v23  ;;  %v702_v40 = vld [vmem:[#allocation7 + $0x40] sm:$0xff]  ;;  %v704_v44 = vld [vmem:[#allocation7 + $0x50] sm:$0xff] }
  0x7b   :  { %4897 = vmatpush1.bf16.msra.mxu1 %v7184_v56  ;;  %276 = vmatprep.mubr.f32.mxu0 %v8379_v0  ;;  %8607 = vst [vmem:[#allocation40_spill] sm:$0xff] %v7211_v27  ;;  %v706_v41 = vld [vmem:[#allocation7 + $0x60] sm:$0xff]  ;;  %v7225_v45 = vpack.c.bf16 %v709_v31, %v705_v30  ;;  %v708_v48 = vld [vmem:[#allocation7 + $0x70] sm:$0xff]  ;;  %v711_v49 = vld [vmem:[#allocation7 + $0x88] sm:$0xff] }
  0x7c   :  { %389 = vmatprep.mubr.f32.mxu1 %v8379_v0  ;;  %4867 = vmatprep.subr.bf16.mxu0 %v7188_v60  ;;  %8609 = vst [vmem:[#allocation42_spill] sm:$0xff] %v7219_v36  ;;  %8610 = vst [vmem:[#allocation43_spill] sm:$0xff] %v7221_v37  ;;  %v715_v51 = vld [vmem:[#allocation7 + $0xa8] sm:$0xff]  ;;  %v713_v53 = vld [vmem:[#allocation7 + $0x98] sm:$0xff]  ;;  %v7231_v57 = vpack.c.bf16 %v706_v41, %v702_v40  ;;  %v7235_v59 = vpack.c.bf16 %v708_v48, %v704_v44 }
  0x7d   :  { %4667 = vmatmul.mubr.msk.f32.gmra.mrb[14].mxu0 %vm145_vm0, %v115_v6  ;;  %4899 = vmatprep.subr.bf16.mxu1 %v7192_v1  ;;  %8611 = vst [vmem:[#allocation44_spill] sm:$0xff] %v7225_v45  ;;  %v717_v55 = vld [vmem:[#allocation7 + $0xb8] sm:$0xff]  ;;  %v7237_v62 = vpack.c.bf16 %v715_v51, %v711_v49  ;;  %v710_v63 = vld [vmem:[#allocation7 + $0x80] sm:$0xff]  ;;  %v712_v4 = vld [vmem:[#allocation7 + $0x90] sm:$0xff] }
  0x7e   :  { %4675 = vmatmul.mubr.msk.f32.gmra.mrb[14].mxu1 %vm145_vm0, %v115_v6  ;;  %4869 = vmatpush1.bf16.msra.mxu0 %v7199_v7  ;;  %8612 = vst [vmem:[#allocation45_spill] sm:$0xff] %v7231_v57  ;;  %8613 = vst [vmem:[#allocation46_spill] sm:$0xff] %v7235_v59  ;;  %v714_v3 = vld [vmem:[#allocation7 + $0xa0] sm:$0xff]  ;;  %v7240_v6 = vpack.c.bf16 %v717_v55, %v713_v53  ;;  %v716_v9 = vld [vmem:[#allocation7 + $0xb0] sm:$0xff] }
  0x7f   :  { %4901 = vmatpush1.bf16.msra.mxu1 %v7203_v12  ;;  %524 = vmatprep.mubr.f32.mxu0 %v8379_v0  ;;  %8614 = vst [vmem:[#allocation47_spill] sm:$0xff] %v7237_v62  ;;  %v719_v10 = vld [vmem:[#allocation7 + $0xc8] sm:$0xff]  ;;  %v721_v14 = vld [vmem:[#allocation7 + $0xd8] sm:$0xff]  ;;  %v7245_v20 = vpack.c.bf16 %v714_v3, %v710_v63  ;;  %v7249_v23 = vpack.c.bf16 %v716_v9, %v712_v4  ;;  %v718_v30 = vld [vmem:[#allocation7 + $0xc0] sm:$0xff] }
  0x80   :  { %595 = vmatprep.mubr.f32.mxu1 %v8379_v0  ;;  %4903 = vmatprep.subr.bf16.mxu0 %v7207_v18  ;;  %8615 = vst [vmem:[#allocation48_spill] sm:$0xff] %v7240_v6  ;;  %v723_v13 = vld [vmem:[#allocation7 + $0xe8] sm:$0xff]  ;;  %v725_v16 = vld [vmem:[#allocation7 + $0xf8] sm:$0xff]  ;;  %v722_v31 = vld [vmem:[#allocation7 + $0xe0] sm:$0xff] }
  0x81   :  { %525 = vmatmul.mubr.f32.vlgmr.msra.gmra.mrb[0].mxu0 %v8379_v0  ;;  %4935 = vmatprep.subr.bf16.mxu1 %v7211_v27  ;;  %8616 = vst [vmem:[#allocation49_spill] sm:$0xff] %v7245_v20  ;;  %8617 = vst [vmem:[#allocation50_spill] sm:$0xff] %v7249_v23  ;;  %v7251_v26 = vpack.c.bf16 %v723_v13, %v719_v10  ;;  %v720_v40 = vld [vmem:[#allocation7 + $0xd0] sm:$0xff]  ;;  %v7254_v41 = vpack.c.bf16 %v725_v16, %v721_v14  ;;  %v727_v48 = vld [vmem:[#allocation7 + $0x108] sm:$0xff] }
  0x82   :  { %596 = vmatmul.mubr.f32.vlgmr.msra.gmra.mrb[0].mxu1 %v8379_v0  ;;  %4905 = vmatpush1.bf16.msra.mxu0 %v7215_v32  ;;  %v724_v44 = vld [vmem:[#allocation7 + $0xf0] sm:$0xff]  ;;  %v731_v49 = vld [vmem:[#allocation7 + $0x128] sm:$0xff]  ;;  %v729_v51 = vld [vmem:[#allocation7 + $0x118] sm:$0xff]  ;;  %v7257_v55 = vpack.c.bf16 %v722_v31, %v718_v30 }
  0x83   :  { %4937 = vmatpush1.bf16.msra.mxu1 %v7219_v36  ;;  %4907 = vmatprep.subr.bf16.mxu0 %v7221_v37  ;;  %8618 = vst [vmem:[#allocation51_spill] sm:$0xff] %v7251_v26  ;;  %8619 = vst [vmem:[#allocation52_spill] sm:$0xff] %v7254_v41  ;;  %v733_v53 = vld [vmem:[#allocation7 + $0x138] sm:$0xff]  ;;  %v7261_v63 = vpack.c.bf16 %v724_v44, %v720_v40  ;;  %v7263_v3 = vpack.c.bf16 %v731_v49, %v727_v48  ;;  %v726_v4 = vld [vmem:[#allocation7 + $0x100] sm:$0xff] }
  0x84   :  { %4939 = vmatprep.subr.bf16.mxu1 %v7225_v45  ;;  %822 = vmatprep.mubr.f32.mxu0 %v8379_v0  ;;  %8620 = vst [vmem:[#allocation53_spill] sm:$0xff] %v7257_v55  ;;  %v730_v9 = vld [vmem:[#allocation7 + $0x120] sm:$0xff]  ;;  %v7266_v10 = vpack.c.bf16 %v733_v53, %v729_v51  ;;  %v728_v13 = vld [vmem:[#allocation7 + $0x110] sm:$0xff]  ;;  %v735_v31 = vld [vmem:[#allocation7 + $0x148] sm:$0xff] }
  0x85   :  { %893 = vmatprep.mubr.f32.mxu1 %v8379_v0  ;;  %8621 = vst [vmem:[#allocation54_spill] sm:$0xff] %v7261_v63  ;;  %8622 = vst [vmem:[#allocation55_spill] sm:$0xff] %v7263_v3  ;;  %v732_v14 = vld [vmem:[#allocation7 + $0x130] sm:$0xff]  ;;  %v7269_v16 = vpack.c.bf16 %v730_v9, %v726_v4  ;;  %v739_v40 = vld [vmem:[#allocation7 + $0x168] sm:$0xff] }
  0x86   :  { %4909 = vmatpush1.bf16.msra.mxu0 %v7231_v57  ;;  %8623 = vst [vmem:[#allocation56_spill] sm:$0xff] %v7266_v10  ;;  %v7273_v30 = vpack.c.bf16 %v732_v14, %v728_v13  ;;  %v737_v44 = vld [vmem:[#allocation7 + $0x158] sm:$0xff]  ;;  %v7278_v48 = vpack.c.bf16 %v739_v40, %v735_v31  ;;  %v734_v51 = vld [vmem:[#allocation7 + $0x140] sm:$0xff]  ;;  %v736_v13 = vld [vmem:[#allocation7 + $0x150] sm:$0xff] }
  0x87   :  { %4941 = vmatpush1.bf16.msra.mxu1 %v7235_v59  ;;  %4911 = vmatprep.subr.bf16.mxu0 %v7237_v62  ;;  %8624 = vst [vmem:[#allocation57_spill] sm:$0xff] %v7269_v16  ;;  %v741_v49 = vld [vmem:[#allocation7 + $0x178] sm:$0xff]  ;;  %v738_v53 = vld [vmem:[#allocation7 + $0x160] sm:$0xff]  ;;  %v740_v14 = vld [vmem:[#allocation7 + $0x170] sm:$0xff] }
  0x88   :  { %4943 = vmatprep.subr.bf16.mxu1 %v7240_v6  ;;  %8625 = vst [vmem:[#allocation58_spill] sm:$0xff] %v7273_v30  ;;  %8626 = vst [vmem:[#allocation59_spill] sm:$0xff] %v7278_v48  ;;  %v7280_v4 = vpack.c.bf16 %v741_v49, %v737_v44  ;;  %v7282_v9 = vpack.c.bf16 %v738_v53, %v734_v51  ;;  %v7285_v0 = vpack.c.bf16 %v740_v14, %v736_v13  ;;  %v747_v31 = vld [vmem:[#allocation7 + $0x1a8] sm:$0xff]  ;;  %v745_v40 = vld [vmem:[#allocation7 + $0x198] sm:$0xff] }
  0x89   :  { %v749_v44 = vld [vmem:[#allocation7 + $0x1b8] sm:$0xff]  ;;  %v742_v49 = vld [vmem:[#allocation7 + $0x180] sm:$0xff]  ;;  %v744_v13 = vld [vmem:[#allocation7 + $0x190] sm:$0xff] }
  0x8a   :  { %4913 = vmatpush1.bf16.msra.mxu0 %v7245_v20  ;;  %8627 = vst [vmem:[#allocation60_spill] sm:$0xff] %v7280_v4  ;;  %8628 = vst [vmem:[#allocation61_spill] sm:$0xff] %v7282_v9  ;;  %v746_v51 = vld [vmem:[#allocation7 + $0x1a0] sm:$0xff]  ;;  %v7292_v53 = vpack.c.bf16 %v749_v44, %v745_v40  ;;  %v748_v14 = vld [vmem:[#allocation7 + $0x1b0] sm:$0xff] }
  0x8b   :  { %4945 = vmatpush1.bf16.msra.mxu1 %v7249_v23  ;;  %4915 = vmatprep.subr.bf16.mxu0 %v7251_v26  ;;  %8629 = vst [vmem:[#allocation62_spill] sm:$0xff] %v7285_v0  ;;  %v757_v40 = vld [vmem:[#allocation7 + $0x1f8] sm:$0xff]  ;;  %v750_v44 = vld [vmem:[#allocation7 + $0x1c0] sm:$0xff] }
  0x8c   :  { %4947 = vmatprep.subr.bf16.mxu1 %v7254_v41  ;;  %8631 = vst [vmem:[#allocation64_spill] sm:$0xff] %v7292_v53 }
  0x8e   :  { %4917 = vmatpush1.bf16.msra.mxu0 %v7257_v55  ;;  %v685_v55 = vld [vmem:[#allocation6 + $0x1b8] sm:$0xff] }
  0x8f   :  { %4949 = vmatpush1.bf16.msra.mxu1 %v7261_v63  ;;  %4919 = vmatprep.subr.bf16.mxu0 %v7263_v3  ;;  %v683_v63 = vld [vmem:[#allocation6 + $0x1a8] sm:$0xff] }
  0x90   :  { %4951 = vmatprep.subr.bf16.mxu1 %v7266_v10  ;;  %v7294_v10 = vpack.c.bf16 %v746_v51, %v742_v49  ;;  %v754_v49 = vld [vmem:[#allocation7 + $0x1e0] sm:$0xff] }
  0x92   :  { %4921 = vmatpush1.bf16.msra.mxu0 %v7269_v16  ;;  %8632 = vst [vmem:[#allocation65_spill] sm:$0xff] %v7294_v10 }
  0x93   :  { %4953 = vmatpush1.bf16.msra.mxu1 %v7273_v30  ;;  %4923 = vmatprep.subr.bf16.mxu0 %v7278_v48  ;;  %v743_v30 = vld [vmem:[#allocation7 + $0x188] sm:$0xff]  ;;  %v7306_v48 = vpack.c.bf16 %v754_v49, %v750_v44  ;;  %v634_v44 = vld [vmem:[#allocation6 + $0x20] sm:$0xff] }
  0x94   :  { %4955 = vmatprep.subr.bf16.mxu1 %v7280_v4  ;;  %v7290_v16 = vpack.c.bf16 %v747_v31, %v743_v30  ;;  %v7297_v4 = vpack.c.bf16 %v748_v14, %v744_v13  ;;  %v755_v30 = vld [vmem:[#allocation7 + $0x1e8] sm:$0xff]  ;;  %v753_v31 = vld [vmem:[#allocation7 + $0x1d8] sm:$0xff]  ;;  %v752_v13 = vld [vmem:[#allocation7 + $0x1d0] sm:$0xff] }
  0x95   :  { %v7304_v51 = vpack.c.bf16 %v757_v40, %v753_v31  ;;  %8636 = vst [vmem:[#allocation69_spill] sm:$0xff] %v7306_v48  ;;  %v756_v14 = vld [vmem:[#allocation7 + $0x1f0] sm:$0xff]  ;;  %v637_v31 = vld [vmem:[#allocation6 + $0x38] sm:$0xff]  ;;  %v630_v40 = vld [vmem:[#allocation6] sm:$0xff] }
  0x96   :  { %4925 = vmatpush1.bf16.msra.mxu0 %v7282_v9  ;;  %8630 = vst [vmem:[#allocation63_spill] sm:$0xff] %v7290_v16  ;;  %8633 = vst [vmem:[#allocation66_spill] sm:$0xff] %v7297_v4 }
  0x97   :  { %4957 = vmatpush1.bf16.msra.mxu1 %v7285_v0  ;;  %4927 = vmatprep.subr.bf16.mxu0 %v7290_v16  ;;  %v751_v0 = vld [vmem:[#allocation7 + $0x1c8] sm:$0xff]  ;;  %8635 = vst [vmem:[#allocation68_spill] sm:$0xff] %v7304_v51  ;;  %v7318_v16 = vpack.c.bf16 %v634_v44, %v630_v40  ;;  %v638_v40 = vld [vmem:[#allocation6 + $0x40] sm:$0xff] }
  0x98   :  { %4959 = vmatprep.subr.bf16.mxu1 %v7292_v53  ;;  %v7302_v9 = vpack.c.bf16 %v755_v30, %v751_v0  ;;  %v7309_v53 = vpack.c.bf16 %v756_v14, %v752_v13  ;;  %v635_v0 = vld [vmem:[#allocation6 + $0x28] sm:$0xff]  ;;  %v633_v30 = vld [vmem:[#allocation6 + $0x18] sm:$0xff]  ;;  %v632_v13 = vld [vmem:[#allocation6 + $0x10] sm:$0xff] }
  0x99   :  { %v7316_v49 = vpack.c.bf16 %v637_v31, %v633_v30  ;;  %8640 = vst [vmem:[#allocation73_spill] sm:$0xff] %v7318_v16  ;;  %v636_v14 = vld [vmem:[#allocation6 + $0x30] sm:$0xff]  ;;  %v645_v31 = vld [vmem:[#allocation6 + $0x78] sm:$0xff]  ;;  %v642_v44 = vld [vmem:[#allocation6 + $0x60] sm:$0xff] }
  0x9a   :  { %4929 = vmatpush1.bf16.msra.mxu0 %v7294_v10  ;;  %8634 = vst [vmem:[#allocation67_spill] sm:$0xff] %v7302_v9  ;;  %8637 = vst [vmem:[#allocation70_spill] sm:$0xff] %v7309_v53 }
  0x9b   :  { %4961 = vmatpush1.bf16.msra.mxu1 %v7297_v4  ;;  %4931 = vmatprep.subr.bf16.mxu0 %v7302_v9  ;;  %v631_v4 = vld [vmem:[#allocation6 + $0x8] sm:$0xff]  ;;  %8639 = vst [vmem:[#allocation72_spill] sm:$0xff] %v7316_v49 }
  0x9c   :  { %4963 = vmatprep.subr.bf16.mxu1 %v7304_v51  ;;  %v7314_v10 = vpack.c.bf16 %v635_v0, %v631_v4  ;;  %v8641_v51 = vmov 0.0   ;;  %v639_v4 = vld [vmem:[#allocation6 + $0x48] sm:$0xff] }
  0x9d   :  { %v643_v0 = vld [vmem:[#allocation6 + $0x68] sm:$0xff] }
  0x9e   :  { %4933 = vmatpush1.bf16.msra.mxu0 %v7306_v48  ;;  %8638 = vst [vmem:[#allocation71_spill] sm:$0xff] %v7314_v10  ;;  %v7322_v48 = vpack.c.bf16 %v636_v14, %v632_v13  ;;  %v7328_v30 = vpack.c.bf16 %v643_v0, %v639_v4  ;;  %v7332_v13 = vpack.c.bf16 %v642_v44, %v638_v40  ;;  %v640_v14 = vld [vmem:[#allocation6 + $0x50] sm:$0xff]  ;;  %v647_v4 = vld [vmem:[#allocation6 + $0x88] sm:$0xff]  ;;  %v646_v40 = vld [vmem:[#allocation6 + $0x80] sm:$0xff] }
  0x9f   :  { %4965 = vmatpush1.bf16.msra.mxu1 %v7309_v53  ;;  %4967 = vmatprep.subr.bf16.mxu0 %v7314_v10  ;;  %v641_v53 = vld [vmem:[#allocation6 + $0x58] sm:$0xff]  ;;  %v651_v0 = vld [vmem:[#allocation6 + $0xa8] sm:$0xff]  ;;  %v650_v44 = vld [vmem:[#allocation6 + $0xa0] sm:$0xff] }
  0xa0   :  { %8642 = vst [vmem:[#allocation74_spill] sm:$0xff] %v7322_v48  ;;  %4999 = vmatprep.subr.bf16.mxu1 %v7316_v49  ;;  %8643 = vst [vmem:[#allocation75_spill] sm:$0xff] %v7328_v30  ;;  %v7330_v10 = vpack.c.bf16 %v645_v31, %v641_v53  ;;  %v644_v49 = vld [vmem:[#allocation6 + $0x70] sm:$0xff]  ;;  %v7342_v53 = vpack.c.bf16 %v651_v0, %v647_v4  ;;  %v653_v31 = vld [vmem:[#allocation6 + $0xb8] sm:$0xff]  ;;  %v7346_v3 = vpack.c.bf16 %v650_v44, %v646_v40 }
  0xa1   :  { %823 = vmatmul.mubr.f32.vlgmr.msra.gmra.mrb[16].mxu0 %v8641_v51  ;;  %8645 = vst [vmem:[#allocation77_spill] sm:$0xff] %v7332_v13  ;;  %v654_v0 = vld [vmem:[#allocation6 + $0xc0] sm:$0xff] }
  0xa2   :  { %894 = vmatmul.mubr.f32.vlgmr.msra.gmra.mrb[16].mxu1 %v8641_v51  ;;  %4969 = vmatpush1.bf16.msra.mxu0 %v7318_v16  ;;  %8644 = vst [vmem:[#allocation76_spill] sm:$0xff] %v7330_v10  ;;  %v7337_v16 = vpack.c.bf16 %v644_v49, %v640_v14  ;;  %8647 = vst [vmem:[#allocation79_spill] sm:$0xff] %v7342_v53  ;;  %v648_v49 = vld [vmem:[#allocation6 + $0x90] sm:$0xff] }
  0xa3   :  { %5001 = vmatpush1.bf16.msra.mxu1 %v7322_v48  ;;  %964 = vmatprep.mubr.f32.mxu0 %v8641_v51  ;;  %v649_v48 = vld [vmem:[#allocation6 + $0x98] sm:$0xff]  ;;  %8649 = vst [vmem:[#allocation81_spill] sm:$0xff] %v7346_v3  ;;  %v652_v14 = vld [vmem:[#allocation6 + $0xb0] sm:$0xff] }
  0xa4   :  { %1035 = vmatprep.mubr.f32.mxu1 %v8641_v51  ;;  %4971 = vmatprep.subr.bf16.mxu0 %v7328_v30  ;;  %8646 = vst [vmem:[#allocation78_spill] sm:$0xff] %v7337_v16  ;;  %v7344_v9 = vpack.c.bf16 %v653_v31, %v649_v48  ;;  %v659_v30 = vld [vmem:[#allocation6 + $0xe8] sm:$0xff]  ;;  %v661_v48 = vld [vmem:[#allocation6 + $0xf8] sm:$0xff]  ;;  %v658_v31 = vld [vmem:[#allocation6 + $0xe0] sm:$0xff] }
  0xa5   :  { %5003 = vmatprep.subr.bf16.mxu1 %v7330_v10  ;;  %v7349_v10 = vpack.c.bf16 %v652_v14, %v648_v49  ;;  %v7358_v44 = vpack.c.bf16 %v658_v31, %v654_v0  ;;  %v656_v49 = vld [vmem:[#allocation6 + $0xd0] sm:$0xff] }
  0xa6   :  { %4973 = vmatpush1.bf16.msra.mxu0 %v7332_v13  ;;  %8648 = vst [vmem:[#allocation80_spill] sm:$0xff] %v7344_v9  ;;  %v655_v13 = vld [vmem:[#allocation6 + $0xc8] sm:$0xff]  ;;  %v660_v14 = vld [vmem:[#allocation6 + $0xf0] sm:$0xff] }
  0xa7   :  { %5005 = vmatpush1.bf16.msra.mxu1 %v7337_v16  ;;  %4975 = vmatprep.subr.bf16.mxu0 %v7342_v53  ;;  %8650 = vst [vmem:[#allocation82_spill] sm:$0xff] %v7349_v10  ;;  %v657_v16 = vld [vmem:[#allocation6 + $0xd8] sm:$0xff]  ;;  %v7354_v4 = vpack.c.bf16 %v659_v30, %v655_v13  ;;  %8653 = vst [vmem:[#allocation85_spill] sm:$0xff] %v7358_v44  ;;  %v667_v53 = vld [vmem:[#allocation6 + $0x128] sm:$0xff] }
  0xa8   :  { %5007 = vmatprep.subr.bf16.mxu1 %v7344_v9  ;;  %v7356_v40 = vpack.c.bf16 %v661_v48, %v657_v16  ;;  %v7361_v9 = vpack.c.bf16 %v660_v14, %v656_v49  ;;  %v669_v16 = vld [vmem:[#allocation6 + $0x138] sm:$0xff]  ;;  %v662_v13 = vld [vmem:[#allocation6 + $0x100] sm:$0xff]  ;;  %v664_v49 = vld [vmem:[#allocation6 + $0x110] sm:$0xff] }
  0xa9   :  { %8651 = vst [vmem:[#allocation83_spill] sm:$0xff] %v7354_v4  ;;  %v666_v48 = vld [vmem:[#allocation6 + $0x120] sm:$0xff]  ;;  %v668_v14 = vld [vmem:[#allocation6 + $0x130] sm:$0xff] }
  0xaa   :  { %4977 = vmatpush1.bf16.msra.mxu0 %v7346_v3  ;;  %8652 = vst [vmem:[#allocation84_spill] sm:$0xff] %v7356_v40  ;;  %8654 = vst [vmem:[#allocation86_spill] sm:$0xff] %v7361_v9  ;;  %v663_v3 = vld [vmem:[#allocation6 + $0x108] sm:$0xff]  ;;  %v7370_v31 = vpack.c.bf16 %v666_v48, %v662_v13 }
  0xab   :  { %5009 = vmatpush1.bf16.msra.mxu1 %v7349_v10  ;;  %4979 = vmatprep.subr.bf16.mxu0 %v7354_v4  ;;  %v665_v10 = vld [vmem:[#allocation6 + $0x118] sm:$0xff]  ;;  %v7366_v30 = vpack.c.bf16 %v667_v53, %v663_v3  ;;  %v675_v4 = vld [vmem:[#allocation6 + $0x168] sm:$0xff]  ;;  %v670_v53 = vld [vmem:[#allocation6 + $0x140] sm:$0xff] }
  0xac   :  { %5011 = vmatprep.subr.bf16.mxu1 %v7356_v40  ;;  %v7368_v0 = vpack.c.bf16 %v669_v16, %v665_v10  ;;  %8657 = vst [vmem:[#allocation89_spill] sm:$0xff] %v7370_v31  ;;  %v7373_v40 = vpack.c.bf16 %v668_v14, %v664_v49  ;;  %v677_v10 = vld [vmem:[#allocation6 + $0x178] sm:$0xff]  ;;  %v674_v16 = vld [vmem:[#allocation6 + $0x160] sm:$0xff]  ;;  %v672_v49 = vld [vmem:[#allocation6 + $0x150] sm:$0xff] }
  0xad   :  { %8655 = vst [vmem:[#allocation87_spill] sm:$0xff] %v7366_v30  ;;  %v7382_v48 = vpack.c.bf16 %v674_v16, %v670_v53  ;;  %v676_v14 = vld [vmem:[#allocation6 + $0x170] sm:$0xff] }
  0xae   :  { %4981 = vmatpush1.bf16.msra.mxu0 %v7358_v44  ;;  %8656 = vst [vmem:[#allocation88_spill] sm:$0xff] %v7368_v0  ;;  %8658 = vst [vmem:[#allocation90_spill] sm:$0xff] %v7373_v40  ;;  %v671_v44 = vld [vmem:[#allocation6 + $0x148] sm:$0xff]  ;;  %v680_v53 = vld [vmem:[#allocation6 + $0x190] sm:$0xff] }
  0xaf   :  { %5013 = vmatpush1.bf16.msra.mxu1 %v7361_v9  ;;  %4983 = vmatprep.subr.bf16.mxu0 %v7366_v30  ;;  %v673_v9 = vld [vmem:[#allocation6 + $0x158] sm:$0xff]  ;;  %v7378_v3 = vpack.c.bf16 %v675_v4, %v671_v44  ;;  %8661 = vst [vmem:[#allocation93_spill] sm:$0xff] %v7382_v48  ;;  %v679_v30 = vld [vmem:[#allocation6 + $0x188] sm:$0xff] }
  0xb0   :  { %5015 = vmatprep.subr.bf16.mxu1 %v7368_v0  ;;  %v7380_v13 = vpack.c.bf16 %v677_v10, %v673_v9  ;;  %v7385_v0 = vpack.c.bf16 %v676_v14, %v672_v49  ;;  %v7388_v4 = vpack.c.bf16 %v683_v63, %v679_v30  ;;  %v678_v9 = vld [vmem:[#allocation6 + $0x180] sm:$0xff]  ;;  %v684_v49 = vld [vmem:[#allocation6 + $0x1b0] sm:$0xff]  ;;  %v687_v14 = vld [vmem:[#allocation6 + $0x1c8] sm:$0xff] }
  0xb1   :  { %8659 = vst [vmem:[#allocation91_spill] sm:$0xff] %v7378_v3  ;;  %v682_v10 = vld [vmem:[#allocation6 + $0x1a0] sm:$0xff]  ;;  %v7398_v63 = vpack.c.bf16 %v684_v49, %v680_v53  ;;  %v689_v30 = vld [vmem:[#allocation6 + $0x1d8] sm:$0xff] }
  0xb2   :  { %4985 = vmatpush1.bf16.msra.mxu0 %v7370_v31  ;;  %8660 = vst [vmem:[#allocation92_spill] sm:$0xff] %v7380_v13  ;;  %8662 = vst [vmem:[#allocation94_spill] sm:$0xff] %v7385_v0  ;;  %v681_v31 = vld [vmem:[#allocation6 + $0x198] sm:$0xff]  ;;  %v7394_v16 = vpack.c.bf16 %v682_v10, %v678_v9  ;;  %v692_v9 = vld [vmem:[#allocation6 + $0x1f0] sm:$0xff] }
  0xb3   :  { %5017 = vmatpush1.bf16.msra.mxu1 %v7373_v40  ;;  %4987 = vmatprep.subr.bf16.mxu0 %v7378_v3  ;;  %8663 = vst [vmem:[#allocation95_spill] sm:$0xff] %v7388_v4  ;;  %v7390_v44 = vpack.c.bf16 %v685_v55, %v681_v31  ;;  %v691_v3 = vld [vmem:[#allocation6 + $0x1e8] sm:$0xff]  ;;  %8666 = vst [vmem:[#allocation98_spill] sm:$0xff] %v7398_v63  ;;  %v693_v31 = vld [vmem:[#allocation6 + $0x1f8] sm:$0xff] }
  0xb4   :  { %5019 = vmatprep.subr.bf16.mxu1 %v7380_v13  ;;  %8665 = vst [vmem:[#allocation97_spill] sm:$0xff] %v7394_v16  ;;  %v7400_v55 = vpack.c.bf16 %v691_v3, %v687_v14  ;;  %v686_v13 = vld [vmem:[#allocation6 + $0x1c0] sm:$0xff]  ;;  %v7402_v40 = vpack.c.bf16 %v693_v31, %v689_v30  ;;  %v125_v3 = vlaneseq }
  0xb5   :  { %8664 = vst [vmem:[#allocation96_spill] sm:$0xff] %v7390_v44 }
  0xb6   :  { %4989 = vmatpush1.bf16.msra.mxu0 %v7382_v48  ;;  %8667 = vst [vmem:[#allocation99_spill] sm:$0xff] %v7400_v55  ;;  %8668 = vst [vmem:[#allocation100_spill] sm:$0xff] %v7402_v40  ;;  %v690_v48 = vld [vmem:[#allocation6 + $0x1e0] sm:$0xff]  ;;  %v7416_v53 = vshrl.u32 %v125_v3, 7 }
  0xb7   :  { %5021 = vmatpush1.bf16.msra.mxu1 %v7385_v0  ;;  %4991 = vmatprep.subr.bf16.mxu0 %v7388_v4  ;;  %v688_v0 = vld [vmem:[#allocation6 + $0x1d0] sm:$0xff]  ;;  %v7406_v10 = vpack.c.bf16 %v690_v48, %v686_v13 }
  0xb8   :  { %5023 = vmatprep.subr.bf16.mxu1 %v7390_v44  ;;  %v7408_v4 = vpack.c.bf16 %v692_v9, %v688_v0  ;;  %v8477_v13 = vsub.s32 0, %v7416_v53  ;;  %v106_v0 = vld [vmem:[%s8370_s3] sm:$0xf]  ;;  %v8478_v48 = vsub.s32 1, %v7416_v53  ;;  %v8485_v31 = vsub.s32 3, %v7416_v53 }
  0xb9   :  { %8669 = vst [vmem:[#allocation101_spill] sm:$0xff] %v7406_v10 }
  0xba   :  { %4993 = vmatpush1.bf16.msra.mxu0 %v7394_v16  ;;  %8670 = vst [vmem:[#allocation102_spill] sm:$0xff] %v7408_v4  ;;  %v7425_v49 = vrot.slane %v106_v0, %v8477_v13  ;;  %v7429_v14 = vrot.slane %v106_v0, %v8478_v48  ;;  %v7436_v13 = vrot.slane %v106_v0, %v8485_v31  ;;  %v8494_v48 = vsub.s32 2, %v7416_v53 }
  0xbb   :  { %5025 = vmatpush1.bf16.msra.mxu1 %v7398_v63  ;;  %4995 = vmatprep.subr.bf16.mxu0 %v7400_v55 }
  0xbc   :  { %5027 = vmatprep.subr.bf16.mxu1 %v7402_v40  ;;  %8671 = vst [vmem:[#allocation103_spill] sm:$0xff] %v7425_v49  ;;  %8672 = vst [vmem:[#allocation104_spill] sm:$0xff] %v7429_v14 }
  0xbd   :  { %8673 = vst [vmem:[#allocation105_spill] sm:$0xff] %v7436_v13 }
  0xbe   :  { %4997 = vmatpush1.bf16.msra.mxu0 %v7406_v10 }
  0xbf   :  { %5029 = vmatpush1.bf16.msra.mxu1 %v7408_v4  ;;  %5031 = vmatprep.subr.bf16.mxu0 %v7065_v17 }
  0xc0   :  { %5063 = vmatprep.subr.bf16.mxu1 %v7067_v21 }
 0x154   :  { %v526_v30 = vpop.f32.mrb[0].mxu0 }
 0x155   :  { %v6422_v9 = vadd.f32 %v526_v30, %v7425_v49  ;;  %v597_v3 = vpop.f32.mrb[0].mxu1  ;;  %v528_v21 = vpop.f32.mrb[1].mxu0  ;;  %v7442_v30 = vrot.slane %v106_v0, %v8494_v48  ;;  %v8689_v48 = vld [vmem:[#allocation68_spill] sm:$0xff] }
 0x156   :  { %v6423_v17 = vadd.f32 %v528_v21, %v7429_v14  ;;  %v599_v4 = vpop.f32.mrb[1].mxu1 }
 0x157   :  { %v4676_v10 = vmul.f32 -1.442695, %v6422_v9  ;;  %v6439_v55 = vadd.f32 %v599_v4, %v7436_v13  ;;  %v6438_v21 = vadd.f32 %v597_v3, %v7442_v30 }
 0x158   :  { %v4677_v40 = vmul.f32 -1.442695, %v6423_v17 }
 0x159   :  { %6530 = vpow2.f32 %v4676_v10  ;;  %v4678_v63 = vmul.f32 -1.442695, %v6439_v55 }
 0x15a   :  { %6532 = vpow2.f32 %v4677_v40 }
 0x15b   :  { %6534 = vpow2.f32 %v4678_v63  ;;  %v8675_v63 = vld [vmem:[#allocation54_spill] sm:$0xff] }
 0x15c   :  { %6536 = vtanh.f32 %v6438_v21  ;;  %v8680_v21 = vld [vmem:[#allocation59_spill] sm:$0xff] }
 0x163   :  { %v6531_v16 = vpop.eup %6530 }
 0x164   :  { %v6533_v9 = vpop.eup %6532  ;;  %v609_v17 = vadd.f32 1.0, %v6531_v16 }
 0x165   :  { %v615_v31 = vadd.f32 1.0, %v6533_v9  ;;  %v6535_v10 = vpop.eup %6534  ;;  %v8681_v9 = vld [vmem:[#allocation60_spill] sm:$0xff] }
 0x166   :  { %6538 = vrcp.f32 %v609_v17  ;;  %v6537_v44 = vpop.eup %6536  ;;  %v622_v13 = vadd.f32 1.0, %v6535_v10  ;;  %v8682_v17 = vld [vmem:[#allocation61_spill] sm:$0xff]  ;;  %v8683_v10 = vld [vmem:[#allocation62_spill] sm:$0xff] }
 0x167   :  { %6540 = vrcp.f32 %v615_v31  ;;  %v8679_v31 = vld [vmem:[#allocation58_spill] sm:$0xff] }
 0x168   :  { %6542 = vrcp.f32 %v622_v13  ;;  %v8676_v13 = vld [vmem:[#allocation55_spill] sm:$0xff] }
 0x170   :  { %v6539_v40 = vpop.eup %6538 }
 0x171   :  { %v6541_v14 = vpop.eup %6540  ;;  %v626_v4 = vmul.f32 %v6539_v40, %v6537_v44  ;;  %v8674_v44 = vld [vmem:[#allocation53_spill] sm:$0xff]  ;;  %v8684_v40 = vld [vmem:[#allocation63_spill] sm:$0xff] }
 0x172   :  { %v625_v49 = vmul.f32 0.0, %v6541_v14  ;;  %v6543_v55 = vpop.eup %6542  ;;  %v8678_v14 = vld [vmem:[#allocation57_spill] sm:$0xff] }
 0x174   :  { %v7445_v0 = vadd.f32 %v626_v4, %v625_v49  ;;  %v8677_v49 = vld [vmem:[#allocation56_spill] sm:$0xff] }
 0x175   :  { %v8685_v4 = vld [vmem:[#allocation64_spill] sm:$0xff] }
 0x176   :  { %6544 = vtanh.f32 %v7445_v0 }
 0x180   :  { %v6545_v3 = vpop.eup %6544 }
 0x181   :  { %v629_v16 = vmul.f32 %v6545_v3, %v6543_v55  ;;  %v8686_v55 = vld [vmem:[#allocation65_spill] sm:$0xff]  ;;  %v8687_v3 = vld [vmem:[#allocation66_spill] sm:$0xff] }
 0x183   :  { %965 = vmatmul.mubr.f32.vlgmr.msra.gmra.mrb[16].mxu0 %v629_v16  ;;  %1036 = vmatmul.mubr.f32.vlgmr.msra.gmra.mrb[16].mxu1 %v629_v16 }
 0x184   :  { %5033 = vmatpush1.bf16.msra.mxu0 %v7069_v22  ;;  %5065 = vmatpush1.bf16.msra.mxu1 %v7072_v25 }
 0x185   :  { %5035 = vmatprep.subr.bf16.mxu0 %v7076_v29  ;;  %5067 = vmatprep.subr.bf16.mxu1 %v7083_v34 }
 0x186   :  { %1155 = vmatprep.mubr.f32.mxu0 %v8641_v51  ;;  %1226 = vmatprep.mubr.f32.mxu1 %v8641_v51 }
 0x188   :  { %5037 = vmatpush1.bf16.msra.mxu0 %v7085_v35  ;;  %5069 = vmatpush1.bf16.msra.mxu1 %v7089_v38 }
 0x189   :  { %5039 = vmatprep.subr.bf16.mxu0 %v7093_v42  ;;  %5071 = vmatprep.subr.bf16.mxu1 %v7100_v47 }
 0x18c   :  { %5041 = vmatpush1.bf16.msra.mxu0 %v7104_v50  ;;  %5073 = vmatpush1.bf16.msra.mxu1 %v7108_v54 }
 0x18d   :  { %5043 = vmatprep.subr.bf16.mxu0 %v7112_v58  ;;  %5075 = vmatprep.subr.bf16.mxu1 %v7116_v61 }
 0x190   :  { %5045 = vmatpush1.bf16.msra.mxu0 %v7123_v2  ;;  %5077 = vmatpush1.bf16.msra.mxu1 %v7127_v5 }
 0x191   :  { %5047 = vmatprep.subr.bf16.mxu0 %v7131_v8  ;;  %5079 = vmatprep.subr.bf16.mxu1 %v7135_v11 }
 0x194   :  { %5049 = vmatpush1.bf16.msra.mxu0 %v7142_v15  ;;  %5081 = vmatpush1.bf16.msra.mxu1 %v7146_v19 }
 0x195   :  { %5051 = vmatprep.subr.bf16.mxu0 %v7150_v24  ;;  %5083 = vmatprep.subr.bf16.mxu1 %v7154_v28 }
 0x198   :  { %5053 = vmatpush1.bf16.msra.mxu0 %v7161_v33  ;;  %5085 = vmatpush1.bf16.msra.mxu1 %v7165_v39 }
 0x199   :  { %5055 = vmatprep.subr.bf16.mxu0 %v7169_v43  ;;  %5087 = vmatprep.subr.bf16.mxu1 %v7173_v46 }
 0x19c   :  { %5057 = vmatpush1.bf16.msra.mxu0 %v7180_v52  ;;  %5089 = vmatpush1.bf16.msra.mxu1 %v7184_v56 }
 0x19d   :  { %5059 = vmatprep.subr.bf16.mxu0 %v7188_v60  ;;  %5091 = vmatprep.subr.bf16.mxu1 %v7192_v1 }
 0x1a0   :  { %5061 = vmatpush1.bf16.msra.mxu0 %v7199_v7  ;;  %5093 = vmatpush1.bf16.msra.mxu1 %v7203_v12 }
 0x1a1   :  { %5095 = vmatprep.subr.bf16.mxu0 %v7207_v18  ;;  %5127 = vmatprep.subr.bf16.mxu1 %v7211_v27 }
 0x1a3   :  { %1156 = vmatmul.mubr.f32.vlgmr.msra.gmra.mrb[2].mxu0 %v629_v16  ;;  %1227 = vmatmul.mubr.f32.vlgmr.msra.gmra.mrb[2].mxu1 %v629_v16  ;;  %v8688_v16 = vld [vmem:[#allocation67_spill] sm:$0xff] }
 0x1a4   :  { %5097 = vmatpush1.bf16.msra.mxu0 %v7215_v32  ;;  %5129 = vmatpush1.bf16.msra.mxu1 %v7219_v36 }
 0x1a5   :  { %5099 = vmatprep.subr.bf16.mxu0 %v7221_v37  ;;  %5131 = vmatprep.subr.bf16.mxu1 %v7225_v45 }
 0x1a6   :  { %1325 = vmatprep.mubr.f32.mxu0 %v8641_v51  ;;  %1396 = vmatprep.mubr.f32.mxu1 %v8641_v51 }
 0x1a8   :  { %5101 = vmatpush1.bf16.msra.mxu0 %v7231_v57  ;;  %5133 = vmatpush1.bf16.msra.mxu1 %v7235_v59 }
 0x1a9   :  { %5103 = vmatprep.subr.bf16.mxu0 %v7237_v62  ;;  %5135 = vmatprep.subr.bf16.mxu1 %v7240_v6 }
 0x1ac   :  { %5105 = vmatpush1.bf16.msra.mxu0 %v7245_v20  ;;  %5137 = vmatpush1.bf16.msra.mxu1 %v7249_v23 }
 0x1ad   :  { %5107 = vmatprep.subr.bf16.mxu0 %v7251_v26  ;;  %5139 = vmatprep.subr.bf16.mxu1 %v7254_v41 }
 0x1b0   :  { %5109 = vmatpush1.bf16.msra.mxu0 %v8674_v44  ;;  %5141 = vmatpush1.bf16.msra.mxu1 %v8675_v63 }
 0x1b1   :  { %5111 = vmatprep.subr.bf16.mxu0 %v8676_v13  ;;  %5143 = vmatprep.subr.bf16.mxu1 %v8677_v49  ;;  %v8698_v13 = vsub.s32 3, %v7416_v53 }
 0x1b4   :  { %5113 = vmatpush1.bf16.msra.mxu0 %v8678_v14  ;;  %5145 = vmatpush1.bf16.msra.mxu1 %v8679_v31  ;;  %v8690_v31 = vld [vmem:[#allocation69_spill] sm:$0xff] }
 0x1b5   :  { %5115 = vmatprep.subr.bf16.mxu0 %v8680_v21  ;;  %5147 = vmatprep.subr.bf16.mxu1 %v8681_v9  ;;  %v8691_v21 = vld [vmem:[#allocation70_spill] sm:$0xff]  ;;  %v8692_v9 = vld [vmem:[#allocation71_spill] sm:$0xff] }
 0x1b8   :  { %5117 = vmatpush1.bf16.msra.mxu0 %v8682_v17  ;;  %5149 = vmatpush1.bf16.msra.mxu1 %v8683_v10  ;;  %v8693_v17 = vld [vmem:[#allocation72_spill] sm:$0xff] }
 0x1b9   :  { %5119 = vmatprep.subr.bf16.mxu0 %v8684_v40  ;;  %5151 = vmatprep.subr.bf16.mxu1 %v8685_v4  ;;  %v107_v4 = vld [vmem:[%s8373_s6] sm:$0xf] }
 0x1ba   :  { %v7531_v63 = vrot.slane %v107_v4, %v8698_v13 }
 0x1bc   :  { %5121 = vmatpush1.bf16.msra.mxu0 %v8686_v55  ;;  %5153 = vmatpush1.bf16.msra.mxu1 %v8687_v3  ;;  %v8694_v55 = vsub.s32 0, %v7416_v53  ;;  %8699 = vst [vmem:[#allocation108_spill] sm:$0xff] %v7531_v63 }
 0x1bd   :  { %5123 = vmatprep.subr.bf16.mxu0 %v8688_v16  ;;  %5155 = vmatprep.subr.bf16.mxu1 %v8689_v48  ;;  %v8696_v16 = vsub.s32 1, %v7416_v53 }
 0x1be   :  { %v7521_v40 = vrot.slane %v107_v4, %v8694_v55 }
 0x1bf   :  { %v7525_v3 = vrot.slane %v107_v4, %v8696_v16  ;;  %v8700_v16 = vsub.s32 2, %v7416_v53 }
 0x1c0   :  { %5125 = vmatpush1.bf16.msra.mxu0 %v8690_v31  ;;  %5157 = vmatpush1.bf16.msra.mxu1 %v8691_v21  ;;  %8695 = vst [vmem:[#allocation106_spill] sm:$0xff] %v7521_v40 }
 0x1c1   :  { %5159 = vmatprep.subr.bf16.mxu0 %v8692_v9  ;;  %5191 = vmatprep.subr.bf16.mxu1 %v8693_v17  ;;  %8697 = vst [vmem:[#allocation107_spill] sm:$0xff] %v7525_v3  ;;  %v7536_v44 = vrot.slane %v107_v4, %v8700_v16 }
 0x1c3   :  { %8701 = vst [vmem:[#allocation109_spill] sm:$0xff] %v7536_v44 }
 0x256   :  { %v966_v48 = vpop.f32.mrb[16].mxu0  ;;  %v1037_v31 = vpop.f32.mrb[16].mxu1 }
 0x257   :  { %v1063_v21 = vadd.f32 %v7521_v40, %v966_v48  ;;  %v968_v10 = vpop.f32.mrb[17].mxu0  ;;  %v1039_v9 = vpop.f32.mrb[17].mxu1  ;;  %v1065_v48 = vadd.f32 %v7536_v44, %v1037_v31  ;;  %v8703_v31 = vld [vmem:[#allocation103_spill] sm:$0xff] }
 0x258   :  { %v1064_v17 = vadd.f32 %v7525_v3, %v968_v10  ;;  %v1066_v55 = vadd.f32 %v7531_v63, %v1039_v9 }
 0x259   :  { %v4679_v14 = vmul.f32 -1.442695, %v1063_v21 }
 0x25a   :  { %v4680_v49 = vmul.f32 -1.442695, %v1064_v17  ;;  %v4681_v41 = vmul.f32 -1.442695, %v1066_v55 }
 0x25b   :  { %6546 = vpow2.f32 %v4679_v14 }
 0x25c   :  { %6548 = vpow2.f32 %v4680_v49 }
 0x25d   :  { %6550 = vpow2.f32 %v4681_v41 }
 0x25e   :  { %6552 = vtanh.f32 %v1065_v48 }
 0x265   :  { %v6547_v40 = vpop.eup %6546 }
 0x266   :  { %v6549_v26 = vpop.eup %6548  ;;  %v1070_v10 = vadd.f32 1.0, %v6547_v40 }
 0x267   :  { %v1076_v21 = vadd.f32 1.0, %v6549_v26  ;;  %v6551_v13 = vpop.eup %6550  ;;  %v8704_v26 = vld [vmem:[#allocation104_spill] sm:$0xff] }
 0x268   :  { %6554 = vrcp.f32 %v1070_v10  ;;  %v6553_v14 = vpop.eup %6552  ;;  %v1083_v63 = vadd.f32 1.0, %v6551_v13 }
 0x269   :  { %6556 = vrcp.f32 %v1076_v21 }
 0x26a   :  { %6558 = vrcp.f32 %v1083_v63 }
 0x272   :  { %v6555_v49 = vpop.eup %6554 }
 0x273   :  { %v6557_v17 = vpop.eup %6556  ;;  %v1087_v9 = vmul.f32 %v6555_v49, %v6553_v14  ;;  %v8705_v14 = vld [vmem:[#allocation105_spill] sm:$0xff] }
 0x274   :  { %v1086_v53 = vmul.f32 0.0, %v6557_v17  ;;  %v6559_v49 = vpop.eup %6558 }
 0x276   :  { %v7539_v4 = vadd.f32 %v1087_v9, %v1086_v53  ;;  %v1157_v55 = vpop.f32.mrb[2].mxu0  ;;  %v1228_v16 = vpop.f32.mrb[2].mxu1 }
 0x277   :  { %v6424_v44 = vadd.f32 %v1157_v55, %v8703_v31  ;;  %v1159_v40 = vpop.f32.mrb[3].mxu0  ;;  %v1230_v41 = vpop.f32.mrb[3].mxu1  ;;  %v6440_v53 = vadd.f32 %v1228_v16, %v7442_v30  ;;  %v8710_v16 = vld [vmem:[#allocation77_spill] sm:$0xff] }
 0x278   :  { %8702 = vst [vmem:[#allocation110_spill] sm:$0xff] %v7539_v4  ;;  %6560 = vtanh.f32 %v7539_v4  ;;  %v6425_v48 = vadd.f32 %v1159_v40, %v8704_v26  ;;  %v6441_v13 = vadd.f32 %v1230_v41, %v8705_v14  ;;  %v8706_v4 = vld [vmem:[#allocation73_spill] sm:$0xff]  ;;  %v8709_v41 = vld [vmem:[#allocation76_spill] sm:$0xff] }
 0x279   :  { %v4682_v10 = vmul.f32 -1.442695, %v6424_v44  ;;  %v8707_v44 = vld [vmem:[#allocation74_spill] sm:$0xff] }
 0x27a   :  { %v4683_v21 = vmul.f32 -1.442695, %v6425_v48  ;;  %v4684_v9 = vmul.f32 -1.442695, %v6441_v13  ;;  %v8708_v48 = vld [vmem:[#allocation75_spill] sm:$0xff]  ;;  %v8714_v13 = vld [vmem:[#allocation81_spill] sm:$0xff] }
 0x27b   :  { %6562 = vpow2.f32 %v4682_v10  ;;  %v8712_v10 = vld [vmem:[#allocation79_spill] sm:$0xff] }
 0x27c   :  { %6564 = vpow2.f32 %v4683_v21  ;;  %v8713_v21 = vld [vmem:[#allocation80_spill] sm:$0xff] }
 0x27d   :  { %6566 = vpow2.f32 %v4684_v9 }
 0x27e   :  { %6568 = vtanh.f32 %v6440_v53 }
 0x282   :  { %v6561_v17 = vpop.eup %6560 }
 0x283   :  { %v1090_v63 = vmul.f32 %v6561_v17, %v6559_v49  ;;  %v8715_v49 = vld [vmem:[#allocation82_spill] sm:$0xff]  ;;  %v8716_v17 = vld [vmem:[#allocation83_spill] sm:$0xff] }
 0x285   :  { %v6563_v3 = vpop.eup %6562  ;;  %1326 = vmatmul.mubr.f32.vlgmr.msra.gmra.mrb[18].mxu0 %v1090_v63  ;;  %1397 = vmatmul.mubr.f32.vlgmr.msra.gmra.mrb[18].mxu1 %v1090_v63 }
 0x286   :  { %v6565_v55 = vpop.eup %6564  ;;  %v1240_v31 = vadd.f32 1.0, %v6563_v3  ;;  %5161 = vmatpush1.bf16.msra.mxu0 %v8706_v4  ;;  %5193 = vmatpush1.bf16.msra.mxu1 %v8707_v44  ;;  %v8711_v3 = vld [vmem:[#allocation78_spill] sm:$0xff] }
 0x287   :  { %v1246_v40 = vadd.f32 1.0, %v6565_v55  ;;  %5163 = vmatprep.subr.bf16.mxu0 %v8708_v48  ;;  %5195 = vmatprep.subr.bf16.mxu1 %v8709_v41  ;;  %v6567_v9 = vpop.eup %6566  ;;  %v8718_v55 = vld [vmem:[#allocation85_spill] sm:$0xff]  ;;  %v8720_v41 = vld [vmem:[#allocation87_spill] sm:$0xff] }
 0x288   :  { %6570 = vrcp.f32 %v1240_v31  ;;  %1467 = vmatprep.mubr.f32.mxu0 %v8641_v51  ;;  %1538 = vmatprep.mubr.f32.mxu1 %v8641_v51  ;;  %v8717_v31 = vld [vmem:[#allocation84_spill] sm:$0xff]  ;;  %v6569_v53 = vpop.eup %6568  ;;  %v8724_v48 = vld [vmem:[#allocation91_spill] sm:$0xff] }
 0x289   :  { %6572 = vrcp.f32 %v1246_v40  ;;  %v8719_v40 = vld [vmem:[#allocation86_spill] sm:$0xff] }
 0x28a   :  { %5165 = vmatpush1.bf16.msra.mxu0 %v8710_v16  ;;  %5197 = vmatpush1.bf16.msra.mxu1 %v8711_v3 }
 0x28b   :  { %5167 = vmatprep.subr.bf16.mxu0 %v8712_v10  ;;  %5199 = vmatprep.subr.bf16.mxu1 %v8713_v21  ;;  %v1253_v10 = vadd.f32 1.0, %v6567_v9  ;;  %v8721_v21 = vld [vmem:[#allocation88_spill] sm:$0xff]  ;;  %v8726_v9 = vld [vmem:[#allocation93_spill] sm:$0xff] }
 0x28d   :  { %6574 = vrcp.f32 %v1253_v10  ;;  %v8733_v10 = vld [vmem:[#allocation100_spill] sm:$0xff] }
 0x28e   :  { %5169 = vmatpush1.bf16.msra.mxu0 %v8714_v13  ;;  %5201 = vmatpush1.bf16.msra.mxu1 %v8715_v49 }
 0x28f   :  { %5171 = vmatprep.subr.bf16.mxu0 %v8716_v17  ;;  %5203 = vmatprep.subr.bf16.mxu1 %v8717_v31  ;;  %v8722_v17 = vld [vmem:[#allocation89_spill] sm:$0xff]  ;;  %v8723_v31 = vld [vmem:[#allocation90_spill] sm:$0xff] }
 0x292   :  { %v6571_v63 = vpop.eup %6570  ;;  %5173 = vmatpush1.bf16.msra.mxu0 %v8718_v55  ;;  %5205 = vmatpush1.bf16.msra.mxu1 %v8719_v40  ;;  %v8725_v55 = vld [vmem:[#allocation92_spill] sm:$0xff] }
 0x293   :  { %v6573_v3 = vpop.eup %6572  ;;  %v1257_v16 = vmul.f32 %v6571_v63, %v6569_v53  ;;  %5175 = vmatprep.subr.bf16.mxu0 %v8720_v41  ;;  %5207 = vmatprep.subr.bf16.mxu1 %v8721_v21  ;;  %v8727_v53 = vld [vmem:[#allocation94_spill] sm:$0xff]  ;;  %v8728_v63 = vld [vmem:[#allocation95_spill] sm:$0xff] }
 0x294   :  { %v1256_v49 = vmul.f32 %v6573_v3, %v7445_v0  ;;  %v8729_v0 = vld [vmem:[#allocation96_spill] sm:$0xff]  ;;  %v8731_v3 = vld [vmem:[#allocation98_spill] sm:$0xff] }
 0x296   :  { %v7565_v13 = vadd.f32 %v1257_v16, %v1256_v49  ;;  %5177 = vmatpush1.bf16.msra.mxu0 %v8722_v17  ;;  %5209 = vmatpush1.bf16.msra.mxu1 %v8723_v31  ;;  %v8730_v16 = vld [vmem:[#allocation97_spill] sm:$0xff]  ;;  %v8732_v49 = vld [vmem:[#allocation99_spill] sm:$0xff]  ;;  %v8735_v17 = vld [vmem:[#allocation102_spill] sm:$0xff] }
 0x297   :  { %5179 = vmatprep.subr.bf16.mxu0 %v8724_v48  ;;  %5211 = vmatprep.subr.bf16.mxu1 %v8725_v55  ;;  %v6575_v48 = vpop.eup %6574  ;;  %v8734_v31 = vld [vmem:[#allocation101_spill] sm:$0xff] }
 0x298   :  { %6576 = vtanh.f32 %v7565_v13 }
 0x29a   :  { %5181 = vmatpush1.bf16.msra.mxu0 %v8726_v9  ;;  %5213 = vmatpush1.bf16.msra.mxu1 %v8727_v53  ;;  %v8736_v53 = vld [vmem:[#allocation13_spill] sm:$0xff] }
 0x29b   :  { %5183 = vmatprep.subr.bf16.mxu0 %v8728_v63  ;;  %5215 = vmatprep.subr.bf16.mxu1 %v8729_v0  ;;  %v8737_v63 = vld [vmem:[#allocation14_spill] sm:$0xff] }
 0x29e   :  { %5185 = vmatpush1.bf16.msra.mxu0 %v8730_v16  ;;  %5217 = vmatpush1.bf16.msra.mxu1 %v8731_v3 }
 0x29f   :  { %5187 = vmatprep.subr.bf16.mxu0 %v8732_v49  ;;  %5219 = vmatprep.subr.bf16.mxu1 %v8733_v10 }
 0x2a2   :  { %v6577_v55 = vpop.eup %6576  ;;  %5189 = vmatpush1.bf16.msra.mxu0 %v8734_v31  ;;  %5221 = vmatpush1.bf16.msra.mxu1 %v8735_v17 }
 0x2a3   :  { %v1260_v9 = vmul.f32 %v6577_v55, %v6575_v48  ;;  %5223 = vmatprep.subr.bf16.mxu0 %v8736_v53  ;;  %5255 = vmatprep.subr.bf16.mxu1 %v8737_v63  ;;  %v8738_v48 = vld [vmem:[#allocation51_spill] sm:$0xff]  ;;  %v8739_v55 = vld [vmem:[#allocation52_spill] sm:$0xff] }
 0x2a5   :  { %1468 = vmatmul.mubr.f32.vlgmr.msra.gmra.mrb[18].mxu0 %v1260_v9  ;;  %1539 = vmatmul.mubr.f32.vlgmr.msra.gmra.mrb[18].mxu1 %v1260_v9 }
 0x2a6   :  { %5225 = vmatpush1.bf16.msra.mxu0 %v7069_v22  ;;  %5257 = vmatpush1.bf16.msra.mxu1 %v7072_v25 }
 0x2a7   :  { %5227 = vmatprep.subr.bf16.mxu0 %v7076_v29  ;;  %5259 = vmatprep.subr.bf16.mxu1 %v7083_v34 }
 0x2a8   :  { %1637 = vmatprep.mubr.f32.mxu0 %v8641_v51  ;;  %1708 = vmatprep.mubr.f32.mxu1 %v8641_v51 }
 0x2aa   :  { %5229 = vmatpush1.bf16.msra.mxu0 %v7085_v35  ;;  %5261 = vmatpush1.bf16.msra.mxu1 %v7089_v38 }
 0x2ab   :  { %5231 = vmatprep.subr.bf16.mxu0 %v7093_v42  ;;  %5263 = vmatprep.subr.bf16.mxu1 %v7100_v47 }
 0x2ae   :  { %5233 = vmatpush1.bf16.msra.mxu0 %v7104_v50  ;;  %5265 = vmatpush1.bf16.msra.mxu1 %v7108_v54 }
 0x2af   :  { %5235 = vmatprep.subr.bf16.mxu0 %v7112_v58  ;;  %5267 = vmatprep.subr.bf16.mxu1 %v7116_v61 }
 0x2b2   :  { %5237 = vmatpush1.bf16.msra.mxu0 %v7123_v2  ;;  %5269 = vmatpush1.bf16.msra.mxu1 %v7127_v5 }
 0x2b3   :  { %5239 = vmatprep.subr.bf16.mxu0 %v7131_v8  ;;  %5271 = vmatprep.subr.bf16.mxu1 %v7135_v11 }
 0x2b6   :  { %5241 = vmatpush1.bf16.msra.mxu0 %v7142_v15  ;;  %5273 = vmatpush1.bf16.msra.mxu1 %v7146_v19 }
 0x2b7   :  { %5243 = vmatprep.subr.bf16.mxu0 %v7150_v24  ;;  %5275 = vmatprep.subr.bf16.mxu1 %v7154_v28 }
 0x2ba   :  { %5245 = vmatpush1.bf16.msra.mxu0 %v7161_v33  ;;  %5277 = vmatpush1.bf16.msra.mxu1 %v7165_v39 }
 0x2bb   :  { %5247 = vmatprep.subr.bf16.mxu0 %v7169_v43  ;;  %5279 = vmatprep.subr.bf16.mxu1 %v7173_v46 }
 0x2be   :  { %5249 = vmatpush1.bf16.msra.mxu0 %v7180_v52  ;;  %5281 = vmatpush1.bf16.msra.mxu1 %v7184_v56 }
 0x2bf   :  { %5251 = vmatprep.subr.bf16.mxu0 %v7188_v60  ;;  %5283 = vmatprep.subr.bf16.mxu1 %v7192_v1 }
 0x2c2   :  { %5253 = vmatpush1.bf16.msra.mxu0 %v7199_v7  ;;  %5285 = vmatpush1.bf16.msra.mxu1 %v7203_v12 }
 0x2c3   :  { %5287 = vmatprep.subr.bf16.mxu0 %v7207_v18  ;;  %5319 = vmatprep.subr.bf16.mxu1 %v7211_v27  ;;  %v8761_v27 = vld [vmem:[#allocation107_spill] sm:$0xff] }
 0x2c5   :  { %1638 = vmatmul.mubr.f32.vlgmr.msra.gmra.mrb[4].mxu0 %v1260_v9  ;;  %1709 = vmatmul.mubr.f32.vlgmr.msra.gmra.mrb[4].mxu1 %v1260_v9  ;;  %v8740_v9 = vld [vmem:[#allocation53_spill] sm:$0xff] }
 0x2c6   :  { %5289 = vmatpush1.bf16.msra.mxu0 %v7215_v32  ;;  %5321 = vmatpush1.bf16.msra.mxu1 %v7219_v36  ;;  %v8760_v36 = vld [vmem:[#allocation106_spill] sm:$0xff] }
 0x2c7   :  { %5291 = vmatprep.subr.bf16.mxu0 %v7221_v37  ;;  %5323 = vmatprep.subr.bf16.mxu1 %v7225_v45  ;;  %v8741_v45 = vld [vmem:[#allocation54_spill] sm:$0xff]  ;;  %v8742_v37 = vld [vmem:[#allocation55_spill] sm:$0xff] }
 0x2c8   :  { %1807 = vmatprep.mubr.f32.mxu0 %v8641_v51  ;;  %1878 = vmatprep.mubr.f32.mxu1 %v8641_v51 }
 0x2ca   :  { %5293 = vmatpush1.bf16.msra.mxu0 %v7231_v57  ;;  %5325 = vmatpush1.bf16.msra.mxu1 %v7235_v59  ;;  %v8743_v57 = vld [vmem:[#allocation56_spill] sm:$0xff]  ;;  %v8744_v59 = vld [vmem:[#allocation57_spill] sm:$0xff] }
 0x2cb   :  { %5295 = vmatprep.subr.bf16.mxu0 %v7237_v62  ;;  %5327 = vmatprep.subr.bf16.mxu1 %v7240_v6  ;;  %v8745_v62 = vld [vmem:[#allocation58_spill] sm:$0xff]  ;;  %v8746_v6 = vld [vmem:[#allocation59_spill] sm:$0xff] }
 0x2ce   :  { %5297 = vmatpush1.bf16.msra.mxu0 %v7245_v20  ;;  %5329 = vmatpush1.bf16.msra.mxu1 %v7249_v23  ;;  %v8747_v20 = vld [vmem:[#allocation60_spill] sm:$0xff]  ;;  %v8748_v23 = vld [vmem:[#allocation61_spill] sm:$0xff] }
 0x2cf   :  { %5299 = vmatprep.subr.bf16.mxu0 %v8738_v48  ;;  %5331 = vmatprep.subr.bf16.mxu1 %v8739_v55  ;;  %v8749_v48 = vld [vmem:[#allocation62_spill] sm:$0xff]  ;;  %v8750_v55 = vld [vmem:[#allocation63_spill] sm:$0xff] }
 0x2d2   :  { %5301 = vmatpush1.bf16.msra.mxu0 %v8740_v9  ;;  %5333 = vmatpush1.bf16.msra.mxu1 %v8741_v45  ;;  %v8751_v9 = vld [vmem:[#allocation64_spill] sm:$0xff]  ;;  %v8752_v45 = vld [vmem:[#allocation65_spill] sm:$0xff] }
 0x2d3   :  { %5303 = vmatprep.subr.bf16.mxu0 %v8742_v37  ;;  %5335 = vmatprep.subr.bf16.mxu1 %v8743_v57  ;;  %v8753_v37 = vld [vmem:[#allocation66_spill] sm:$0xff]  ;;  %v8754_v57 = vld [vmem:[#allocation67_spill] sm:$0xff] }
 0x2d6   :  { %5305 = vmatpush1.bf16.msra.mxu0 %v8744_v59  ;;  %5337 = vmatpush1.bf16.msra.mxu1 %v8745_v62  ;;  %v8755_v59 = vld [vmem:[#allocation68_spill] sm:$0xff]  ;;  %v8756_v62 = vld [vmem:[#allocation69_spill] sm:$0xff] }
 0x2d7   :  { %5307 = vmatprep.subr.bf16.mxu0 %v8746_v6  ;;  %5339 = vmatprep.subr.bf16.mxu1 %v8747_v20  ;;  %v8757_v6 = vld [vmem:[#allocation70_spill] sm:$0xff]  ;;  %v8758_v20 = vld [vmem:[#allocation71_spill] sm:$0xff] }
 0x2da   :  { %5309 = vmatpush1.bf16.msra.mxu0 %v8748_v23  ;;  %5341 = vmatpush1.bf16.msra.mxu1 %v8749_v48  ;;  %v8759_v23 = vld [vmem:[#allocation72_spill] sm:$0xff] }
 0x2db   :  { %5311 = vmatprep.subr.bf16.mxu0 %v8750_v55  ;;  %5343 = vmatprep.subr.bf16.mxu1 %v8751_v9 }
 0x2de   :  { %5313 = vmatpush1.bf16.msra.mxu0 %v8752_v45  ;;  %5345 = vmatpush1.bf16.msra.mxu1 %v8753_v37 }
 0x2df   :  { %5315 = vmatprep.subr.bf16.mxu0 %v8754_v57  ;;  %5347 = vmatprep.subr.bf16.mxu1 %v8755_v59  ;;  %v8762_v59 = vld [vmem:[#allocation108_spill] sm:$0xff] }
 0x2e2   :  { %5317 = vmatpush1.bf16.msra.mxu0 %v8756_v62  ;;  %5349 = vmatpush1.bf16.msra.mxu1 %v8757_v6  ;;  %v8763_v6 = vld [vmem:[#allocation109_spill] sm:$0xff] }
 0x2e3   :  { %5351 = vmatprep.subr.bf16.mxu0 %v8758_v20  ;;  %5383 = vmatprep.subr.bf16.mxu1 %v8759_v23 }
 0x378   :  { %v1469_v48 = vpop.f32.mrb[18].mxu0  ;;  %v1540_v55 = vpop.f32.mrb[18].mxu1 }
 0x379   :  { %v1545_v9 = vadd.f32 %v1469_v48, %v8760_v36  ;;  %v1471_v32 = vpop.f32.mrb[19].mxu0  ;;  %v1542_v45 = vpop.f32.mrb[19].mxu1  ;;  %v1547_v7 = vadd.f32 %v1540_v55, %v8763_v6  ;;  %v8765_v6 = vld [vmem:[#allocation103_spill] sm:$0xff] }
 0x37a   :  { %v1546_v37 = vadd.f32 %v1471_v32, %v8761_v27  ;;  %v1548_v62 = vadd.f32 %v1542_v45, %v8762_v59 }
 0x37b   :  { %v4685_v18 = vmul.f32 -1.442695, %v1545_v9 }
 0x37c   :  { %v4686_v57 = vmul.f32 -1.442695, %v1546_v37  ;;  %v4687_v12 = vmul.f32 -1.442695, %v1548_v62 }
 0x37d   :  { %6578 = vpow2.f32 %v4685_v18 }
 0x37e   :  { %6580 = vpow2.f32 %v4686_v57  ;;  %v8764_v57 = vld [vmem:[#allocation110_spill] sm:$0xff] }
 0x37f   :  { %6582 = vpow2.f32 %v4687_v12 }
 0x380   :  { %6584 = vtanh.f32 %v1547_v7 }
 0x387   :  { %v6579_v20 = vpop.eup %6578 }
 0x388   :  { %v6581_v1 = vpop.eup %6580  ;;  %v1552_v23 = vadd.f32 1.0, %v6579_v20 }
 0x389   :  { %v1558_v60 = vadd.f32 1.0, %v6581_v1  ;;  %v6583_v48 = vpop.eup %6582 }
 0x38a   :  { %6586 = vrcp.f32 %v1552_v23  ;;  %v6585_v36 = vpop.eup %6584  ;;  %v1565_v18 = vadd.f32 1.0, %v6583_v48 }
 0x38b   :  { %6588 = vrcp.f32 %v1558_v60 }
 0x38c   :  { %6590 = vrcp.f32 %v1565_v18 }
 0x394   :  { %v6587_v32 = vpop.eup %6586 }
 0x395   :  { %v6589_v9 = vpop.eup %6588  ;;  %v1569_v37 = vmul.f32 %v6587_v32, %v6585_v36 }
 0x396   :  { %v1568_v27 = vmul.f32 %v6589_v9, %v8764_v57  ;;  %v6591_v48 = vpop.eup %6590 }
 0x398   :  { %v7657_v45 = vadd.f32 %v1569_v37, %v1568_v27  ;;  %v1639_v62 = vpop.f32.mrb[4].mxu0  ;;  %v1710_v55 = vpop.f32.mrb[4].mxu1 }
 0x399   :  { %v6426_v20 = vadd.f32 %v1639_v62, %v8765_v6  ;;  %v1641_v12 = vpop.f32.mrb[5].mxu0  ;;  %v1712_v7 = vpop.f32.mrb[5].mxu1  ;;  %v6442_v9 = vadd.f32 %v1710_v55, %v7442_v30  ;;  %v8768_v55 = vld [vmem:[#allocation77_spill] sm:$0xff] }
 0x39a   :  { %v6427_v1 = vadd.f32 %v1641_v12, %v8704_v26  ;;  %6592 = vtanh.f32 %v7657_v45  ;;  %v6443_v36 = vadd.f32 %v1712_v7, %v8705_v14  ;;  %v8766_v12 = vld [vmem:[#allocation75_spill] sm:$0xff]  ;;  %v8767_v7 = vld [vmem:[#allocation76_spill] sm:$0xff] }
 0x39b   :  { %v4688_v60 = vmul.f32 -1.442695, %v6426_v20 }
 0x39c   :  { %v4689_v23 = vmul.f32 -1.442695, %v6427_v1  ;;  %v4690_v32 = vmul.f32 -1.442695, %v6443_v36  ;;  %v8769_v1 = vld [vmem:[#allocation78_spill] sm:$0xff]  ;;  %v8772_v36 = vld [vmem:[#allocation81_spill] sm:$0xff] }
 0x39d   :  { %6594 = vpow2.f32 %v4688_v60  ;;  %v8770_v60 = vld [vmem:[#allocation79_spill] sm:$0xff] }
 0x39e   :  { %6596 = vpow2.f32 %v4689_v23  ;;  %v8771_v23 = vld [vmem:[#allocation80_spill] sm:$0xff] }
 0x39f   :  { %6598 = vpow2.f32 %v4690_v32  ;;  %v8775_v32 = vld [vmem:[#allocation84_spill] sm:$0xff] }
 0x3a0   :  { %6600 = vtanh.f32 %v6442_v9 }
 0x3a4   :  { %v6593_v27 = vpop.eup %6592 }
 0x3a5   :  { %v1572_v37 = vmul.f32 %v6593_v27, %v6591_v48  ;;  %v8773_v48 = vld [vmem:[#allocation82_spill] sm:$0xff]  ;;  %v8774_v27 = vld [vmem:[#allocation83_spill] sm:$0xff] }
 0x3a7   :  { %v6595_v18 = vpop.eup %6594  ;;  %1808 = vmatmul.mubr.f32.vlgmr.msra.gmra.mrb[20].mxu0 %v1572_v37  ;;  %1879 = vmatmul.mubr.f32.vlgmr.msra.gmra.mrb[20].mxu1 %v1572_v37 }
 0x3a8   :  { %v6597_v57 = vpop.eup %6596  ;;  %v1722_v62 = vadd.f32 1.0, %v6595_v18  ;;  %5353 = vmatpush1.bf16.msra.mxu0 %v8706_v4  ;;  %5385 = vmatpush1.bf16.msra.mxu1 %v8707_v44 }
 0x3a9   :  { %v1728_v20 = vadd.f32 1.0, %v6597_v57  ;;  %5355 = vmatprep.subr.bf16.mxu0 %v8766_v12  ;;  %5387 = vmatprep.subr.bf16.mxu1 %v8767_v7  ;;  %v6599_v9 = vpop.eup %6598  ;;  %v8776_v57 = vld [vmem:[#allocation85_spill] sm:$0xff] }
 0x3aa   :  { %6602 = vrcp.f32 %v1722_v62  ;;  %1949 = vmatprep.mubr.f32.mxu0 %v8641_v51  ;;  %2020 = vmatprep.mubr.f32.mxu1 %v8641_v51  ;;  %v6601_v37 = vpop.eup %6600 }
 0x3ab   :  { %6604 = vrcp.f32 %v1728_v20 }
 0x3ac   :  { %5357 = vmatpush1.bf16.msra.mxu0 %v8768_v55  ;;  %5389 = vmatpush1.bf16.msra.mxu1 %v8769_v1 }
 0x3ad   :  { %5359 = vmatprep.subr.bf16.mxu0 %v8770_v60  ;;  %5391 = vmatprep.subr.bf16.mxu1 %v8771_v23  ;;  %v1735_v60 = vadd.f32 1.0, %v6599_v9  ;;  %v8779_v23 = vld [vmem:[#allocation91_spill] sm:$0xff]  ;;  %v8781_v9 = vld [vmem:[#allocation93_spill] sm:$0xff] }
 0x3af   :  { %6606 = vrcp.f32 %v1735_v60 }
 0x3b0   :  { %5361 = vmatpush1.bf16.msra.mxu0 %v8772_v36  ;;  %5393 = vmatpush1.bf16.msra.mxu1 %v8773_v48 }
 0x3b1   :  { %5363 = vmatprep.subr.bf16.mxu0 %v8774_v27  ;;  %5395 = vmatprep.subr.bf16.mxu1 %v8775_v32  ;;  %v8777_v27 = vld [vmem:[#allocation89_spill] sm:$0xff]  ;;  %v8778_v32 = vld [vmem:[#allocation90_spill] sm:$0xff] }
 0x3b4   :  { %v6603_v18 = vpop.eup %6602  ;;  %5365 = vmatpush1.bf16.msra.mxu0 %v8776_v57  ;;  %5397 = vmatpush1.bf16.msra.mxu1 %v8719_v40  ;;  %v8780_v57 = vld [vmem:[#allocation92_spill] sm:$0xff] }
 0x3b5   :  { %v6605_v62 = vpop.eup %6604  ;;  %v1739_v20 = vmul.f32 %v6603_v18, %v6601_v37  ;;  %5367 = vmatprep.subr.bf16.mxu0 %v8720_v41  ;;  %5399 = vmatprep.subr.bf16.mxu1 %v8721_v21  ;;  %v8782_v37 = vld [vmem:[#allocation94_spill] sm:$0xff]  ;;  %v8783_v18 = vld [vmem:[#allocation95_spill] sm:$0xff] }
 0x3b6   :  { %v1738_v48 = vmul.f32 %v6605_v62, %v7565_v13  ;;  %v8784_v62 = vld [vmem:[#allocation35_spill] sm:$0xff] }
 0x3b8   :  { %v7683_v36 = vadd.f32 %v1739_v20, %v1738_v48  ;;  %5369 = vmatpush1.bf16.msra.mxu0 %v8777_v27  ;;  %5401 = vmatpush1.bf16.msra.mxu1 %v8778_v32  ;;  %v8785_v20 = vld [vmem:[#allocation36_spill] sm:$0xff] }
 0x3b9   :  { %5371 = vmatprep.subr.bf16.mxu0 %v8779_v23  ;;  %5403 = vmatprep.subr.bf16.mxu1 %v8780_v57  ;;  %v6607_v13 = vpop.eup %6606 }
 0x3ba   :  { %6608 = vtanh.f32 %v7683_v36 }
 0x3bc   :  { %5373 = vmatpush1.bf16.msra.mxu0 %v8781_v9  ;;  %5405 = vmatpush1.bf16.msra.mxu1 %v8782_v37 }
 0x3bd   :  { %5375 = vmatprep.subr.bf16.mxu0 %v8783_v18  ;;  %5407 = vmatprep.subr.bf16.mxu1 %v8729_v0 }
 0x3c0   :  { %5377 = vmatpush1.bf16.msra.mxu0 %v8730_v16  ;;  %5409 = vmatpush1.bf16.msra.mxu1 %v8731_v3 }
 0x3c1   :  { %5379 = vmatprep.subr.bf16.mxu0 %v8732_v49  ;;  %5411 = vmatprep.subr.bf16.mxu1 %v8733_v10 }
 0x3c4   :  { %v6609_v60 = vpop.eup %6608  ;;  %5381 = vmatpush1.bf16.msra.mxu0 %v8734_v31  ;;  %5413 = vmatpush1.bf16.msra.mxu1 %v8735_v17 }
 0x3c5   :  { %5415 = vmatprep.subr.bf16.mxu0 %v8736_v53  ;;  %5447 = vmatprep.subr.bf16.mxu1 %v8737_v63  ;;  %v1742_v48 = vmul.f32 %v6609_v60, %v6607_v13  ;;  %v8786_v13 = vld [vmem:[#allocation37_spill] sm:$0xff]  ;;  %v8787_v60 = vld [vmem:[#allocation38_spill] sm:$0xff] }
 0x3c7   :  { %1950 = vmatmul.mubr.f32.vlgmr.msra.gmra.mrb[20].mxu0 %v1742_v48  ;;  %2021 = vmatmul.mubr.f32.vlgmr.msra.gmra.mrb[20].mxu1 %v1742_v48 }
 0x3c8   :  { %5417 = vmatpush1.bf16.msra.mxu0 %v7069_v22  ;;  %5449 = vmatpush1.bf16.msra.mxu1 %v7072_v25 }
 0x3c9   :  { %5419 = vmatprep.subr.bf16.mxu0 %v7076_v29  ;;  %5451 = vmatprep.subr.bf16.mxu1 %v7083_v34 }
 0x3ca   :  { %2119 = vmatprep.mubr.f32.mxu0 %v8641_v51  ;;  %2190 = vmatprep.mubr.f32.mxu1 %v8641_v51 }
 0x3cc   :  { %5421 = vmatpush1.bf16.msra.mxu0 %v7085_v35  ;;  %5453 = vmatpush1.bf16.msra.mxu1 %v7089_v38 }
 0x3cd   :  { %5423 = vmatprep.subr.bf16.mxu0 %v7093_v42  ;;  %5455 = vmatprep.subr.bf16.mxu1 %v7100_v47 }
 0x3d0   :  { %5425 = vmatpush1.bf16.msra.mxu0 %v7104_v50  ;;  %5457 = vmatpush1.bf16.msra.mxu1 %v7108_v54 }
 0x3d1   :  { %5427 = vmatprep.subr.bf16.mxu0 %v7112_v58  ;;  %5459 = vmatprep.subr.bf16.mxu1 %v7116_v61 }
 0x3d4   :  { %5429 = vmatpush1.bf16.msra.mxu0 %v7123_v2  ;;  %5461 = vmatpush1.bf16.msra.mxu1 %v7127_v5 }
 0x3d5   :  { %5431 = vmatprep.subr.bf16.mxu0 %v7131_v8  ;;  %5463 = vmatprep.subr.bf16.mxu1 %v7135_v11 }
 0x3d8   :  { %5433 = vmatpush1.bf16.msra.mxu0 %v7142_v15  ;;  %5465 = vmatpush1.bf16.msra.mxu1 %v7146_v19  ;;  %v8823_v19 = vld [vmem:[#allocation107_spill] sm:$0xff] }
 0x3d9   :  { %5435 = vmatprep.subr.bf16.mxu0 %v7150_v24  ;;  %5467 = vmatprep.subr.bf16.mxu1 %v7154_v28  ;;  %v8788_v28 = vld [vmem:[#allocation39_spill] sm:$0xff] }
 0x3dc   :  { %5437 = vmatpush1.bf16.msra.mxu0 %v7161_v33  ;;  %5469 = vmatpush1.bf16.msra.mxu1 %v7165_v39  ;;  %v8789_v33 = vld [vmem:[#allocation40_spill] sm:$0xff]  ;;  %v8822_v39 = vld [vmem:[#allocation106_spill] sm:$0xff] }
 0x3dd   :  { %5439 = vmatprep.subr.bf16.mxu0 %v7169_v43  ;;  %5471 = vmatprep.subr.bf16.mxu1 %v7173_v46  ;;  %v8790_v43 = vld [vmem:[#allocation41_spill] sm:$0xff]  ;;  %v8791_v46 = vld [vmem:[#allocation42_spill] sm:$0xff] }
 0x3e0   :  { %5441 = vmatpush1.bf16.msra.mxu0 %v7180_v52  ;;  %5473 = vmatpush1.bf16.msra.mxu1 %v7184_v56  ;;  %v8792_v52 = vld [vmem:[#allocation43_spill] sm:$0xff]  ;;  %v8793_v56 = vld [vmem:[#allocation44_spill] sm:$0xff] }
 0x3e1   :  { %5443 = vmatprep.subr.bf16.mxu0 %v8784_v62  ;;  %5475 = vmatprep.subr.bf16.mxu1 %v8785_v20  ;;  %v8803_v20 = vld [vmem:[#allocation54_spill] sm:$0xff]  ;;  %v8804_v62 = vld [vmem:[#allocation55_spill] sm:$0xff] }
 0x3e4   :  { %5445 = vmatpush1.bf16.msra.mxu0 %v8786_v13  ;;  %5477 = vmatpush1.bf16.msra.mxu1 %v8787_v60  ;;  %v8794_v13 = vld [vmem:[#allocation45_spill] sm:$0xff]  ;;  %v8795_v60 = vld [vmem:[#allocation46_spill] sm:$0xff] }
 0x3e5   :  { %5479 = vmatprep.subr.bf16.mxu0 %v8788_v28  ;;  %5511 = vmatprep.subr.bf16.mxu1 %v8789_v33  ;;  %v8796_v28 = vld [vmem:[#allocation47_spill] sm:$0xff]  ;;  %v8797_v33 = vld [vmem:[#allocation48_spill] sm:$0xff] }
 0x3e7   :  { %2120 = vmatmul.mubr.f32.vlgmr.msra.gmra.mrb[6].mxu0 %v1742_v48  ;;  %2191 = vmatmul.mubr.f32.vlgmr.msra.gmra.mrb[6].mxu1 %v1742_v48  ;;  %v8798_v48 = vld [vmem:[#allocation49_spill] sm:$0xff] }
 0x3e8   :  { %5481 = vmatpush1.bf16.msra.mxu0 %v8790_v43  ;;  %5513 = vmatpush1.bf16.msra.mxu1 %v8791_v46  ;;  %v8799_v43 = vld [vmem:[#allocation50_spill] sm:$0xff]  ;;  %v8800_v46 = vld [vmem:[#allocation51_spill] sm:$0xff] }
 0x3e9   :  { %5483 = vmatprep.subr.bf16.mxu0 %v8792_v52  ;;  %5515 = vmatprep.subr.bf16.mxu1 %v8793_v56  ;;  %v8801_v52 = vld [vmem:[#allocation52_spill] sm:$0xff]  ;;  %v8802_v56 = vld [vmem:[#allocation53_spill] sm:$0xff] }
 0x3ea   :  { %2289 = vmatprep.mubr.f32.mxu0 %v8641_v51  ;;  %2360 = vmatprep.mubr.f32.mxu1 %v8641_v51 }
 0x3ec   :  { %5485 = vmatpush1.bf16.msra.mxu0 %v8794_v13  ;;  %5517 = vmatpush1.bf16.msra.mxu1 %v8795_v60  ;;  %v8805_v13 = vld [vmem:[#allocation56_spill] sm:$0xff]  ;;  %v8806_v60 = vld [vmem:[#allocation57_spill] sm:$0xff] }
 0x3ed   :  { %5487 = vmatprep.subr.bf16.mxu0 %v8796_v28  ;;  %5519 = vmatprep.subr.bf16.mxu1 %v8797_v33  ;;  %v8807_v28 = vld [vmem:[#allocation58_spill] sm:$0xff]  ;;  %v8808_v33 = vld [vmem:[#allocation59_spill] sm:$0xff] }
 0x3f0   :  { %5489 = vmatpush1.bf16.msra.mxu0 %v8798_v48  ;;  %5521 = vmatpush1.bf16.msra.mxu1 %v8799_v43  ;;  %v8809_v48 = vld [vmem:[#allocation60_spill] sm:$0xff]  ;;  %v8810_v43 = vld [vmem:[#allocation61_spill] sm:$0xff] }
 0x3f1   :  { %5491 = vmatprep.subr.bf16.mxu0 %v8800_v46  ;;  %5523 = vmatprep.subr.bf16.mxu1 %v8801_v52  ;;  %v8811_v46 = vld [vmem:[#allocation62_spill] sm:$0xff]  ;;  %v8812_v52 = vld [vmem:[#allocation63_spill] sm:$0xff] }
 0x3f4   :  { %5493 = vmatpush1.bf16.msra.mxu0 %v8802_v56  ;;  %5525 = vmatpush1.bf16.msra.mxu1 %v8803_v20  ;;  %v8813_v56 = vld [vmem:[#allocation64_spill] sm:$0xff]  ;;  %v8814_v20 = vld [vmem:[#allocation65_spill] sm:$0xff] }
 0x3f5   :  { %5495 = vmatprep.subr.bf16.mxu0 %v8804_v62  ;;  %5527 = vmatprep.subr.bf16.mxu1 %v8805_v13  ;;  %v8815_v62 = vld [vmem:[#allocation66_spill] sm:$0xff]  ;;  %v8816_v13 = vld [vmem:[#allocation67_spill] sm:$0xff] }
 0x3f8   :  { %5497 = vmatpush1.bf16.msra.mxu0 %v8806_v60  ;;  %5529 = vmatpush1.bf16.msra.mxu1 %v8807_v28  ;;  %v8817_v60 = vld [vmem:[#allocation68_spill] sm:$0xff]  ;;  %v8818_v28 = vld [vmem:[#allocation69_spill] sm:$0xff] }
 0x3f9   :  { %5499 = vmatprep.subr.bf16.mxu0 %v8808_v33  ;;  %5531 = vmatprep.subr.bf16.mxu1 %v8809_v48  ;;  %v8819_v33 = vld [vmem:[#allocation70_spill] sm:$0xff]  ;;  %v8820_v48 = vld [vmem:[#allocation71_spill] sm:$0xff] }
 0x3fc   :  { %5501 = vmatpush1.bf16.msra.mxu0 %v8810_v43  ;;  %5533 = vmatpush1.bf16.msra.mxu1 %v8811_v46  ;;  %v8821_v43 = vld [vmem:[#allocation72_spill] sm:$0xff] }
 0x3fd   :  { %5503 = vmatprep.subr.bf16.mxu0 %v8812_v52  ;;  %5535 = vmatprep.subr.bf16.mxu1 %v8813_v56 }
 0x400   :  { %5505 = vmatpush1.bf16.msra.mxu0 %v8814_v20  ;;  %5537 = vmatpush1.bf16.msra.mxu1 %v8815_v62 }
 0x401   :  { %5507 = vmatprep.subr.bf16.mxu0 %v8816_v13  ;;  %5539 = vmatprep.subr.bf16.mxu1 %v8817_v60 }
 0x404   :  { %5509 = vmatpush1.bf16.msra.mxu0 %v8818_v28  ;;  %5541 = vmatpush1.bf16.msra.mxu1 %v8819_v33  ;;  %v8824_v33 = vld [vmem:[#allocation109_spill] sm:$0xff] }
 0x405   :  { %5543 = vmatprep.subr.bf16.mxu0 %v8820_v48  ;;  %5575 = vmatprep.subr.bf16.mxu1 %v8821_v43 }
 0x49a   :  { %v1951_v46 = vpop.f32.mrb[20].mxu0  ;;  %v2022_v52 = vpop.f32.mrb[20].mxu1 }
 0x49b   :  { %v2027_v56 = vadd.f32 %v1951_v46, %v8822_v39  ;;  %v1953_v24 = vpop.f32.mrb[21].mxu0  ;;  %v2024_v20 = vpop.f32.mrb[21].mxu1  ;;  %v2029_v11 = vadd.f32 %v2022_v52, %v8824_v33 }
 0x49c   :  { %v2028_v62 = vadd.f32 %v1953_v24, %v8823_v19  ;;  %v2030_v28 = vadd.f32 %v2024_v20, %v8762_v59 }
 0x49d   :  { %v4691_v15 = vmul.f32 -1.442695, %v2027_v56 }
 0x49e   :  { %v4692_v13 = vmul.f32 -1.442695, %v2028_v62  ;;  %v4693_v60 = vmul.f32 -1.442695, %v2030_v28 }
 0x49f   :  { %6610 = vpow2.f32 %v4691_v15 }
 0x4a0   :  { %6612 = vpow2.f32 %v4692_v13 }
 0x4a1   :  { %6614 = vpow2.f32 %v4693_v60 }
 0x4a2   :  { %6616 = vtanh.f32 %v2029_v11 }
 0x4a9   :  { %v6611_v48 = vpop.eup %6610 }
 0x4aa   :  { %v6613_v8 = vpop.eup %6612  ;;  %v2034_v43 = vadd.f32 1.0, %v6611_v48 }
 0x4ab   :  { %v2040_v5 = vadd.f32 1.0, %v6613_v8  ;;  %v6615_v46 = vpop.eup %6614 }
 0x4ac   :  { %6618 = vrcp.f32 %v2034_v43  ;;  %v6617_v39 = vpop.eup %6616  ;;  %v2047_v15 = vadd.f32 1.0, %v6615_v46 }
 0x4ad   :  { %6620 = vrcp.f32 %v2040_v5 }
 0x4ae   :  { %6622 = vrcp.f32 %v2047_v15 }
 0x4b6   :  { %v6619_v24 = vpop.eup %6618 }
 0x4b7   :  { %v6621_v56 = vpop.eup %6620  ;;  %v2051_v62 = vmul.f32 %v6619_v24, %v6617_v39 }
 0x4b8   :  { %v2050_v13 = vmul.f32 %v6621_v56, %v7657_v45  ;;  %v6623_v45 = vpop.eup %6622 }
 0x4ba   :  { %v7775_v20 = vadd.f32 %v2051_v62, %v2050_v13  ;;  %v2121_v28 = vpop.f32.mrb[6].mxu0  ;;  %v2192_v52 = vpop.f32.mrb[6].mxu1 }
 0x4bb   :  { %v6428_v48 = vadd.f32 %v2121_v28, %v8765_v6  ;;  %v2123_v60 = vpop.f32.mrb[7].mxu0  ;;  %v2194_v11 = vpop.f32.mrb[7].mxu1  ;;  %v6444_v56 = vadd.f32 %v2192_v52, %v7442_v30  ;;  %v8825_v52 = vld [vmem:[#allocation79_spill] sm:$0xff] }
 0x4bc   :  { %v6429_v8 = vadd.f32 %v2123_v60, %v8704_v26  ;;  %6624 = vtanh.f32 %v7775_v20  ;;  %v6445_v39 = vadd.f32 %v2194_v11, %v8705_v14  ;;  %v8826_v60 = vld [vmem:[#allocation80_spill] sm:$0xff]  ;;  %v8827_v11 = vld [vmem:[#allocation81_spill] sm:$0xff] }
 0x4bd   :  { %v4694_v5 = vmul.f32 -1.442695, %v6428_v48 }
 0x4be   :  { %v4695_v43 = vmul.f32 -1.442695, %v6429_v8  ;;  %v4696_v24 = vmul.f32 -1.442695, %v6445_v39  ;;  %v8828_v8 = vld [vmem:[#allocation82_spill] sm:$0xff] }
 0x4bf   :  { %6626 = vpow2.f32 %v4694_v5  ;;  %v8829_v5 = vld [vmem:[#allocation83_spill] sm:$0xff] }
 0x4c0   :  { %6628 = vpow2.f32 %v4695_v43  ;;  %v8830_v43 = vld [vmem:[#allocation84_spill] sm:$0xff] }
 0x4c1   :  { %6630 = vpow2.f32 %v4696_v24  ;;  %v8831_v24 = vld [vmem:[#allocation85_spill] sm:$0xff] }
 0x4c2   :  { %6632 = vtanh.f32 %v6444_v56 }
 0x4c6   :  { %v6625_v46 = vpop.eup %6624 }
 0x4c7   :  { %v2054_v62 = vmul.f32 %v6625_v46, %v6623_v45 }
 0x4c9   :  { %v6627_v15 = vpop.eup %6626  ;;  %2290 = vmatmul.mubr.f32.vlgmr.msra.gmra.mrb[22].mxu0 %v2054_v62  ;;  %2361 = vmatmul.mubr.f32.vlgmr.msra.gmra.mrb[22].mxu1 %v2054_v62 }
 0x4ca   :  { %v6629_v13 = vpop.eup %6628  ;;  %v2204_v28 = vadd.f32 1.0, %v6627_v15  ;;  %5545 = vmatpush1.bf16.msra.mxu0 %v8706_v4  ;;  %5577 = vmatpush1.bf16.msra.mxu1 %v8707_v44 }
 0x4cb   :  { %v2210_v48 = vadd.f32 1.0, %v6629_v13  ;;  %5547 = vmatprep.subr.bf16.mxu0 %v8766_v12  ;;  %5579 = vmatprep.subr.bf16.mxu1 %v8767_v7  ;;  %v6631_v39 = vpop.eup %6630 }
 0x4cc   :  { %6634 = vrcp.f32 %v2204_v28  ;;  %2431 = vmatprep.mubr.f32.mxu0 %v8641_v51  ;;  %2502 = vmatprep.mubr.f32.mxu1 %v8641_v51  ;;  %v6633_v45 = vpop.eup %6632  ;;  %v2217_v15 = vadd.f32 1.0, %v6631_v39 }
 0x4cd   :  { %6636 = vrcp.f32 %v2210_v48 }
 0x4ce   :  { %5549 = vmatpush1.bf16.msra.mxu0 %v8768_v55  ;;  %5581 = vmatpush1.bf16.msra.mxu1 %v8769_v1  ;;  %6638 = vrcp.f32 %v2217_v15  ;;  %v8836_v15 = vld [vmem:[#allocation26_spill] sm:$0xff] }
 0x4cf   :  { %5551 = vmatprep.subr.bf16.mxu0 %v8825_v52  ;;  %5583 = vmatprep.subr.bf16.mxu1 %v8826_v60 }
 0x4d2   :  { %5553 = vmatpush1.bf16.msra.mxu0 %v8827_v11  ;;  %5585 = vmatpush1.bf16.msra.mxu1 %v8828_v8 }
 0x4d3   :  { %5555 = vmatprep.subr.bf16.mxu0 %v8829_v5  ;;  %5587 = vmatprep.subr.bf16.mxu1 %v8830_v43 }
 0x4d6   :  { %v6635_v46 = vpop.eup %6634  ;;  %5557 = vmatpush1.bf16.msra.mxu0 %v8831_v24  ;;  %5589 = vmatpush1.bf16.msra.mxu1 %v8719_v40 }
 0x4d7   :  { %v6637_v56 = vpop.eup %6636  ;;  %v2221_v62 = vmul.f32 %v6635_v46, %v6633_v45  ;;  %5559 = vmatprep.subr.bf16.mxu0 %v8720_v41  ;;  %5591 = vmatprep.subr.bf16.mxu1 %v8721_v21  ;;  %v8832_v45 = vld [vmem:[#allocation22_spill] sm:$0xff]  ;;  %v8833_v46 = vld [vmem:[#allocation23_spill] sm:$0xff] }
 0x4d8   :  { %v2220_v13 = vmul.f32 %v6637_v56, %v7683_v36  ;;  %v6639_v36 = vpop.eup %6638  ;;  %v8834_v56 = vld [vmem:[#allocation24_spill] sm:$0xff] }
 0x4da   :  { %v7801_v28 = vadd.f32 %v2221_v62, %v2220_v13  ;;  %5561 = vmatpush1.bf16.msra.mxu0 %v8777_v27  ;;  %5593 = vmatpush1.bf16.msra.mxu1 %v8778_v32  ;;  %v8835_v62 = vld [vmem:[#allocation25_spill] sm:$0xff]  ;;  %v8837_v13 = vld [vmem:[#allocation27_spill] sm:$0xff] }
 0x4db   :  { %5563 = vmatprep.subr.bf16.mxu0 %v8779_v23  ;;  %5595 = vmatprep.subr.bf16.mxu1 %v8780_v57 }
 0x4dc   :  { %6640 = vtanh.f32 %v7801_v28 }
 0x4de   :  { %5565 = vmatpush1.bf16.msra.mxu0 %v8781_v9  ;;  %5597 = vmatpush1.bf16.msra.mxu1 %v8782_v37 }
 0x4df   :  { %5567 = vmatprep.subr.bf16.mxu0 %v8783_v18  ;;  %5599 = vmatprep.subr.bf16.mxu1 %v8729_v0 }
 0x4e2   :  { %5569 = vmatpush1.bf16.msra.mxu0 %v8730_v16  ;;  %5601 = vmatpush1.bf16.msra.mxu1 %v8731_v3 }
 0x4e3   :  { %5571 = vmatprep.subr.bf16.mxu0 %v8732_v49  ;;  %5603 = vmatprep.subr.bf16.mxu1 %v8733_v10 }
 0x4e6   :  { %v6641_v48 = vpop.eup %6640  ;;  %5573 = vmatpush1.bf16.msra.mxu0 %v8734_v31  ;;  %5605 = vmatpush1.bf16.msra.mxu1 %v8735_v17 }
 0x4e7   :  { %v2224_v39 = vmul.f32 %v6641_v48, %v6639_v36  ;;  %5607 = vmatprep.subr.bf16.mxu0 %v8736_v53  ;;  %5639 = vmatprep.subr.bf16.mxu1 %v8737_v63  ;;  %v8838_v36 = vld [vmem:[#allocation28_spill] sm:$0xff]  ;;  %v8839_v48 = vld [vmem:[#allocation29_spill] sm:$0xff] }
 0x4e9   :  { %2432 = vmatmul.mubr.f32.vlgmr.msra.gmra.mrb[22].mxu0 %v2224_v39  ;;  %2503 = vmatmul.mubr.f32.vlgmr.msra.gmra.mrb[22].mxu1 %v2224_v39 }
 0x4ea   :  { %5609 = vmatpush1.bf16.msra.mxu0 %v7069_v22  ;;  %5641 = vmatpush1.bf16.msra.mxu1 %v7072_v25 }
 0x4eb   :  { %5611 = vmatprep.subr.bf16.mxu0 %v7076_v29  ;;  %5643 = vmatprep.subr.bf16.mxu1 %v7083_v34 }
 0x4ec   :  { %2601 = vmatprep.mubr.f32.mxu0 %v8641_v51  ;;  %2672 = vmatprep.mubr.f32.mxu1 %v8641_v51 }
 0x4ee   :  { %5613 = vmatpush1.bf16.msra.mxu0 %v7085_v35  ;;  %5645 = vmatpush1.bf16.msra.mxu1 %v7089_v38 }
 0x4ef   :  { %5615 = vmatprep.subr.bf16.mxu0 %v7093_v42  ;;  %5647 = vmatprep.subr.bf16.mxu1 %v7100_v47 }
 0x4f2   :  { %5617 = vmatpush1.bf16.msra.mxu0 %v7104_v50  ;;  %5649 = vmatpush1.bf16.msra.mxu1 %v7108_v54 }
 0x4f3   :  { %5619 = vmatprep.subr.bf16.mxu0 %v7112_v58  ;;  %5651 = vmatprep.subr.bf16.mxu1 %v7116_v61  ;;  %v8840_v58 = vld [vmem:[#allocation30_spill] sm:$0xff]  ;;  %v8841_v61 = vld [vmem:[#allocation31_spill] sm:$0xff] }
 0x4f6   :  { %5621 = vmatpush1.bf16.msra.mxu0 %v7123_v2  ;;  %5653 = vmatpush1.bf16.msra.mxu1 %v8832_v45  ;;  %v8842_v2 = vld [vmem:[#allocation32_spill] sm:$0xff]  ;;  %v8843_v45 = vld [vmem:[#allocation33_spill] sm:$0xff] }
 0x4f7   :  { %5623 = vmatprep.subr.bf16.mxu0 %v8833_v46  ;;  %5655 = vmatprep.subr.bf16.mxu1 %v8834_v56  ;;  %v8844_v46 = vld [vmem:[#allocation34_spill] sm:$0xff]  ;;  %v8845_v56 = vld [vmem:[#allocation35_spill] sm:$0xff] }
 0x4fa   :  { %5625 = vmatpush1.bf16.msra.mxu0 %v8835_v62  ;;  %5657 = vmatpush1.bf16.msra.mxu1 %v8836_v15  ;;  %v8846_v62 = vld [vmem:[#allocation36_spill] sm:$0xff]  ;;  %v8847_v15 = vld [vmem:[#allocation37_spill] sm:$0xff] }
 0x4fb   :  { %5627 = vmatprep.subr.bf16.mxu0 %v8837_v13  ;;  %5659 = vmatprep.subr.bf16.mxu1 %v8838_v36  ;;  %v8848_v13 = vld [vmem:[#allocation38_spill] sm:$0xff]  ;;  %v8849_v36 = vld [vmem:[#allocation39_spill] sm:$0xff] }
 0x4fe   :  { %5629 = vmatpush1.bf16.msra.mxu0 %v8839_v48  ;;  %5661 = vmatpush1.bf16.msra.mxu1 %v8840_v58  ;;  %v8850_v48 = vld [vmem:[#allocation40_spill] sm:$0xff]  ;;  %v8883_v58 = vld [vmem:[#allocation106_spill] sm:$0xff] }
 0x4ff   :  { %5631 = vmatprep.subr.bf16.mxu0 %v8841_v61  ;;  %5663 = vmatprep.subr.bf16.mxu1 %v8842_v2  ;;  %v8851_v61 = vld [vmem:[#allocation41_spill] sm:$0xff]  ;;  %v8852_v2 = vld [vmem:[#allocation42_spill] sm:$0xff] }
 0x502   :  { %5633 = vmatpush1.bf16.msra.mxu0 %v8843_v45  ;;  %5665 = vmatpush1.bf16.msra.mxu1 %v8844_v46  ;;  %v8853_v45 = vld [vmem:[#allocation43_spill] sm:$0xff]  ;;  %v8854_v46 = vld [vmem:[#allocation44_spill] sm:$0xff] }
 0x503   :  { %5635 = vmatprep.subr.bf16.mxu0 %v8845_v56  ;;  %5667 = vmatprep.subr.bf16.mxu1 %v8846_v62  ;;  %v8864_v62 = vld [vmem:[#allocation54_spill] sm:$0xff]  ;;  %v8865_v56 = vld [vmem:[#allocation55_spill] sm:$0xff] }
 0x506   :  { %5637 = vmatpush1.bf16.msra.mxu0 %v8847_v15  ;;  %5669 = vmatpush1.bf16.msra.mxu1 %v8848_v13  ;;  %v8855_v15 = vld [vmem:[#allocation45_spill] sm:$0xff]  ;;  %v8856_v13 = vld [vmem:[#allocation46_spill] sm:$0xff] }
 0x507   :  { %5671 = vmatprep.subr.bf16.mxu0 %v8849_v36  ;;  %5703 = vmatprep.subr.bf16.mxu1 %v8850_v48  ;;  %v8857_v36 = vld [vmem:[#allocation47_spill] sm:$0xff]  ;;  %v8858_v48 = vld [vmem:[#allocation48_spill] sm:$0xff] }
 0x509   :  { %2602 = vmatmul.mubr.f32.vlgmr.msra.gmra.mrb[8].mxu0 %v2224_v39  ;;  %2673 = vmatmul.mubr.f32.vlgmr.msra.gmra.mrb[8].mxu1 %v2224_v39  ;;  %v8859_v39 = vld [vmem:[#allocation49_spill] sm:$0xff] }
 0x50a   :  { %5673 = vmatpush1.bf16.msra.mxu0 %v8851_v61  ;;  %5705 = vmatpush1.bf16.msra.mxu1 %v8852_v2  ;;  %v8860_v61 = vld [vmem:[#allocation50_spill] sm:$0xff]  ;;  %v8861_v2 = vld [vmem:[#allocation51_spill] sm:$0xff] }
 0x50b   :  { %5675 = vmatprep.subr.bf16.mxu0 %v8853_v45  ;;  %5707 = vmatprep.subr.bf16.mxu1 %v8854_v46  ;;  %v8862_v45 = vld [vmem:[#allocation52_spill] sm:$0xff]  ;;  %v8863_v46 = vld [vmem:[#allocation53_spill] sm:$0xff] }
 0x50c   :  { %2771 = vmatprep.mubr.f32.mxu0 %v8641_v51  ;;  %2842 = vmatprep.mubr.f32.mxu1 %v8641_v51 }
 0x50e   :  { %5677 = vmatpush1.bf16.msra.mxu0 %v8855_v15  ;;  %5709 = vmatpush1.bf16.msra.mxu1 %v8856_v13  ;;  %v8866_v15 = vld [vmem:[#allocation56_spill] sm:$0xff]  ;;  %v8867_v13 = vld [vmem:[#allocation57_spill] sm:$0xff] }
 0x50f   :  { %5679 = vmatprep.subr.bf16.mxu0 %v8857_v36  ;;  %5711 = vmatprep.subr.bf16.mxu1 %v8858_v48  ;;  %v8868_v36 = vld [vmem:[#allocation58_spill] sm:$0xff]  ;;  %v8869_v48 = vld [vmem:[#allocation59_spill] sm:$0xff] }
 0x512   :  { %5681 = vmatpush1.bf16.msra.mxu0 %v8859_v39  ;;  %5713 = vmatpush1.bf16.msra.mxu1 %v8860_v61  ;;  %v8870_v39 = vld [vmem:[#allocation60_spill] sm:$0xff]  ;;  %v8871_v61 = vld [vmem:[#allocation61_spill] sm:$0xff] }
 0x513   :  { %5683 = vmatprep.subr.bf16.mxu0 %v8861_v2  ;;  %5715 = vmatprep.subr.bf16.mxu1 %v8862_v45  ;;  %v8872_v2 = vld [vmem:[#allocation62_spill] sm:$0xff]  ;;  %v8873_v45 = vld [vmem:[#allocation63_spill] sm:$0xff] }
 0x516   :  { %5685 = vmatpush1.bf16.msra.mxu0 %v8863_v46  ;;  %5717 = vmatpush1.bf16.msra.mxu1 %v8864_v62  ;;  %v8874_v46 = vld [vmem:[#allocation64_spill] sm:$0xff]  ;;  %v8875_v62 = vld [vmem:[#allocation65_spill] sm:$0xff] }
 0x517   :  { %5687 = vmatprep.subr.bf16.mxu0 %v8865_v56  ;;  %5719 = vmatprep.subr.bf16.mxu1 %v8866_v15  ;;  %v8876_v56 = vld [vmem:[#allocation66_spill] sm:$0xff]  ;;  %v8877_v15 = vld [vmem:[#allocation67_spill] sm:$0xff] }
 0x51a   :  { %5689 = vmatpush1.bf16.msra.mxu0 %v8867_v13  ;;  %5721 = vmatpush1.bf16.msra.mxu1 %v8868_v36  ;;  %v8878_v13 = vld [vmem:[#allocation68_spill] sm:$0xff]  ;;  %v8879_v36 = vld [vmem:[#allocation69_spill] sm:$0xff] }
 0x51b   :  { %5691 = vmatprep.subr.bf16.mxu0 %v8869_v48  ;;  %5723 = vmatprep.subr.bf16.mxu1 %v8870_v39  ;;  %v8880_v48 = vld [vmem:[#allocation70_spill] sm:$0xff]  ;;  %v8881_v39 = vld [vmem:[#allocation71_spill] sm:$0xff] }
 0x51e   :  { %5693 = vmatpush1.bf16.msra.mxu0 %v8871_v61  ;;  %5725 = vmatpush1.bf16.msra.mxu1 %v8872_v2  ;;  %v8882_v61 = vld [vmem:[#allocation72_spill] sm:$0xff] }
 0x51f   :  { %5695 = vmatprep.subr.bf16.mxu0 %v8873_v45  ;;  %5727 = vmatprep.subr.bf16.mxu1 %v8874_v46 }
 0x522   :  { %5697 = vmatpush1.bf16.msra.mxu0 %v8875_v62  ;;  %5729 = vmatpush1.bf16.msra.mxu1 %v8876_v56 }
 0x523   :  { %5699 = vmatprep.subr.bf16.mxu0 %v8877_v15  ;;  %5731 = vmatprep.subr.bf16.mxu1 %v8878_v13 }
 0x526   :  { %5701 = vmatpush1.bf16.msra.mxu0 %v8879_v36  ;;  %5733 = vmatpush1.bf16.msra.mxu1 %v8880_v48 }
 0x527   :  { %5735 = vmatprep.subr.bf16.mxu0 %v8881_v39  ;;  %5767 = vmatprep.subr.bf16.mxu1 %v8882_v61 }
 0x5bc   :  { %v2433_v2 = vpop.f32.mrb[22].mxu0  ;;  %v2504_v45 = vpop.f32.mrb[22].mxu1 }
 0x5bd   :  { %v2509_v46 = vadd.f32 %v2433_v2, %v8883_v58  ;;  %v2435_v54 = vpop.f32.mrb[23].mxu0  ;;  %v2506_v62 = vpop.f32.mrb[23].mxu1  ;;  %v2511_v48 = vadd.f32 %v2504_v45, %v8824_v33 }
 0x5be   :  { %v2510_v56 = vadd.f32 %v2435_v54, %v8823_v19  ;;  %v2512_v36 = vadd.f32 %v2506_v62, %v8762_v59 }
 0x5bf   :  { %v4697_v50 = vmul.f32 -1.442695, %v2509_v46 }
 0x5c0   :  { %v4698_v15 = vmul.f32 -1.442695, %v2510_v56  ;;  %v4699_v13 = vmul.f32 -1.442695, %v2512_v36 }
 0x5c1   :  { %6642 = vpow2.f32 %v4697_v50 }
 0x5c2   :  { %6644 = vpow2.f32 %v4698_v15 }
 0x5c3   :  { %6646 = vpow2.f32 %v4699_v13 }
 0x5c4   :  { %6648 = vtanh.f32 %v2511_v48 }
 0x5cb   :  { %v6643_v39 = vpop.eup %6642 }
 0x5cc   :  { %v6645_v47 = vpop.eup %6644  ;;  %v2516_v61 = vadd.f32 1.0, %v6643_v39 }
 0x5cd   :  { %v2522_v42 = vadd.f32 1.0, %v6645_v47  ;;  %v6647_v2 = vpop.eup %6646 }
 0x5ce   :  { %6650 = vrcp.f32 %v2516_v61  ;;  %v6649_v58 = vpop.eup %6648  ;;  %v2529_v50 = vadd.f32 1.0, %v6647_v2 }
 0x5cf   :  { %6652 = vrcp.f32 %v2522_v42 }
 0x5d0   :  { %6654 = vrcp.f32 %v2529_v50 }
 0x5d8   :  { %v6651_v54 = vpop.eup %6650 }
 0x5d9   :  { %v6653_v46 = vpop.eup %6652  ;;  %v2533_v56 = vmul.f32 %v6651_v54, %v6649_v58 }
 0x5da   :  { %v2532_v15 = vmul.f32 %v6653_v46, %v7775_v20  ;;  %v6655_v20 = vpop.eup %6654 }
 0x5dc   :  { %v7893_v62 = vadd.f32 %v2533_v56, %v2532_v15  ;;  %v2603_v36 = vpop.f32.mrb[8].mxu0  ;;  %v2674_v45 = vpop.f32.mrb[8].mxu1 }
 0x5dd   :  { %v6430_v39 = vadd.f32 %v2603_v36, %v8765_v6  ;;  %v2605_v13 = vpop.f32.mrb[9].mxu0  ;;  %v2676_v48 = vpop.f32.mrb[9].mxu1  ;;  %v6446_v46 = vadd.f32 %v2674_v45, %v7442_v30 }
 0x5de   :  { %v6431_v47 = vadd.f32 %v2605_v13, %v8704_v26  ;;  %6656 = vtanh.f32 %v7893_v62  ;;  %v6447_v58 = vadd.f32 %v2676_v48, %v8705_v14 }
 0x5df   :  { %v4700_v42 = vmul.f32 -1.442695, %v6430_v39 }
 0x5e0   :  { %v4701_v61 = vmul.f32 -1.442695, %v6431_v47  ;;  %v4702_v54 = vmul.f32 -1.442695, %v6447_v58 }
 0x5e1   :  { %6658 = vpow2.f32 %v4700_v42 }
 0x5e2   :  { %6660 = vpow2.f32 %v4701_v61 }
 0x5e3   :  { %6662 = vpow2.f32 %v4702_v54 }
 0x5e4   :  { %6664 = vtanh.f32 %v6446_v46  ;;  %v8884_v46 = vld [vmem:[#allocation15_spill] sm:$0xff] }
 0x5e8   :  { %v6657_v2 = vpop.eup %6656 }
 0x5e9   :  { %v2536_v56 = vmul.f32 %v6657_v2, %v6655_v20 }
 0x5eb   :  { %v6659_v50 = vpop.eup %6658  ;;  %2772 = vmatmul.mubr.f32.vlgmr.msra.gmra.mrb[24].mxu0 %v2536_v56  ;;  %2843 = vmatmul.mubr.f32.vlgmr.msra.gmra.mrb[24].mxu1 %v2536_v56  ;;  %v8885_v56 = vld [vmem:[#allocation16_spill] sm:$0xff] }
 0x5ec   :  { %v6661_v15 = vpop.eup %6660  ;;  %v2686_v36 = vadd.f32 1.0, %v6659_v50  ;;  %5737 = vmatpush1.bf16.msra.mxu0 %v8706_v4  ;;  %5769 = vmatpush1.bf16.msra.mxu1 %v8707_v44  ;;  %v8886_v50 = vld [vmem:[#allocation17_spill] sm:$0xff] }
 0x5ed   :  { %v2692_v39 = vadd.f32 1.0, %v6661_v15  ;;  %5739 = vmatprep.subr.bf16.mxu0 %v8766_v12  ;;  %5771 = vmatprep.subr.bf16.mxu1 %v8767_v7  ;;  %v6663_v45 = vpop.eup %6662  ;;  %v8887_v15 = vld [vmem:[#allocation18_spill] sm:$0xff] }
 0x5ee   :  { %6666 = vrcp.f32 %v2686_v36  ;;  %2913 = vmatprep.mubr.f32.mxu0 %v8641_v51  ;;  %2984 = vmatprep.mubr.f32.mxu1 %v8641_v51  ;;  %v6665_v13 = vpop.eup %6664  ;;  %v2699_v61 = vadd.f32 1.0, %v6663_v45  ;;  %v8888_v36 = vld [vmem:[#allocation19_spill] sm:$0xff]  ;;  %v8890_v45 = vld [vmem:[#allocation21_spill] sm:$0xff] }
 0x5ef   :  { %6668 = vrcp.f32 %v2692_v39  ;;  %v8889_v39 = vld [vmem:[#allocation20_spill] sm:$0xff] }
 0x5f0   :  { %5741 = vmatpush1.bf16.msra.mxu0 %v8768_v55  ;;  %5773 = vmatpush1.bf16.msra.mxu1 %v8769_v1  ;;  %6670 = vrcp.f32 %v2699_v61  ;;  %v8895_v61 = vld [vmem:[#allocation26_spill] sm:$0xff] }
 0x5f1   :  { %5743 = vmatprep.subr.bf16.mxu0 %v8825_v52  ;;  %5775 = vmatprep.subr.bf16.mxu1 %v8826_v60 }
 0x5f4   :  { %5745 = vmatpush1.bf16.msra.mxu0 %v8827_v11  ;;  %5777 = vmatpush1.bf16.msra.mxu1 %v8828_v8 }
 0x5f5   :  { %5747 = vmatprep.subr.bf16.mxu0 %v8829_v5  ;;  %5779 = vmatprep.subr.bf16.mxu1 %v8830_v43 }
 0x5f8   :  { %v6667_v48 = vpop.eup %6666  ;;  %5749 = vmatpush1.bf16.msra.mxu0 %v8831_v24  ;;  %5781 = vmatpush1.bf16.msra.mxu1 %v8719_v40 }
 0x5f9   :  { %v6669_v47 = vpop.eup %6668  ;;  %v2703_v42 = vmul.f32 %v6667_v48, %v6665_v13  ;;  %5751 = vmatprep.subr.bf16.mxu0 %v8720_v41  ;;  %5783 = vmatprep.subr.bf16.mxu1 %v8721_v21  ;;  %v8891_v13 = vld [vmem:[#allocation22_spill] sm:$0xff]  ;;  %v8892_v48 = vld [vmem:[#allocation23_spill] sm:$0xff] }
 0x5fa   :  { %v2702_v58 = vmul.f32 %v6669_v47, %v7801_v28  ;;  %v6671_v28 = vpop.eup %6670  ;;  %v8893_v47 = vld [vmem:[#allocation24_spill] sm:$0xff] }
 0x5fc   :  { %v7919_v20 = vadd.f32 %v2703_v42, %v2702_v58  ;;  %5753 = vmatpush1.bf16.msra.mxu0 %v8777_v27  ;;  %5785 = vmatpush1.bf16.msra.mxu1 %v8778_v32  ;;  %v8894_v42 = vld [vmem:[#allocation25_spill] sm:$0xff]  ;;  %v8896_v58 = vld [vmem:[#allocation27_spill] sm:$0xff] }
 0x5fd   :  { %5755 = vmatprep.subr.bf16.mxu0 %v8779_v23  ;;  %5787 = vmatprep.subr.bf16.mxu1 %v8780_v57 }
 0x5fe   :  { %6672 = vtanh.f32 %v7919_v20 }
 0x600   :  { %5757 = vmatpush1.bf16.msra.mxu0 %v8781_v9  ;;  %5789 = vmatpush1.bf16.msra.mxu1 %v8782_v37 }
 0x601   :  { %5759 = vmatprep.subr.bf16.mxu0 %v8783_v18  ;;  %5791 = vmatprep.subr.bf16.mxu1 %v8729_v0 }
 0x604   :  { %5761 = vmatpush1.bf16.msra.mxu0 %v8730_v16  ;;  %5793 = vmatpush1.bf16.msra.mxu1 %v8731_v3 }
 0x605   :  { %5763 = vmatprep.subr.bf16.mxu0 %v8732_v49  ;;  %5795 = vmatprep.subr.bf16.mxu1 %v8733_v10 }
 0x608   :  { %v6673_v2 = vpop.eup %6672  ;;  %5765 = vmatpush1.bf16.msra.mxu0 %v8734_v31  ;;  %5797 = vmatpush1.bf16.msra.mxu1 %v8735_v17 }
 0x609   :  { %5799 = vmatprep.subr.bf16.mxu0 %v8736_v53  ;;  %5831 = vmatprep.subr.bf16.mxu1 %v8737_v63  ;;  %v2706_v54 = vmul.f32 %v6673_v2, %v6671_v28  ;;  %v8897_v28 = vld [vmem:[#allocation28_spill] sm:$0xff]  ;;  %v8898_v2 = vld [vmem:[#allocation29_spill] sm:$0xff] }
 0x60b   :  { %2914 = vmatmul.mubr.f32.vlgmr.msra.gmra.mrb[24].mxu0 %v2706_v54  ;;  %2985 = vmatmul.mubr.f32.vlgmr.msra.gmra.mrb[24].mxu1 %v2706_v54 }
 0x60c   :  { %5801 = vmatpush1.bf16.msra.mxu0 %v7069_v22  ;;  %5833 = vmatpush1.bf16.msra.mxu1 %v7072_v25 }
 0x60d   :  { %5803 = vmatprep.subr.bf16.mxu0 %v7076_v29  ;;  %5835 = vmatprep.subr.bf16.mxu1 %v7083_v34 }
 0x60e   :  { %3083 = vmatprep.mubr.f32.mxu0 %v8641_v51  ;;  %3154 = vmatprep.mubr.f32.mxu1 %v8641_v51 }
 0x610   :  { %5805 = vmatpush1.bf16.msra.mxu0 %v7085_v35  ;;  %5837 = vmatpush1.bf16.msra.mxu1 %v7089_v38 }
 0x611   :  { %5807 = vmatprep.subr.bf16.mxu0 %v8884_v46  ;;  %5839 = vmatprep.subr.bf16.mxu1 %v8885_v56 }
 0x614   :  { %5809 = vmatpush1.bf16.msra.mxu0 %v8886_v50  ;;  %5841 = vmatpush1.bf16.msra.mxu1 %v8887_v15 }
 0x615   :  { %5811 = vmatprep.subr.bf16.mxu0 %v8888_v36  ;;  %5843 = vmatprep.subr.bf16.mxu1 %v8889_v39  ;;  %v8899_v36 = vld [vmem:[#allocation30_spill] sm:$0xff]  ;;  %v8900_v39 = vld [vmem:[#allocation31_spill] sm:$0xff] }
 0x618   :  { %5813 = vmatpush1.bf16.msra.mxu0 %v8890_v45  ;;  %5845 = vmatpush1.bf16.msra.mxu1 %v8891_v13  ;;  %v8901_v45 = vld [vmem:[#allocation32_spill] sm:$0xff]  ;;  %v8902_v13 = vld [vmem:[#allocation33_spill] sm:$0xff] }
 0x619   :  { %5815 = vmatprep.subr.bf16.mxu0 %v8892_v48  ;;  %5847 = vmatprep.subr.bf16.mxu1 %v8893_v47  ;;  %v8903_v48 = vld [vmem:[#allocation34_spill] sm:$0xff]  ;;  %v8904_v47 = vld [vmem:[#allocation35_spill] sm:$0xff] }
 0x61c   :  { %5817 = vmatpush1.bf16.msra.mxu0 %v8894_v42  ;;  %5849 = vmatpush1.bf16.msra.mxu1 %v8895_v61  ;;  %v8905_v42 = vld [vmem:[#allocation36_spill] sm:$0xff]  ;;  %v8906_v61 = vld [vmem:[#allocation37_spill] sm:$0xff] }
 0x61d   :  { %5819 = vmatprep.subr.bf16.mxu0 %v8896_v58  ;;  %5851 = vmatprep.subr.bf16.mxu1 %v8897_v28  ;;  %v8907_v58 = vld [vmem:[#allocation38_spill] sm:$0xff]  ;;  %v8908_v28 = vld [vmem:[#allocation39_spill] sm:$0xff] }
 0x620   :  { %5821 = vmatpush1.bf16.msra.mxu0 %v8898_v2  ;;  %5853 = vmatpush1.bf16.msra.mxu1 %v8899_v36  ;;  %v8909_v2 = vld [vmem:[#allocation40_spill] sm:$0xff]  ;;  %v8942_v36 = vld [vmem:[#allocation106_spill] sm:$0xff] }
 0x621   :  { %5823 = vmatprep.subr.bf16.mxu0 %v8900_v39  ;;  %5855 = vmatprep.subr.bf16.mxu1 %v8901_v45  ;;  %v8910_v39 = vld [vmem:[#allocation41_spill] sm:$0xff]  ;;  %v8911_v45 = vld [vmem:[#allocation42_spill] sm:$0xff] }
 0x624   :  { %5825 = vmatpush1.bf16.msra.mxu0 %v8902_v13  ;;  %5857 = vmatpush1.bf16.msra.mxu1 %v8903_v48  ;;  %v8912_v13 = vld [vmem:[#allocation43_spill] sm:$0xff]  ;;  %v8913_v48 = vld [vmem:[#allocation44_spill] sm:$0xff] }
 0x625   :  { %5827 = vmatprep.subr.bf16.mxu0 %v8904_v47  ;;  %5859 = vmatprep.subr.bf16.mxu1 %v8905_v42  ;;  %v8923_v42 = vld [vmem:[#allocation54_spill] sm:$0xff]  ;;  %v8924_v47 = vld [vmem:[#allocation55_spill] sm:$0xff] }
 0x628   :  { %5829 = vmatpush1.bf16.msra.mxu0 %v8906_v61  ;;  %5861 = vmatpush1.bf16.msra.mxu1 %v8907_v58  ;;  %v8914_v61 = vld [vmem:[#allocation45_spill] sm:$0xff]  ;;  %v8915_v58 = vld [vmem:[#allocation46_spill] sm:$0xff] }
 0x629   :  { %5863 = vmatprep.subr.bf16.mxu0 %v8908_v28  ;;  %5895 = vmatprep.subr.bf16.mxu1 %v8909_v2  ;;  %v8916_v28 = vld [vmem:[#allocation47_spill] sm:$0xff]  ;;  %v8917_v2 = vld [vmem:[#allocation48_spill] sm:$0xff] }
 0x62b   :  { %3084 = vmatmul.mubr.f32.vlgmr.msra.gmra.mrb[10].mxu0 %v2706_v54  ;;  %3155 = vmatmul.mubr.f32.vlgmr.msra.gmra.mrb[10].mxu1 %v2706_v54  ;;  %v8918_v54 = vld [vmem:[#allocation49_spill] sm:$0xff] }
 0x62c   :  { %5865 = vmatpush1.bf16.msra.mxu0 %v8910_v39  ;;  %5897 = vmatpush1.bf16.msra.mxu1 %v8911_v45  ;;  %v8919_v39 = vld [vmem:[#allocation50_spill] sm:$0xff]  ;;  %v8920_v45 = vld [vmem:[#allocation51_spill] sm:$0xff] }
 0x62d   :  { %5867 = vmatprep.subr.bf16.mxu0 %v8912_v13  ;;  %5899 = vmatprep.subr.bf16.mxu1 %v8913_v48  ;;  %v8921_v13 = vld [vmem:[#allocation52_spill] sm:$0xff]  ;;  %v8922_v48 = vld [vmem:[#allocation53_spill] sm:$0xff] }
 0x62e   :  { %3253 = vmatprep.mubr.f32.mxu0 %v8641_v51  ;;  %3324 = vmatprep.mubr.f32.mxu1 %v8641_v51 }
 0x630   :  { %5869 = vmatpush1.bf16.msra.mxu0 %v8914_v61  ;;  %5901 = vmatpush1.bf16.msra.mxu1 %v8915_v58  ;;  %v8925_v61 = vld [vmem:[#allocation56_spill] sm:$0xff]  ;;  %v8926_v58 = vld [vmem:[#allocation57_spill] sm:$0xff] }
 0x631   :  { %5871 = vmatprep.subr.bf16.mxu0 %v8916_v28  ;;  %5903 = vmatprep.subr.bf16.mxu1 %v8917_v2  ;;  %v8927_v28 = vld [vmem:[#allocation58_spill] sm:$0xff]  ;;  %v8928_v2 = vld [vmem:[#allocation59_spill] sm:$0xff] }
 0x634   :  { %5873 = vmatpush1.bf16.msra.mxu0 %v8918_v54  ;;  %5905 = vmatpush1.bf16.msra.mxu1 %v8919_v39  ;;  %v8929_v54 = vld [vmem:[#allocation60_spill] sm:$0xff]  ;;  %v8930_v39 = vld [vmem:[#allocation61_spill] sm:$0xff] }
 0x635   :  { %5875 = vmatprep.subr.bf16.mxu0 %v8920_v45  ;;  %5907 = vmatprep.subr.bf16.mxu1 %v8921_v13  ;;  %v8931_v45 = vld [vmem:[#allocation62_spill] sm:$0xff]  ;;  %v8932_v13 = vld [vmem:[#allocation63_spill] sm:$0xff] }
 0x638   :  { %5877 = vmatpush1.bf16.msra.mxu0 %v8922_v48  ;;  %5909 = vmatpush1.bf16.msra.mxu1 %v8923_v42  ;;  %v8933_v48 = vld [vmem:[#allocation64_spill] sm:$0xff]  ;;  %v8934_v42 = vld [vmem:[#allocation65_spill] sm:$0xff] }
 0x639   :  { %5879 = vmatprep.subr.bf16.mxu0 %v8924_v47  ;;  %5911 = vmatprep.subr.bf16.mxu1 %v8925_v61  ;;  %v8935_v47 = vld [vmem:[#allocation66_spill] sm:$0xff]  ;;  %v8936_v61 = vld [vmem:[#allocation67_spill] sm:$0xff] }
 0x63c   :  { %5881 = vmatpush1.bf16.msra.mxu0 %v8926_v58  ;;  %5913 = vmatpush1.bf16.msra.mxu1 %v8927_v28  ;;  %v8937_v58 = vld [vmem:[#allocation68_spill] sm:$0xff]  ;;  %v8938_v28 = vld [vmem:[#allocation69_spill] sm:$0xff] }
 0x63d   :  { %5883 = vmatprep.subr.bf16.mxu0 %v8928_v2  ;;  %5915 = vmatprep.subr.bf16.mxu1 %v8929_v54  ;;  %v8939_v2 = vld [vmem:[#allocation70_spill] sm:$0xff]  ;;  %v8940_v54 = vld [vmem:[#allocation71_spill] sm:$0xff] }
 0x640   :  { %5885 = vmatpush1.bf16.msra.mxu0 %v8930_v39  ;;  %5917 = vmatpush1.bf16.msra.mxu1 %v8931_v45  ;;  %v8941_v39 = vld [vmem:[#allocation72_spill] sm:$0xff] }
 0x641   :  { %5887 = vmatprep.subr.bf16.mxu0 %v8932_v13  ;;  %5919 = vmatprep.subr.bf16.mxu1 %v8933_v48 }
 0x644   :  { %5889 = vmatpush1.bf16.msra.mxu0 %v8934_v42  ;;  %5921 = vmatpush1.bf16.msra.mxu1 %v8935_v47 }
 0x645   :  { %5891 = vmatprep.subr.bf16.mxu0 %v8936_v61  ;;  %5923 = vmatprep.subr.bf16.mxu1 %v8937_v58 }
 0x648   :  { %5893 = vmatpush1.bf16.msra.mxu0 %v8938_v28  ;;  %5925 = vmatpush1.bf16.msra.mxu1 %v8939_v2 }
 0x649   :  { %5927 = vmatprep.subr.bf16.mxu0 %v8940_v54  ;;  %5959 = vmatprep.subr.bf16.mxu1 %v8941_v39 }
 0x6de   :  { %v2915_v45 = vpop.f32.mrb[24].mxu0  ;;  %v2986_v13 = vpop.f32.mrb[24].mxu1 }
 0x6df   :  { %v2991_v48 = vadd.f32 %v2915_v45, %v8942_v36  ;;  %v2917_v15 = vpop.f32.mrb[25].mxu0  ;;  %v2988_v42 = vpop.f32.mrb[25].mxu1  ;;  %v2993_v2 = vadd.f32 %v2986_v13, %v8824_v33 }
 0x6e0   :  { %v2992_v47 = vadd.f32 %v2917_v15, %v8823_v19  ;;  %v2994_v28 = vadd.f32 %v2988_v42, %v8762_v59 }
 0x6e1   :  { %v4703_v50 = vmul.f32 -1.442695, %v2991_v48 }
 0x6e2   :  { %v4704_v61 = vmul.f32 -1.442695, %v2992_v47  ;;  %v4705_v58 = vmul.f32 -1.442695, %v2994_v28 }
 0x6e3   :  { %6674 = vpow2.f32 %v4703_v50 }
 0x6e4   :  { %6676 = vpow2.f32 %v4704_v61 }
 0x6e5   :  { %6678 = vpow2.f32 %v4705_v58 }
 0x6e6   :  { %6680 = vtanh.f32 %v2993_v2 }
 0x6ed   :  { %v6675_v54 = vpop.eup %6674 }
 0x6ee   :  { %v6677_v56 = vpop.eup %6676  ;;  %v2998_v39 = vadd.f32 1.0, %v6675_v54 }
 0x6ef   :  { %v3004_v46 = vadd.f32 1.0, %v6677_v56  ;;  %v6679_v45 = vpop.eup %6678 }
 0x6f0   :  { %6682 = vrcp.f32 %v2998_v39  ;;  %v6681_v36 = vpop.eup %6680  ;;  %v3011_v50 = vadd.f32 1.0, %v6679_v45 }
 0x6f1   :  { %6684 = vrcp.f32 %v3004_v46 }
 0x6f2   :  { %6686 = vrcp.f32 %v3011_v50 }
 0x6fa   :  { %v6683_v15 = vpop.eup %6682 }
 0x6fb   :  { %v6685_v48 = vpop.eup %6684  ;;  %v3015_v47 = vmul.f32 %v6683_v15, %v6681_v36 }
 0x6fc   :  { %v3014_v61 = vmul.f32 %v6685_v48, %v7893_v62  ;;  %v6687_v62 = vpop.eup %6686 }
 0x6fe   :  { %v8011_v42 = vadd.f32 %v3015_v47, %v3014_v61  ;;  %v3085_v28 = vpop.f32.mrb[10].mxu0  ;;  %v3156_v13 = vpop.f32.mrb[10].mxu1 }
 0x6ff   :  { %v6432_v54 = vadd.f32 %v3085_v28, %v8765_v6  ;;  %v3087_v58 = vpop.f32.mrb[11].mxu0  ;;  %v3158_v2 = vpop.f32.mrb[11].mxu1  ;;  %v6448_v48 = vadd.f32 %v3156_v13, %v7442_v30 }
 0x700   :  { %v6433_v56 = vadd.f32 %v3087_v58, %v8704_v26  ;;  %6688 = vtanh.f32 %v8011_v42  ;;  %v6449_v36 = vadd.f32 %v3158_v2, %v8705_v14 }
 0x701   :  { %v4706_v46 = vmul.f32 -1.442695, %v6432_v54 }
 0x702   :  { %v4707_v39 = vmul.f32 -1.442695, %v6433_v56  ;;  %v4708_v15 = vmul.f32 -1.442695, %v6449_v36 }
 0x703   :  { %6690 = vpow2.f32 %v4706_v46 }
 0x704   :  { %6692 = vpow2.f32 %v4707_v39 }
 0x705   :  { %6694 = vpow2.f32 %v4708_v15 }
 0x706   :  { %6696 = vtanh.f32 %v6448_v48  ;;  %v8943_v48 = vld [vmem:[#allocation15_spill] sm:$0xff] }
 0x70a   :  { %v6689_v45 = vpop.eup %6688 }
 0x70b   :  { %v3018_v47 = vmul.f32 %v6689_v45, %v6687_v62 }
 0x70d   :  { %v6691_v50 = vpop.eup %6690  ;;  %3254 = vmatmul.mubr.f32.vlgmr.msra.gmra.mrb[26].mxu0 %v3018_v47  ;;  %3325 = vmatmul.mubr.f32.vlgmr.msra.gmra.mrb[26].mxu1 %v3018_v47  ;;  %v8944_v47 = vld [vmem:[#allocation16_spill] sm:$0xff] }
 0x70e   :  { %v6693_v61 = vpop.eup %6692  ;;  %v3168_v28 = vadd.f32 1.0, %v6691_v50  ;;  %5929 = vmatpush1.bf16.msra.mxu0 %v8706_v4  ;;  %5961 = vmatpush1.bf16.msra.mxu1 %v8707_v44  ;;  %v8945_v50 = vld [vmem:[#allocation17_spill] sm:$0xff] }
 0x70f   :  { %v3174_v54 = vadd.f32 1.0, %v6693_v61  ;;  %5931 = vmatprep.subr.bf16.mxu0 %v8766_v12  ;;  %5963 = vmatprep.subr.bf16.mxu1 %v8767_v7  ;;  %v6695_v13 = vpop.eup %6694  ;;  %v8946_v61 = vld [vmem:[#allocation18_spill] sm:$0xff] }
 0x710   :  { %6698 = vrcp.f32 %v3168_v28  ;;  %3395 = vmatprep.mubr.f32.mxu0 %v8641_v51  ;;  %3466 = vmatprep.mubr.f32.mxu1 %v8641_v51  ;;  %v6697_v58 = vpop.eup %6696  ;;  %v3181_v39 = vadd.f32 1.0, %v6695_v13  ;;  %v8947_v28 = vld [vmem:[#allocation19_spill] sm:$0xff]  ;;  %v8949_v13 = vld [vmem:[#allocation21_spill] sm:$0xff] }
 0x711   :  { %6700 = vrcp.f32 %v3174_v54  ;;  %v8948_v54 = vld [vmem:[#allocation20_spill] sm:$0xff] }
 0x712   :  { %5933 = vmatpush1.bf16.msra.mxu0 %v8768_v55  ;;  %5965 = vmatpush1.bf16.msra.mxu1 %v8769_v1  ;;  %6702 = vrcp.f32 %v3181_v39  ;;  %v8954_v39 = vld [vmem:[#allocation26_spill] sm:$0xff] }
 0x713   :  { %5935 = vmatprep.subr.bf16.mxu0 %v8825_v52  ;;  %5967 = vmatprep.subr.bf16.mxu1 %v8826_v60 }
 0x716   :  { %5937 = vmatpush1.bf16.msra.mxu0 %v8827_v11  ;;  %5969 = vmatpush1.bf16.msra.mxu1 %v8828_v8 }
 0x717   :  { %5939 = vmatprep.subr.bf16.mxu0 %v8829_v5  ;;  %5971 = vmatprep.subr.bf16.mxu1 %v8830_v43 }
 0x71a   :  { %v6699_v2 = vpop.eup %6698  ;;  %5941 = vmatpush1.bf16.msra.mxu0 %v8831_v24  ;;  %5973 = vmatpush1.bf16.msra.mxu1 %v8719_v40 }
 0x71b   :  { %v6701_v56 = vpop.eup %6700  ;;  %v3185_v46 = vmul.f32 %v6699_v2, %v6697_v58  ;;  %5943 = vmatprep.subr.bf16.mxu0 %v8720_v41  ;;  %5975 = vmatprep.subr.bf16.mxu1 %v8721_v21  ;;  %v8950_v58 = vld [vmem:[#allocation22_spill] sm:$0xff]  ;;  %v8951_v2 = vld [vmem:[#allocation23_spill] sm:$0xff] }
 0x71c   :  { %v3184_v36 = vmul.f32 %v6701_v56, %v7919_v20  ;;  %v6703_v20 = vpop.eup %6702  ;;  %v8952_v56 = vld [vmem:[#allocation24_spill] sm:$0xff] }
 0x71e   :  { %v8037_v62 = vadd.f32 %v3185_v46, %v3184_v36  ;;  %5945 = vmatpush1.bf16.msra.mxu0 %v8777_v27  ;;  %5977 = vmatpush1.bf16.msra.mxu1 %v8778_v32  ;;  %v8953_v46 = vld [vmem:[#allocation25_spill] sm:$0xff]  ;;  %v8955_v36 = vld [vmem:[#allocation27_spill] sm:$0xff] }
 0x71f   :  { %5947 = vmatprep.subr.bf16.mxu0 %v8779_v23  ;;  %5979 = vmatprep.subr.bf16.mxu1 %v8780_v57 }
 0x720   :  { %6704 = vtanh.f32 %v8037_v62 }
 0x722   :  { %5949 = vmatpush1.bf16.msra.mxu0 %v8781_v9  ;;  %5981 = vmatpush1.bf16.msra.mxu1 %v8782_v37 }
 0x723   :  { %5951 = vmatprep.subr.bf16.mxu0 %v8783_v18  ;;  %5983 = vmatprep.subr.bf16.mxu1 %v8729_v0 }
 0x726   :  { %5953 = vmatpush1.bf16.msra.mxu0 %v8730_v16  ;;  %5985 = vmatpush1.bf16.msra.mxu1 %v8731_v3 }
 0x727   :  { %5955 = vmatprep.subr.bf16.mxu0 %v8732_v49  ;;  %5987 = vmatprep.subr.bf16.mxu1 %v8733_v10 }
 0x72a   :  { %v6705_v45 = vpop.eup %6704  ;;  %5957 = vmatpush1.bf16.msra.mxu0 %v8734_v31  ;;  %5989 = vmatpush1.bf16.msra.mxu1 %v8735_v17 }
 0x72b   :  { %v3188_v15 = vmul.f32 %v6705_v45, %v6703_v20  ;;  %5991 = vmatprep.subr.bf16.mxu0 %v8736_v53  ;;  %6023 = vmatprep.subr.bf16.mxu1 %v8737_v63  ;;  %v8956_v20 = vld [vmem:[#allocation28_spill] sm:$0xff]  ;;  %v8957_v45 = vld [vmem:[#allocation29_spill] sm:$0xff] }
 0x72d   :  { %3396 = vmatmul.mubr.f32.vlgmr.msra.gmra.mrb[26].mxu0 %v3188_v15  ;;  %3467 = vmatmul.mubr.f32.vlgmr.msra.gmra.mrb[26].mxu1 %v3188_v15 }
 0x72e   :  { %5993 = vmatpush1.bf16.msra.mxu0 %v7069_v22  ;;  %6025 = vmatpush1.bf16.msra.mxu1 %v7072_v25 }
 0x72f   :  { %5995 = vmatprep.subr.bf16.mxu0 %v7076_v29  ;;  %6027 = vmatprep.subr.bf16.mxu1 %v7083_v34 }
 0x730   :  { %3565 = vmatprep.mubr.f32.mxu0 %v8641_v51  ;;  %3636 = vmatprep.mubr.f32.mxu1 %v8641_v51 }
 0x732   :  { %5997 = vmatpush1.bf16.msra.mxu0 %v7085_v35  ;;  %6029 = vmatpush1.bf16.msra.mxu1 %v7089_v38 }
 0x733   :  { %5999 = vmatprep.subr.bf16.mxu0 %v8943_v48  ;;  %6031 = vmatprep.subr.bf16.mxu1 %v8944_v47 }
 0x736   :  { %6001 = vmatpush1.bf16.msra.mxu0 %v8945_v50  ;;  %6033 = vmatpush1.bf16.msra.mxu1 %v8946_v61 }
 0x737   :  { %6003 = vmatprep.subr.bf16.mxu0 %v8947_v28  ;;  %6035 = vmatprep.subr.bf16.mxu1 %v8948_v54  ;;  %v8958_v28 = vld [vmem:[#allocation30_spill] sm:$0xff]  ;;  %v8959_v54 = vld [vmem:[#allocation31_spill] sm:$0xff] }
 0x73a   :  { %6005 = vmatpush1.bf16.msra.mxu0 %v8949_v13  ;;  %6037 = vmatpush1.bf16.msra.mxu1 %v8950_v58  ;;  %v8960_v13 = vld [vmem:[#allocation32_spill] sm:$0xff]  ;;  %v8961_v58 = vld [vmem:[#allocation33_spill] sm:$0xff] }
 0x73b   :  { %6007 = vmatprep.subr.bf16.mxu0 %v8951_v2  ;;  %6039 = vmatprep.subr.bf16.mxu1 %v8952_v56  ;;  %v8962_v2 = vld [vmem:[#allocation34_spill] sm:$0xff]  ;;  %v8963_v56 = vld [vmem:[#allocation35_spill] sm:$0xff] }
 0x73e   :  { %6009 = vmatpush1.bf16.msra.mxu0 %v8953_v46  ;;  %6041 = vmatpush1.bf16.msra.mxu1 %v8954_v39  ;;  %v8964_v46 = vld [vmem:[#allocation36_spill] sm:$0xff]  ;;  %v8965_v39 = vld [vmem:[#allocation37_spill] sm:$0xff] }
 0x73f   :  { %6011 = vmatprep.subr.bf16.mxu0 %v8955_v36  ;;  %6043 = vmatprep.subr.bf16.mxu1 %v8956_v20  ;;  %v8966_v36 = vld [vmem:[#allocation38_spill] sm:$0xff]  ;;  %v8967_v20 = vld [vmem:[#allocation39_spill] sm:$0xff] }
 0x742   :  { %6013 = vmatpush1.bf16.msra.mxu0 %v8957_v45  ;;  %6045 = vmatpush1.bf16.msra.mxu1 %v8958_v28  ;;  %v8968_v45 = vld [vmem:[#allocation40_spill] sm:$0xff]  ;;  %v9001_v28 = vld [vmem:[#allocation106_spill] sm:$0xff] }
 0x743   :  { %6015 = vmatprep.subr.bf16.mxu0 %v8959_v54  ;;  %6047 = vmatprep.subr.bf16.mxu1 %v8960_v13  ;;  %v8969_v54 = vld [vmem:[#allocation41_spill] sm:$0xff]  ;;  %v8970_v13 = vld [vmem:[#allocation42_spill] sm:$0xff] }
 0x746   :  { %6017 = vmatpush1.bf16.msra.mxu0 %v8961_v58  ;;  %6049 = vmatpush1.bf16.msra.mxu1 %v8962_v2  ;;  %v8971_v58 = vld [vmem:[#allocation43_spill] sm:$0xff]  ;;  %v8972_v2 = vld [vmem:[#allocation44_spill] sm:$0xff] }
 0x747   :  { %6019 = vmatprep.subr.bf16.mxu0 %v8963_v56  ;;  %6051 = vmatprep.subr.bf16.mxu1 %v8964_v46  ;;  %v8982_v46 = vld [vmem:[#allocation54_spill] sm:$0xff]  ;;  %v8983_v56 = vld [vmem:[#allocation55_spill] sm:$0xff] }
 0x74a   :  { %6021 = vmatpush1.bf16.msra.mxu0 %v8965_v39  ;;  %6053 = vmatpush1.bf16.msra.mxu1 %v8966_v36  ;;  %v8973_v39 = vld [vmem:[#allocation45_spill] sm:$0xff]  ;;  %v8974_v36 = vld [vmem:[#allocation46_spill] sm:$0xff] }
 0x74b   :  { %6055 = vmatprep.subr.bf16.mxu0 %v8967_v20  ;;  %6087 = vmatprep.subr.bf16.mxu1 %v8968_v45  ;;  %v8975_v20 = vld [vmem:[#allocation47_spill] sm:$0xff]  ;;  %v8976_v45 = vld [vmem:[#allocation48_spill] sm:$0xff] }
 0x74d   :  { %3566 = vmatmul.mubr.f32.vlgmr.msra.gmra.mrb[12].mxu0 %v3188_v15  ;;  %3637 = vmatmul.mubr.f32.vlgmr.msra.gmra.mrb[12].mxu1 %v3188_v15  ;;  %v8977_v15 = vld [vmem:[#allocation49_spill] sm:$0xff] }
 0x74e   :  { %6057 = vmatpush1.bf16.msra.mxu0 %v8969_v54  ;;  %6089 = vmatpush1.bf16.msra.mxu1 %v8970_v13  ;;  %v8978_v54 = vld [vmem:[#allocation50_spill] sm:$0xff]  ;;  %v8979_v13 = vld [vmem:[#allocation51_spill] sm:$0xff] }
 0x74f   :  { %6059 = vmatprep.subr.bf16.mxu0 %v8971_v58  ;;  %6091 = vmatprep.subr.bf16.mxu1 %v8972_v2  ;;  %v8980_v58 = vld [vmem:[#allocation52_spill] sm:$0xff]  ;;  %v8981_v2 = vld [vmem:[#allocation53_spill] sm:$0xff] }
 0x750   :  { %3735 = vmatprep.mubr.f32.mxu0 %v8641_v51  ;;  %3806 = vmatprep.mubr.f32.mxu1 %v8641_v51 }
 0x752   :  { %6061 = vmatpush1.bf16.msra.mxu0 %v8973_v39  ;;  %6093 = vmatpush1.bf16.msra.mxu1 %v8974_v36  ;;  %v8984_v39 = vld [vmem:[#allocation56_spill] sm:$0xff]  ;;  %v8985_v36 = vld [vmem:[#allocation57_spill] sm:$0xff] }
 0x753   :  { %6063 = vmatprep.subr.bf16.mxu0 %v8975_v20  ;;  %6095 = vmatprep.subr.bf16.mxu1 %v8976_v45  ;;  %v8986_v20 = vld [vmem:[#allocation58_spill] sm:$0xff]  ;;  %v8987_v45 = vld [vmem:[#allocation59_spill] sm:$0xff] }
 0x756   :  { %6065 = vmatpush1.bf16.msra.mxu0 %v8977_v15  ;;  %6097 = vmatpush1.bf16.msra.mxu1 %v8978_v54  ;;  %v8988_v15 = vld [vmem:[#allocation60_spill] sm:$0xff]  ;;  %v8989_v54 = vld [vmem:[#allocation61_spill] sm:$0xff] }
 0x757   :  { %6067 = vmatprep.subr.bf16.mxu0 %v8979_v13  ;;  %6099 = vmatprep.subr.bf16.mxu1 %v8980_v58  ;;  %v8990_v13 = vld [vmem:[#allocation62_spill] sm:$0xff]  ;;  %v8991_v58 = vld [vmem:[#allocation63_spill] sm:$0xff] }
 0x75a   :  { %6069 = vmatpush1.bf16.msra.mxu0 %v8981_v2  ;;  %6101 = vmatpush1.bf16.msra.mxu1 %v8982_v46  ;;  %v8992_v2 = vld [vmem:[#allocation64_spill] sm:$0xff]  ;;  %v8993_v46 = vld [vmem:[#allocation65_spill] sm:$0xff] }
 0x75b   :  { %6071 = vmatprep.subr.bf16.mxu0 %v8983_v56  ;;  %6103 = vmatprep.subr.bf16.mxu1 %v8984_v39  ;;  %v8994_v56 = vld [vmem:[#allocation66_spill] sm:$0xff]  ;;  %v8995_v39 = vld [vmem:[#allocation67_spill] sm:$0xff] }
 0x75e   :  { %6073 = vmatpush1.bf16.msra.mxu0 %v8985_v36  ;;  %6105 = vmatpush1.bf16.msra.mxu1 %v8986_v20  ;;  %v8996_v36 = vld [vmem:[#allocation68_spill] sm:$0xff]  ;;  %v8997_v20 = vld [vmem:[#allocation69_spill] sm:$0xff] }
 0x75f   :  { %6075 = vmatprep.subr.bf16.mxu0 %v8987_v45  ;;  %6107 = vmatprep.subr.bf16.mxu1 %v8988_v15  ;;  %v8998_v45 = vld [vmem:[#allocation70_spill] sm:$0xff]  ;;  %v8999_v15 = vld [vmem:[#allocation71_spill] sm:$0xff] }
 0x762   :  { %6077 = vmatpush1.bf16.msra.mxu0 %v8989_v54  ;;  %6109 = vmatpush1.bf16.msra.mxu1 %v8990_v13  ;;  %v9000_v54 = vld [vmem:[#allocation72_spill] sm:$0xff] }
 0x763   :  { %6079 = vmatprep.subr.bf16.mxu0 %v8991_v58  ;;  %6111 = vmatprep.subr.bf16.mxu1 %v8992_v2 }
 0x766   :  { %6081 = vmatpush1.bf16.msra.mxu0 %v8993_v46  ;;  %6113 = vmatpush1.bf16.msra.mxu1 %v8994_v56 }
 0x767   :  { %6083 = vmatprep.subr.bf16.mxu0 %v8995_v39  ;;  %6115 = vmatprep.subr.bf16.mxu1 %v8996_v36 }
 0x76a   :  { %6085 = vmatpush1.bf16.msra.mxu0 %v8997_v20  ;;  %6117 = vmatpush1.bf16.msra.mxu1 %v8998_v45 }
 0x76b   :  { %6119 = vmatprep.subr.bf16.mxu0 %v8999_v15  ;;  %6151 = vmatprep.subr.bf16.mxu1 %v9000_v54 }
 0x800   :  { %v3397_v13 = vpop.f32.mrb[26].mxu0  ;;  %v3468_v58 = vpop.f32.mrb[26].mxu1 }
 0x801   :  { %v3473_v2 = vadd.f32 %v3397_v13, %v9001_v28  ;;  %v3399_v61 = vpop.f32.mrb[27].mxu0  ;;  %v3470_v46 = vpop.f32.mrb[27].mxu1  ;;  %v3475_v45 = vadd.f32 %v3468_v58, %v8824_v33 }
 0x802   :  { %v3474_v56 = vadd.f32 %v3399_v61, %v8823_v19  ;;  %v3476_v20 = vadd.f32 %v3470_v46, %v8762_v59 }
 0x803   :  { %v4709_v50 = vmul.f32 -1.442695, %v3473_v2 }
 0x804   :  { %v4710_v39 = vmul.f32 -1.442695, %v3474_v56  ;;  %v4711_v36 = vmul.f32 -1.442695, %v3476_v20 }
 0x805   :  { %6706 = vpow2.f32 %v4709_v50 }
 0x806   :  { %6708 = vpow2.f32 %v4710_v39 }
 0x807   :  { %6710 = vpow2.f32 %v4711_v36 }
 0x808   :  { %6712 = vtanh.f32 %v3475_v45 }
 0x80f   :  { %v6707_v15 = vpop.eup %6706 }
 0x810   :  { %v6709_v47 = vpop.eup %6708  ;;  %v3480_v54 = vadd.f32 1.0, %v6707_v15 }
 0x811   :  { %v3486_v48 = vadd.f32 1.0, %v6709_v47  ;;  %v6711_v13 = vpop.eup %6710 }
 0x812   :  { %6714 = vrcp.f32 %v3480_v54  ;;  %v6713_v28 = vpop.eup %6712  ;;  %v3493_v50 = vadd.f32 1.0, %v6711_v13 }
 0x813   :  { %6716 = vrcp.f32 %v3486_v48 }
 0x814   :  { %6718 = vrcp.f32 %v3493_v50 }
 0x81c   :  { %v6715_v61 = vpop.eup %6714 }
 0x81d   :  { %v6717_v2 = vpop.eup %6716  ;;  %v3497_v56 = vmul.f32 %v6715_v61, %v6713_v28 }
 0x81e   :  { %v3496_v39 = vmul.f32 %v6717_v2, %v8011_v42  ;;  %v6719_v42 = vpop.eup %6718 }
 0x820   :  { %v8129_v46 = vadd.f32 %v3497_v56, %v3496_v39  ;;  %v3567_v20 = vpop.f32.mrb[12].mxu0  ;;  %v3638_v58 = vpop.f32.mrb[12].mxu1 }
 0x821   :  { %v6434_v15 = vadd.f32 %v3567_v20, %v8765_v6  ;;  %v3569_v36 = vpop.f32.mrb[13].mxu0  ;;  %v3640_v45 = vpop.f32.mrb[13].mxu1  ;;  %v6450_v2 = vadd.f32 %v3638_v58, %v7442_v30 }
 0x822   :  { %v6435_v47 = vadd.f32 %v3569_v36, %v8704_v26  ;;  %6720 = vtanh.f32 %v8129_v46  ;;  %v6451_v28 = vadd.f32 %v3640_v45, %v8705_v14 }
 0x823   :  { %v4712_v48 = vmul.f32 -1.442695, %v6434_v15 }
 0x824   :  { %v4713_v54 = vmul.f32 -1.442695, %v6435_v47  ;;  %v4714_v61 = vmul.f32 -1.442695, %v6451_v28 }
 0x825   :  { %6722 = vpow2.f32 %v4712_v48 }
 0x826   :  { %6724 = vpow2.f32 %v4713_v54 }
 0x827   :  { %6726 = vpow2.f32 %v4714_v61 }
 0x828   :  { %6728 = vtanh.f32 %v6450_v2  ;;  %v9004_v2 = vld [vmem:[#allocation17_spill] sm:$0xff] }
 0x82c   :  { %v6721_v13 = vpop.eup %6720 }
 0x82d   :  { %v3500_v56 = vmul.f32 %v6721_v13, %v6719_v42 }
 0x82f   :  { %v6723_v50 = vpop.eup %6722  ;;  %3736 = vmatmul.mubr.f32.vlgmr.msra.gmra.mrb[28].mxu0 %v3500_v56  ;;  %3807 = vmatmul.mubr.f32.vlgmr.msra.gmra.mrb[28].mxu1 %v3500_v56  ;;  %v9009_v56 = vld [vmem:[#allocation22_spill] sm:$0xff] }
 0x830   :  { %v6725_v39 = vpop.eup %6724  ;;  %v3650_v20 = vadd.f32 1.0, %v6723_v50  ;;  %6121 = vmatpush1.bf16.msra.mxu0 %v8706_v4  ;;  %6153 = vmatpush1.bf16.msra.mxu1 %v8707_v44  ;;  %v9010_v50 = vld [vmem:[#allocation23_spill] sm:$0xff] }
 0x831   :  { %v3656_v15 = vadd.f32 1.0, %v6725_v39  ;;  %6123 = vmatprep.subr.bf16.mxu0 %v8766_v12  ;;  %6155 = vmatprep.subr.bf16.mxu1 %v8767_v7  ;;  %v6727_v58 = vpop.eup %6726  ;;  %v9013_v39 = vld [vmem:[#allocation26_spill] sm:$0xff] }
 0x832   :  { %6730 = vrcp.f32 %v3650_v20  ;;  %3877 = vmatprep.mubr.f32.mxu0 %v8641_v51  ;;  %3948 = vmatprep.mubr.f32.mxu1 %v8641_v51  ;;  %v6729_v36 = vpop.eup %6728  ;;  %v3663_v54 = vadd.f32 1.0, %v6727_v58  ;;  %v9014_v20 = vld [vmem:[#allocation27_spill] sm:$0xff]  ;;  %v9016_v58 = vld [vmem:[#allocation29_spill] sm:$0xff] }
 0x833   :  { %6732 = vrcp.f32 %v3656_v15  ;;  %v9015_v15 = vld [vmem:[#allocation28_spill] sm:$0xff] }
 0x834   :  { %6125 = vmatpush1.bf16.msra.mxu0 %v8768_v55  ;;  %6157 = vmatpush1.bf16.msra.mxu1 %v8769_v1  ;;  %6734 = vrcp.f32 %v3663_v54  ;;  %v9021_v54 = vld [vmem:[#allocation34_spill] sm:$0xff] }
 0x835   :  { %6127 = vmatprep.subr.bf16.mxu0 %v8825_v52  ;;  %6159 = vmatprep.subr.bf16.mxu1 %v8826_v60 }
 0x838   :  { %6129 = vmatpush1.bf16.msra.mxu0 %v8827_v11  ;;  %6161 = vmatpush1.bf16.msra.mxu1 %v8828_v8 }
 0x839   :  { %6131 = vmatprep.subr.bf16.mxu0 %v8829_v5  ;;  %6163 = vmatprep.subr.bf16.mxu1 %v8830_v43 }
 0x83c   :  { %v6731_v45 = vpop.eup %6730  ;;  %6133 = vmatpush1.bf16.msra.mxu0 %v8831_v24  ;;  %6165 = vmatpush1.bf16.msra.mxu1 %v8719_v40 }
 0x83d   :  { %v6733_v47 = vpop.eup %6732  ;;  %v3667_v48 = vmul.f32 %v6731_v45, %v6729_v36  ;;  %6135 = vmatprep.subr.bf16.mxu0 %v8720_v41  ;;  %6167 = vmatprep.subr.bf16.mxu1 %v8721_v21  ;;  %v9017_v36 = vld [vmem:[#allocation30_spill] sm:$0xff]  ;;  %v9018_v45 = vld [vmem:[#allocation31_spill] sm:$0xff] }
 0x83e   :  { %v3666_v28 = vmul.f32 %v6733_v47, %v8037_v62  ;;  %v6735_v62 = vpop.eup %6734  ;;  %v9019_v47 = vld [vmem:[#allocation32_spill] sm:$0xff] }
 0x840   :  { %v8155_v42 = vadd.f32 %v3667_v48, %v3666_v28  ;;  %6137 = vmatpush1.bf16.msra.mxu0 %v8777_v27  ;;  %6169 = vmatpush1.bf16.msra.mxu1 %v8778_v32  ;;  %v9020_v48 = vld [vmem:[#allocation33_spill] sm:$0xff]  ;;  %v9022_v28 = vld [vmem:[#allocation35_spill] sm:$0xff] }
 0x841   :  { %6139 = vmatprep.subr.bf16.mxu0 %v8779_v23  ;;  %6171 = vmatprep.subr.bf16.mxu1 %v8780_v57 }
 0x842   :  { %6736 = vtanh.f32 %v8155_v42 }
 0x844   :  { %6141 = vmatpush1.bf16.msra.mxu0 %v8781_v9  ;;  %6173 = vmatpush1.bf16.msra.mxu1 %v8782_v37 }
 0x845   :  { %6143 = vmatprep.subr.bf16.mxu0 %v8783_v18  ;;  %6175 = vmatprep.subr.bf16.mxu1 %v8729_v0 }
 0x848   :  { %6145 = vmatpush1.bf16.msra.mxu0 %v8730_v16  ;;  %6177 = vmatpush1.bf16.msra.mxu1 %v8731_v3 }
 0x849   :  { %6147 = vmatprep.subr.bf16.mxu0 %v8732_v49  ;;  %6179 = vmatprep.subr.bf16.mxu1 %v8733_v10 }
 0x84c   :  { %v6737_v13 = vpop.eup %6736  ;;  %6149 = vmatpush1.bf16.msra.mxu0 %v8734_v31  ;;  %6181 = vmatpush1.bf16.msra.mxu1 %v8735_v17 }
 0x84d   :  { %6183 = vmatprep.subr.bf16.mxu0 %v8736_v53  ;;  %6215 = vmatprep.subr.bf16.mxu1 %v8737_v63  ;;  %v3670_v61 = vmul.f32 %v6737_v13, %v6735_v62  ;;  %v9002_v53 = vld [vmem:[#allocation15_spill] sm:$0xff]  ;;  %v9003_v63 = vld [vmem:[#allocation16_spill] sm:$0xff]  ;;  %v9024_v13 = vld [vmem:[#allocation37_spill] sm:$0xff] }
 0x84e   :  { %v9023_v62 = vld [vmem:[#allocation36_spill] sm:$0xff] }
 0x84f   :  { %3878 = vmatmul.mubr.f32.vlgmr.msra.gmra.mrb[28].mxu0 %v3670_v61  ;;  %3949 = vmatmul.mubr.f32.vlgmr.msra.gmra.mrb[28].mxu1 %v3670_v61 }
 0x850   :  { %6185 = vmatpush1.bf16.msra.mxu0 %v7069_v22  ;;  %6217 = vmatpush1.bf16.msra.mxu1 %v7072_v25  ;;  %v9005_v22 = vld [vmem:[#allocation18_spill] sm:$0xff]  ;;  %v9006_v25 = vld [vmem:[#allocation19_spill] sm:$0xff] }
 0x851   :  { %6187 = vmatprep.subr.bf16.mxu0 %v7076_v29  ;;  %6219 = vmatprep.subr.bf16.mxu1 %v7083_v34  ;;  %v9007_v29 = vld [vmem:[#allocation20_spill] sm:$0xff]  ;;  %v9008_v34 = vld [vmem:[#allocation21_spill] sm:$0xff] }
 0x852   :  { %4047 = vmatprep.mubr.f32.mxu0 %v8641_v51  ;;  %4118 = vmatprep.mubr.f32.mxu1 %v8641_v51 }
 0x854   :  { %6189 = vmatpush1.bf16.msra.mxu0 %v7085_v35  ;;  %6221 = vmatpush1.bf16.msra.mxu1 %v7089_v38  ;;  %v9011_v35 = vld [vmem:[#allocation24_spill] sm:$0xff]  ;;  %v9012_v38 = vld [vmem:[#allocation25_spill] sm:$0xff] }
 0x855   :  { %6191 = vmatprep.subr.bf16.mxu0 %v9002_v53  ;;  %6223 = vmatprep.subr.bf16.mxu1 %v9003_v63  ;;  %v9025_v53 = vld [vmem:[#allocation38_spill] sm:$0xff]  ;;  %v9026_v63 = vld [vmem:[#allocation39_spill] sm:$0xff] }
 0x858   :  { %6193 = vmatpush1.bf16.msra.mxu0 %v9004_v2  ;;  %6225 = vmatpush1.bf16.msra.mxu1 %v9005_v22  ;;  %v9027_v2 = vld [vmem:[#allocation40_spill] sm:$0xff]  ;;  %v9028_v22 = vld [vmem:[#allocation41_spill] sm:$0xff] }
 0x859   :  { %6195 = vmatprep.subr.bf16.mxu0 %v9006_v25  ;;  %6227 = vmatprep.subr.bf16.mxu1 %v9007_v29  ;;  %v9029_v25 = vld [vmem:[#allocation42_spill] sm:$0xff]  ;;  %v9030_v29 = vld [vmem:[#allocation43_spill] sm:$0xff] }
 0x85c   :  { %6197 = vmatpush1.bf16.msra.mxu0 %v9008_v34  ;;  %6229 = vmatpush1.bf16.msra.mxu1 %v9009_v56  ;;  %v9031_v34 = vld [vmem:[#allocation44_spill] sm:$0xff]  ;;  %v9032_v56 = vld [vmem:[#allocation45_spill] sm:$0xff] }
 0x85d   :  { %6199 = vmatprep.subr.bf16.mxu0 %v9010_v50  ;;  %6231 = vmatprep.subr.bf16.mxu1 %v9011_v35  ;;  %v9033_v50 = vld [vmem:[#allocation46_spill] sm:$0xff]  ;;  %v9034_v35 = vld [vmem:[#allocation47_spill] sm:$0xff] }
 0x860   :  { %6201 = vmatpush1.bf16.msra.mxu0 %v9012_v38  ;;  %6233 = vmatpush1.bf16.msra.mxu1 %v9013_v39  ;;  %v9035_v38 = vld [vmem:[#allocation48_spill] sm:$0xff]  ;;  %v9037_v39 = vld [vmem:[#allocation50_spill] sm:$0xff] }
 0x861   :  { %6203 = vmatprep.subr.bf16.mxu0 %v9014_v20  ;;  %6235 = vmatprep.subr.bf16.mxu1 %v9015_v15  ;;  %v9038_v20 = vld [vmem:[#allocation51_spill] sm:$0xff]  ;;  %v9039_v15 = vld [vmem:[#allocation52_spill] sm:$0xff] }
 0x864   :  { %6205 = vmatpush1.bf16.msra.mxu0 %v9016_v58  ;;  %6237 = vmatpush1.bf16.msra.mxu1 %v9017_v36  ;;  %v9040_v58 = vld [vmem:[#allocation53_spill] sm:$0xff]  ;;  %v9041_v36 = vld [vmem:[#allocation54_spill] sm:$0xff] }
 0x865   :  { %6207 = vmatprep.subr.bf16.mxu0 %v9018_v45  ;;  %6239 = vmatprep.subr.bf16.mxu1 %v9019_v47  ;;  %v9042_v45 = vld [vmem:[#allocation55_spill] sm:$0xff]  ;;  %v9043_v47 = vld [vmem:[#allocation56_spill] sm:$0xff] }
 0x868   :  { %6209 = vmatpush1.bf16.msra.mxu0 %v9020_v48  ;;  %6241 = vmatpush1.bf16.msra.mxu1 %v9021_v54  ;;  %v9044_v48 = vld [vmem:[#allocation57_spill] sm:$0xff]  ;;  %v9045_v54 = vld [vmem:[#allocation58_spill] sm:$0xff] }
 0x869   :  { %6211 = vmatprep.subr.bf16.mxu0 %v9022_v28  ;;  %6243 = vmatprep.subr.bf16.mxu1 %v9023_v62  ;;  %v9046_v28 = vld [vmem:[#allocation59_spill] sm:$0xff]  ;;  %v9047_v62 = vld [vmem:[#allocation60_spill] sm:$0xff] }
 0x86c   :  { %6213 = vmatpush1.bf16.msra.mxu0 %v9024_v13  ;;  %6245 = vmatpush1.bf16.msra.mxu1 %v9025_v53  ;;  %v9048_v13 = vld [vmem:[#allocation61_spill] sm:$0xff]  ;;  %v9049_v53 = vld [vmem:[#allocation62_spill] sm:$0xff] }
 0x86d   :  { %6247 = vmatprep.subr.bf16.mxu0 %v9026_v63  ;;  %6279 = vmatprep.subr.bf16.mxu1 %v9027_v2  ;;  %v9050_v63 = vld [vmem:[#allocation63_spill] sm:$0xff]  ;;  %v9051_v2 = vld [vmem:[#allocation64_spill] sm:$0xff] }
 0x86f   :  { %4048 = vmatmul.mubr.f32.vlgmr.msra.gmra.mrb[14].mxu0 %v3670_v61  ;;  %4119 = vmatmul.mubr.f32.vlgmr.msra.gmra.mrb[14].mxu1 %v3670_v61  ;;  %v9036_v61 = vld [vmem:[#allocation49_spill] sm:$0xff] }
 0x870   :  { %6249 = vmatpush1.bf16.msra.mxu0 %v9028_v22  ;;  %6281 = vmatpush1.bf16.msra.mxu1 %v9029_v25  ;;  %v9052_v22 = vld [vmem:[#allocation65_spill] sm:$0xff]  ;;  %v9053_v25 = vld [vmem:[#allocation66_spill] sm:$0xff] }
 0x871   :  { %6251 = vmatprep.subr.bf16.mxu0 %v9030_v29  ;;  %6283 = vmatprep.subr.bf16.mxu1 %v9031_v34  ;;  %v9054_v29 = vld [vmem:[#allocation67_spill] sm:$0xff]  ;;  %v9055_v34 = vld [vmem:[#allocation68_spill] sm:$0xff] }
 0x872   :  { %4217 = vmatprep.mubr.f32.mxu0 %v8641_v51  ;;  %4288 = vmatprep.mubr.f32.mxu1 %v8641_v51 }
 0x874   :  { %6253 = vmatpush1.bf16.msra.mxu0 %v9032_v56  ;;  %6285 = vmatpush1.bf16.msra.mxu1 %v9033_v50  ;;  %v9056_v56 = vld [vmem:[#allocation69_spill] sm:$0xff]  ;;  %v9057_v50 = vld [vmem:[#allocation70_spill] sm:$0xff] }
 0x875   :  { %6255 = vmatprep.subr.bf16.mxu0 %v9034_v35  ;;  %6287 = vmatprep.subr.bf16.mxu1 %v9035_v38  ;;  %v9058_v35 = vld [vmem:[#allocation71_spill] sm:$0xff]  ;;  %v9059_v38 = vld [vmem:[#allocation72_spill] sm:$0xff] }
 0x878   :  { %6257 = vmatpush1.bf16.msra.mxu0 %v9036_v61  ;;  %6289 = vmatpush1.bf16.msra.mxu1 %v9037_v39 }
 0x879   :  { %6259 = vmatprep.subr.bf16.mxu0 %v9038_v20  ;;  %6291 = vmatprep.subr.bf16.mxu1 %v9039_v15  ;;  %v9060_v20 = vld [vmem:[#allocation106_spill] sm:$0xff] }
 0x87c   :  { %6261 = vmatpush1.bf16.msra.mxu0 %v9040_v58  ;;  %6293 = vmatpush1.bf16.msra.mxu1 %v9041_v36 }
 0x87d   :  { %6263 = vmatprep.subr.bf16.mxu0 %v9042_v45  ;;  %6295 = vmatprep.subr.bf16.mxu1 %v9043_v47 }
 0x880   :  { %6265 = vmatpush1.bf16.msra.mxu0 %v9044_v48  ;;  %6297 = vmatpush1.bf16.msra.mxu1 %v9045_v54 }
 0x881   :  { %6267 = vmatprep.subr.bf16.mxu0 %v9046_v28  ;;  %6299 = vmatprep.subr.bf16.mxu1 %v9047_v62 }
 0x884   :  { %6269 = vmatpush1.bf16.msra.mxu0 %v9048_v13  ;;  %6301 = vmatpush1.bf16.msra.mxu1 %v9049_v53 }
 0x885   :  { %6271 = vmatprep.subr.bf16.mxu0 %v9050_v63  ;;  %6303 = vmatprep.subr.bf16.mxu1 %v9051_v2 }
 0x888   :  { %6273 = vmatpush1.bf16.msra.mxu0 %v9052_v22  ;;  %6305 = vmatpush1.bf16.msra.mxu1 %v9053_v25 }
 0x889   :  { %6275 = vmatprep.subr.bf16.mxu0 %v9054_v29  ;;  %6307 = vmatprep.subr.bf16.mxu1 %v9055_v34 }
 0x88c   :  { %6277 = vmatpush1.bf16.msra.mxu0 %v9056_v56  ;;  %6309 = vmatpush1.bf16.msra.mxu1 %v9057_v50 }
 0x88d   :  { %6311 = vmatprep.subr.bf16.mxu0 %v9058_v35  ;;  %6343 = vmatprep.subr.bf16.mxu1 %v9059_v38 }
 0x922   :  { %v3879_v61 = vpop.f32.mrb[28].mxu0  ;;  %v3950_v39 = vpop.f32.mrb[28].mxu1 }
 0x923   :  { %v3955_v15 = vadd.f32 %v3879_v61, %v9060_v20  ;;  %v3881_v58 = vpop.f32.mrb[29].mxu0  ;;  %v3952_v36 = vpop.f32.mrb[29].mxu1  ;;  %v3957_v62 = vadd.f32 %v3950_v39, %v8824_v33 }
 0x924   :  { %v3956_v45 = vadd.f32 %v3881_v58, %v8823_v19  ;;  %v3958_v54 = vadd.f32 %v3952_v36, %v8762_v59 }
 0x925   :  { %v4715_v47 = vmul.f32 -1.442695, %v3955_v15 }
 0x926   :  { %v4716_v48 = vmul.f32 -1.442695, %v3956_v45  ;;  %v4717_v28 = vmul.f32 -1.442695, %v3958_v54 }
 0x927   :  { %6738 = vpow2.f32 %v4715_v47 }
 0x928   :  { %6740 = vpow2.f32 %v4716_v48 }
 0x929   :  { %6742 = vpow2.f32 %v4717_v28 }
 0x92a   :  { %6744 = vtanh.f32 %v3957_v62 }
 0x931   :  { %v6739_v13 = vpop.eup %6738 }
 0x932   :  { %v6741_v53 = vpop.eup %6740  ;;  %v3962_v63 = vadd.f32 1.0, %v6739_v13 }
 0x933   :  { %v3968_v2 = vadd.f32 1.0, %v6741_v53  ;;  %v6743_v22 = vpop.eup %6742 }
 0x934   :  { %6746 = vrcp.f32 %v3962_v63  ;;  %v6745_v25 = vpop.eup %6744  ;;  %v3975_v50 = vadd.f32 1.0, %v6743_v22  ;;  %v4479_v22 = vld [vmem:[%s8374_s7 + $0x70] sm:$0xff] }
 0x935   :  { %6748 = vrcp.f32 %v3968_v2 }
 0x936   :  { %6750 = vrcp.f32 %v3975_v50 }
 0x93e   :  { %v6747_v29 = vpop.eup %6746 }
 0x93f   :  { %v6749_v34 = vpop.eup %6748  ;;  %v3979_v56 = vmul.f32 %v6747_v29, %v6745_v25  ;;  %v4480_v25 = vld [vmem:[%s8374_s7 + $0x78] sm:$0xff] }
 0x940   :  { %v3978_v35 = vmul.f32 %v6749_v34, %v8129_v46  ;;  %v6751_v46 = vpop.eup %6750  ;;  %v6396_v29 = vpack.c.bf16 %v4480_v25, %v4479_v22  ;;  %v4559_v34 = vld [vmem:[#allocation9] sm:$0xff] }
 0x942   :  { %v8247_v38 = vadd.f32 %v3979_v56, %v3978_v35  ;;  %v4049_v61 = vpop.f32.mrb[14].mxu0  ;;  %v4120_v39 = vpop.f32.mrb[14].mxu1  ;;  %v4560_v56 = vld [vmem:[#allocation9 + $0x8] sm:$0xff]  ;;  %v4562_v35 = vld [vmem:[#allocation9 + $0x18] sm:$0xff] }
 0x943   :  { %v6436_v15 = vadd.f32 %v4049_v61, %v8765_v6  ;;  %v4051_v58 = vpop.f32.mrb[15].mxu0  ;;  %v4122_v36 = vpop.f32.mrb[15].mxu1  ;;  %v6452_v13 = vadd.f32 %v4120_v39, %v7442_v30  ;;  %v6399_v50 = vpack.c.bf16 %v4560_v56, %v4559_v34  ;;  %v4563_v39 = vld [vmem:[#allocation9 + $0x20] sm:$0xff] }
 0x944   :  { %v6437_v45 = vadd.f32 %v4051_v58, %v8704_v26  ;;  %6752 = vtanh.f32 %v8247_v38  ;;  %v6453_v54 = vadd.f32 %v4122_v36, %v8705_v14  ;;  %v4565_v36 = vld [vmem:[#allocation9 + $0x30] sm:$0xff] }
 0x945   :  { %v4718_v47 = vmul.f32 -1.442695, %v6436_v15  ;;  %v4564_v15 = vld [vmem:[#allocation9 + $0x28] sm:$0xff] }
 0x946   :  { %v4719_v48 = vmul.f32 -1.442695, %v6437_v45  ;;  %v4720_v62 = vmul.f32 -1.442695, %v6453_v54  ;;  %v6405_v58 = vpack.c.bf16 %v4564_v15, %v4563_v39  ;;  %v4566_v45 = vld [vmem:[#allocation9 + $0x38] sm:$0xff]  ;;  %v4568_v54 = vld [vmem:[#allocation9 + $0x48] sm:$0xff] }
 0x947   :  { %6754 = vpow2.f32 %v4718_v47  ;;  %v6408_v47 = vpack.c.bf16 %v4566_v45, %v4565_v36 }
 0x948   :  { %6756 = vpow2.f32 %v4719_v48  ;;  %v4567_v48 = vld [vmem:[#allocation9 + $0x40] sm:$0xff] }
 0x949   :  { %6758 = vpow2.f32 %v4720_v62  ;;  %v4570_v62 = vld [vmem:[#allocation9 + $0x58] sm:$0xff] }
 0x94a   :  { %6760 = vtanh.f32 %v6452_v13 }
 0x94e   :  { %v6753_v28 = vpop.eup %6752 }
 0x94f   :  { %v3982_v53 = vmul.f32 %v6753_v28, %v6751_v46  ;;  %v6411_v46 = vpack.c.bf16 %v4568_v54, %v4567_v48  ;;  %v4569_v28 = vld [vmem:[#allocation9 + $0x50] sm:$0xff] }
 0x950   :  { %v6414_v13 = vpack.c.bf16 %v4570_v62, %v4569_v28 }
 0x951   :  { %v6755_v63 = vpop.eup %6754  ;;  %4218 = vmatmul.mubr.f32.vlgmr.msra.gmra.mrb[30].mxu0 %v3982_v53  ;;  %4289 = vmatmul.mubr.f32.vlgmr.msra.gmra.mrb[30].mxu1 %v3982_v53  ;;  %v4571_v53 = vld [vmem:[#allocation9 + $0x60] sm:$0xff] }
 0x952   :  { %v6757_v6 = vpop.eup %6756  ;;  %v4132_v2 = vadd.f32 1.0, %v6755_v63  ;;  %6313 = vmatpush1.bf16.msra.mxu0 %v8706_v4  ;;  %6345 = vmatpush1.bf16.msra.mxu1 %v8707_v44  ;;  %v4572_v63 = vld [vmem:[#allocation9 + $0x68] sm:$0xff] }
 0x953   :  { %v4138_v26 = vadd.f32 1.0, %v6757_v6  ;;  %6315 = vmatprep.subr.bf16.mxu0 %v8766_v12  ;;  %6347 = vmatprep.subr.bf16.mxu1 %v8767_v7  ;;  %v6759_v30 = vpop.eup %6758  ;;  %v6417_v6 = vpack.c.bf16 %v4572_v63, %v4571_v53 }
 0x954   :  { %6762 = vrcp.f32 %v4132_v2  ;;  %4359 = vmatprep.mubr.f32.mxu0 %v8641_v51  ;;  %4430 = vmatprep.mubr.f32.mxu1 %v8641_v51  ;;  %v6761_v4 = vpop.eup %6760  ;;  %v4145_v7 = vadd.f32 1.0, %v6759_v30 }
 0x955   :  { %6764 = vrcp.f32 %v4138_v26 }
 0x956   :  { %6317 = vmatpush1.bf16.msra.mxu0 %v8768_v55  ;;  %6349 = vmatpush1.bf16.msra.mxu1 %v8769_v1  ;;  %6766 = vrcp.f32 %v4145_v7 }
 0x957   :  { %6319 = vmatprep.subr.bf16.mxu0 %v8825_v52  ;;  %6351 = vmatprep.subr.bf16.mxu1 %v8826_v60  ;;  %v4474_v52 = vld [vmem:[%s8374_s7 + $0x48] sm:$0xff] }
 0x95a   :  { %6321 = vmatpush1.bf16.msra.mxu0 %v8827_v11  ;;  %6353 = vmatpush1.bf16.msra.mxu1 %v8828_v8  ;;  %v4475_v11 = vld [vmem:[%s8374_s7 + $0x50] sm:$0xff]  ;;  %v4476_v8 = vld [vmem:[%s8374_s7 + $0x58] sm:$0xff] }
 0x95b   :  { %6323 = vmatprep.subr.bf16.mxu0 %v8829_v5  ;;  %6355 = vmatprep.subr.bf16.mxu1 %v8830_v43  ;;  %v4477_v5 = vld [vmem:[%s8374_s7 + $0x60] sm:$0xff]  ;;  %v6390_v43 = vpack.c.bf16 %v4476_v8, %v4475_v11 }
 0x95e   :  { %v6763_v14 = vpop.eup %6762  ;;  %6325 = vmatpush1.bf16.msra.mxu0 %v8831_v24  ;;  %6357 = vmatpush1.bf16.msra.mxu1 %v8719_v40  ;;  %v4478_v24 = vld [vmem:[%s8374_s7 + $0x68] sm:$0xff] }
 0x95f   :  { %v6765_v44 = vpop.eup %6764  ;;  %v4149_v12 = vmul.f32 %v6763_v14, %v6761_v4  ;;  %6327 = vmatprep.subr.bf16.mxu0 %v8720_v41  ;;  %6359 = vmatprep.subr.bf16.mxu1 %v8721_v21 }
 0x960   :  { %v4148_v55 = vmul.f32 %v6765_v44, %v8155_v42  ;;  %v6767_v41 = vpop.eup %6766  ;;  %v6393_v42 = vpack.c.bf16 %v4478_v24, %v4477_v5 }
 0x962   :  { %v4150_v1 = vadd.f32 %v4149_v12, %v4148_v55  ;;  %6329 = vmatpush1.bf16.msra.mxu0 %v8777_v27  ;;  %6361 = vmatpush1.bf16.msra.mxu1 %v8778_v32  ;;  %v4470_v27 = vld [vmem:[%s8374_s7 + $0x28] sm:$0xff] }
 0x963   :  { %6331 = vmatprep.subr.bf16.mxu0 %v8779_v23  ;;  %6363 = vmatprep.subr.bf16.mxu1 %v8780_v57  ;;  %v4469_v23 = vld [vmem:[%s8374_s7 + $0x20] sm:$0xff]  ;;  %v4471_v57 = vld [vmem:[%s8374_s7 + $0x30] sm:$0xff] }
 0x964   :  { %6768 = vtanh.f32 %v4150_v1  ;;  %v6381_v32 = vpack.c.bf16 %v4470_v27, %v4469_v23 }
 0x966   :  { %6333 = vmatpush1.bf16.msra.mxu0 %v8781_v9  ;;  %6365 = vmatpush1.bf16.msra.mxu1 %v8782_v37  ;;  %v4472_v9 = vld [vmem:[%s8374_s7 + $0x38] sm:$0xff] }
 0x967   :  { %6335 = vmatprep.subr.bf16.mxu0 %v8783_v18  ;;  %6367 = vmatprep.subr.bf16.mxu1 %v8729_v0  ;;  %v4465_v0 = vld [vmem:[%s8374_s7] sm:$0xff]  ;;  %v6384_v37 = vpack.c.bf16 %v4472_v9, %v4471_v57  ;;  %v4574_v57 = vld [vmem:[#allocation9 + $0x78] sm:$0xff] }
 0x968   :  { %v4473_v18 = vld [vmem:[%s8374_s7 + $0x40] sm:$0xff] }
 0x969   :  { %v6387_v60 = vpack.c.bf16 %v4474_v52, %v4473_v18 }
 0x96a   :  { %6337 = vmatpush1.bf16.msra.mxu0 %v8730_v16  ;;  %6369 = vmatpush1.bf16.msra.mxu1 %v8731_v3  ;;  %v4466_v16 = vld [vmem:[%s8374_s7 + $0x8] sm:$0xff] }
 0x96b   :  { %6339 = vmatprep.subr.bf16.mxu0 %v8732_v49  ;;  %6371 = vmatprep.subr.bf16.mxu1 %v8733_v10  ;;  %v6375_v3 = vpack.c.bf16 %v4466_v16, %v4465_v0  ;;  %v6912_v49 = vmov 0.0|0.0  }
 0x96e   :  { %v6769_v21 = vpop.eup %6768  ;;  %6341 = vmatpush1.bf16.msra.mxu0 %v8734_v31  ;;  %6373 = vmatpush1.bf16.msra.mxu1 %v8735_v17  ;;  %v4467_v17 = vld [vmem:[%s8374_s7 + $0x10] sm:$0xff]  ;;  %v4468_v31 = vld [vmem:[%s8374_s7 + $0x18] sm:$0xff] }
 0x96f   :  { %v4152_v40 = vmul.f32 %v6769_v21, %v6767_v41  ;;  %6374 = vmatprep.subr.bf16.mxu0 %v6912_v49  ;;  %6398 = vmatprep.subr.bf16.mxu1 %v6912_v49  ;;  %v6378_v10 = vpack.c.bf16 %v4468_v31, %v4467_v17 }
 0x971   :  { %4360 = vmatmul.mubr.f32.vlgmr.msra.gmra.mrb[30].mxu0 %v4152_v40  ;;  %4431 = vmatmul.mubr.f32.vlgmr.msra.gmra.mrb[30].mxu1 %v4152_v40 }
 0x972   :  { %6376 = vmatpush3.bf16.msra.mxu0 %v6375_v3  ;;  %4792 = vmatprep.mubr.msk.f32.mxu0 %vm6913_vm1, %v8641_v51 }
 0x973   :  { %6377 = vmatprep.subr.bf16.mxu0 %v6912_v49  ;;  %4827 = vmatprep.mubr.msk.f32.mxu1 %vm6913_vm1, %v8641_v51  ;;  %v4561_v51 = vld [vmem:[#allocation9 + $0x10] sm:$0xff] }
 0x974   :  { %6400 = vmatpush3.bf16.msra.mxu1 %v6399_v50  ;;  %v6402_v61 = vpack.c.bf16 %v4562_v35, %v4561_v51 }
 0x975   :  { %6401 = vmatprep.subr.bf16.mxu1 %v6912_v49 }
 0x976   :  { %6379 = vmatpush3.bf16.msra.mxu0 %v6378_v10 }
 0x977   :  { %6380 = vmatprep.subr.bf16.mxu0 %v6912_v49 }
 0x978   :  { %6403 = vmatpush3.bf16.msra.mxu1 %v6402_v61 }
 0x979   :  { %6404 = vmatprep.subr.bf16.mxu1 %v6912_v49 }
 0x97a   :  { %6382 = vmatpush3.bf16.msra.mxu0 %v6381_v32  ;;  %v4573_v32 = vld [vmem:[#allocation9 + $0x70] sm:$0xff] }
 0x97b   :  { %6383 = vmatprep.subr.bf16.mxu0 %v6912_v49  ;;  %v6420_v9 = vpack.c.bf16 %v4574_v57, %v4573_v32 }
 0x97c   :  { %6406 = vmatpush3.bf16.msra.mxu1 %v6405_v58 }
 0x97d   :  { %6407 = vmatprep.subr.bf16.mxu1 %v6912_v49 }
 0x97e   :  { %6385 = vmatpush3.bf16.msra.mxu0 %v6384_v37  ;;  %v4724_v37 = vld [vmem:[%s8375_s8] ss:$0 sm:$0xff] }
 0x97f   :  { %6386 = vmatprep.subr.bf16.mxu0 %v6912_v49 }
 0x980   :  { %6409 = vmatpush3.bf16.msra.mxu1 %v6408_v47 }
 0x981   :  { %6410 = vmatprep.subr.bf16.mxu1 %v6912_v49 }
 0x982   :  { %6388 = vmatpush3.bf16.msra.mxu0 %v6387_v60 }
 0x983   :  { %6389 = vmatprep.subr.bf16.mxu0 %v6912_v49 }
 0x984   :  { %6412 = vmatpush3.bf16.msra.mxu1 %v6411_v46 }
 0x985   :  { %6413 = vmatprep.subr.bf16.mxu1 %v6912_v49 }
 0x986   :  { %6391 = vmatpush3.bf16.msra.mxu0 %v6390_v43 }
 0x987   :  { %6392 = vmatprep.subr.bf16.mxu0 %v6912_v49 }
 0x988   :  { %6415 = vmatpush3.bf16.msra.mxu1 %v6414_v13 }
 0x989   :  { %6416 = vmatprep.subr.bf16.mxu1 %v6912_v49 }
 0x98a   :  { %6394 = vmatpush3.bf16.msra.mxu0 %v6393_v42 }
 0x98b   :  { %6395 = vmatprep.subr.bf16.mxu0 %v6912_v49 }
 0x98c   :  { %6418 = vmatpush3.bf16.msra.mxu1 %v6417_v6 }
 0x98d   :  { %6419 = vmatprep.subr.bf16.mxu1 %v6912_v49 }
 0x98e   :  { %6397 = vmatpush3.bf16.msra.mxu0 %v6396_v29 }
 0x990   :  { %6421 = vmatpush3.bf16.msra.mxu1 %v6420_v9 }
 0xa44   :  { %v4361_v2 = vpop.f32.mrb[30].mxu0  ;;  %v4432_v26 = vpop.f32.mrb[30].mxu1 }
 0xa45   :  { %v4437_v30 = vadd.f32 %v4361_v2, %v9060_v20  ;;  %v4363_v4 = vpop.f32.mrb[31].mxu0  ;;  %v4434_v14 = vpop.f32.mrb[31].mxu1  ;;  %v4439_v41 = vadd.f32 %v4432_v26, %v8824_v33 }
 0xa46   :  { %v4438_v44 = vadd.f32 %v4363_v4, %v8823_v19  ;;  %v4440_v55 = vadd.f32 %v4434_v14, %v8762_v59 }
 0xa47   :  { %v4721_v12 = vmul.f32 -1.442695, %v4437_v30 }
 0xa48   :  { %v4722_v7 = vmul.f32 -1.442695, %v4438_v44  ;;  %v4723_v1 = vmul.f32 -1.442695, %v4440_v55 }
 0xa49   :  { %6770 = vpow2.f32 %v4721_v12 }
 0xa4a   :  { %6772 = vpow2.f32 %v4722_v7 }
 0xa4b   :  { %6774 = vpow2.f32 %v4723_v1 }
 0xa4c   :  { %6776 = vtanh.f32 %v4439_v41 }
 0xa53   :  { %v6771_v21 = vpop.eup %6770 }
 0xa54   :  { %v6773_v40 = vpop.eup %6772  ;;  %v4444_v0 = vadd.f32 1.0, %v6771_v21 }
 0xa55   :  { %v4450_v16 = vadd.f32 1.0, %v6773_v40  ;;  %v6775_v20 = vpop.eup %6774 }
 0xa56   :  { %6778 = vrcp.f32 %v4444_v0  ;;  %v6777_v3 = vpop.eup %6776  ;;  %v4457_v31 = vadd.f32 1.0, %v6775_v20 }
 0xa57   :  { %6780 = vrcp.f32 %v4450_v16 }
 0xa58   :  { %6782 = vrcp.f32 %v4457_v31 }
 0xa60   :  { %v6779_v19 = vpop.eup %6778 }
 0xa61   :  { %v6781_v49 = vpop.eup %6780  ;;  %v4461_v17 = vmul.f32 %v6779_v19, %v6777_v3 }
 0xa62   :  { %v4460_v10 = vmul.f32 %v6781_v49, %v8247_v38  ;;  %v6783_v33 = vpop.eup %6782  ;;  %v4725_v38 = vld [vmem:[%s8377_s10] ss:$0 sm:$0xff] }
 0xa64   :  { %v4462_v59 = vadd.f32 %v4461_v17, %v4460_v10 }
 0xa66   :  { %6784 = vtanh.f32 %v4462_v59 }
 0xa70   :  { %v6785_v23 = vpop.eup %6784 }
 0xa71   :  { %v4464_v27 = vmul.f32 %v6785_v23, %v6783_v33 }
 0xa73   :  { %4793 = vmatmul.mubr.f32.vlgmr.msra.gmra.mrb[32].mxu0 %v4464_v27 }
 0xb46   :  { %v4554_v18 = vpop.f32.mrb[32].mxu0 }
 0xb47   :  { %v4555_v52 = vadd.f32 %v4724_v37, %v4554_v18  ;;  %v4794_v60 = vpop.f32.mrb[33].mxu0 }
 0xb49   :  { %v4558_v11 = vmax.f32 %v4555_v52, 0.0 }
 0xb4b   :  { %4828 = vmatmul.mubr.f32.vlgmr.msra.gmra.mrb[32].mxu1 %v4558_v11 }
 0xc1e   :  { %v4648_v8 = vpop.f32.mrb[32].mxu1 }
 0xc1f   :  { %v4649_v5 = vadd.f32 %v4725_v38, %v4648_v8  ;;  %v4829_v43 = vpop.f32.mrb[33].mxu1 }
 0xc21   :  { %4652 = vst [vmem:[%s8378_s11] sm:$0xff] %v4649_v5 }
 0xc22   :  { %4657 = vsyncpa [#allocation3], 1 }
 0xc23   :  { %4658 = vsyncpa [#allocation5], 1 }
 0xc24   :  { %4659 = vsyncpa [#allocation8], 1 }

</bundles_post_ra>
